<compile_context>
chip_gen: v7x
topology: tpu7x:2x2x1
jax: 0.10.0
libtpu: 0.0.40
codegen_flags: <defaults>
</compile_context>

<pallas_src>
import functools

import numpy as np
import jax
import jax.numpy as jnp
from jax.experimental import pallas as pl
from jax.experimental.pallas import tpu as pltpu


_BB = 8  # images per grid step (multiple of 8 so the (BB, 10) logits block is legal)


# ---------------------------------------------------------------------------
# Fused kernel: one batch block per grid step
# ---------------------------------------------------------------------------
def _mnist_fused_kernel(x_ref, w1m_ref, b1_ref, w2m_ref, b2_ref, w3_ref, b3_ref, o_ref):
    """x_ref   : (32, BB, 28)   raw images, h-major / batch-minor, rows 28..31 zero-pad
       w1m_ref : (5, 28, 256)   banded exp(W1) per kernel-row ki; col = o*24 + w
       b1_ref  : (1, 240)       b1[o] + 25  at lane o*24 + w
       w2m_ref : (5, 240, 256)  banded W2 per ki; row = c*24 + 2*(w2+kj), col = u*8 + w2
       b2_ref  : (1, 160)       b2[u] at lane u*8 + w2
       w3_ref  : (4, 160, 10)   Linear weight per pooled row hq (zeros at odd lanes)
       b3_ref  : (1, 10)
       o_ref   : (BB, 10)       logits block
    """
    bb = x_ref.shape[1]
    f32 = jnp.float32

    # ---- Stage 1: CustomConv2d(1,10,5) = (b1 + 25) - exp(x) (conv) exp(w) ----
    ex = jnp.exp(x_ref[...])                  # one exp pass over the raw image
    ex2 = ex.reshape(32 * bb, 28)             # layout no-op (bb % 8 == 0)
    acc1 = None
    for ki in range(5):                       # width+channel taps on the MXU, height taps as adds
        g = jnp.dot(ex2, w1m_ref[ki], preferred_element_type=f32)   # (32*bb, 256)
        g = g.reshape(32, bb, 256)[ki:ki + 25, :, 0:241]
        acc1 = g if acc1 is None else acc1 + g                      # (25, bb, 241)
    # MaxPool2d(2) + ReLU, no downsample: relu(bias - min over the 2x2 window of acc1).
    mn = jnp.minimum(acc1[:, :, 0:240], acc1[:, :, 1:241])          # w neighbour
    mn = jnp.minimum(mn[0:24], mn[1:25])                            # h neighbour
    a1 = jnp.maximum(b1_ref[...] - mn, 0.0)                         # (24, bb, 240); pooled at even h/w

    # ---- Stage 2: Conv2d(10,20,5); stride-2 read of a1 folded into w2m's zeros ----
    a1_2 = a1.reshape(24 * bb, 240)                                  # layout no-op
    acc2 = None
    for ki in range(5):
        g = jnp.dot(a1_2, w2m_ref[ki], preferred_element_type=f32)   # (24*bb, 256)
        g = g.reshape(24, bb, 256)[2 * ki:2 * ki + 16, :, 0:161]
        acc2 = g if acc2 is None else acc2 + g                       # (16, bb, 161); valid rows s=2*h2
    # MaxPool2d(2) + ReLU: relu(max over the window + bias); pooled at rows {0,4,8,12}.
    mx = jnp.maximum(acc2[0:14], acc2[2:16])                         # h neighbour (+2 rows)
    mx = jnp.maximum(mx[:, :, 0:160], mx[:, :, 1:161])               # w neighbour
    r2 = jnp.maximum(mx + b2_ref[...], 0.0)                          # (14, bb, 160)

    # ---- Flatten + Linear(320, 10) on the MXU (selection folded into w3's zeros) ----
    out = b3_ref[...] + jnp.dot(r2[0], w3_ref[0], preferred_element_type=f32)
    for hq in range(1, 4):
        out = out + jnp.dot(r2[4 * hq], w3_ref[hq], preferred_element_type=f32)
    o_ref[...] = out                                                 # (bb, 10)


# ---------------------------------------------------------------------------
# One-time weight preparation (all reshuffling / exp(W) hoisted out of forward)
# ---------------------------------------------------------------------------
def prepare_params(params):
    w1, b1, w2, b2, w3, b3 = params
    f32 = jnp.float32

    # CustomConv2d: exp(W1) as 5 banded (28, 256) matrices (one per kernel row ki).
    ew1 = jnp.exp(w1.reshape(10, 5, 5).astype(f32))
    o, ki, kj, w = np.meshgrid(np.arange(10), np.arange(5), np.arange(5),
                               np.arange(24), indexing="ij")
    w1mat = jnp.zeros((5, 28, 256), f32).at[
        ki.ravel(), (w + kj).ravel(), (o * 24 + w).ravel()
    ].set(ew1[o.ravel(), ki.ravel(), kj.ravel()])
    bias1 = jnp.repeat(b1.astype(f32) + 25.0, 24).reshape(1, 240)    # K=25 folded into bias

    # Conv2d(10,20,5): banded matrices reading only the even (pooled) lanes of a1.
    w2f = w2.astype(f32)
    u, c, ki, kj, wo = np.meshgrid(np.arange(20), np.arange(10), np.arange(5),
                                   np.arange(5), np.arange(8), indexing="ij")
    w2mat = jnp.zeros((5, 240, 256), f32).at[
        ki.ravel(), (c * 24 + 2 * (wo + kj)).ravel(), (u * 8 + wo).ravel()
    ].set(w2f[u.ravel(), c.ravel(), ki.ravel(), kj.ravel()])
    bias2 = jnp.repeat(b2.astype(f32), 8).reshape(1, 160)

    # Linear(320,10): one (160,10) matrix per pooled output row hq; zeros at odd lanes
    # implement the stride-2 width selection for free.
    w3r = jnp.transpose(w3.astype(f32).reshape(10, 20, 4, 4), (2, 1, 3, 0))   # (hq, u, wq, j)
    w3sel = jnp.zeros((4, 20, 8, 10), f32).at[:, :, 0::2, :].set(w3r).reshape(4, 160, 10)
    bias3 = b3.astype(f32).reshape(1, 10)

    return w1mat, bias1, w2mat, bias2, w3sel, bias3


# ---------------------------------------------------------------------------
# Forward wrapper
# ---------------------------------------------------------------------------
def _mnist_forward_impl(x, prepared):
    """x: (N, 1, 28, 28) NCHW. Returns logits (N, 10)."""
    w1mat, bias1, w2mat, bias2, w3sel, bias3 = prepared
    n = x.shape[0]
    bb = _BB
    n_pad = (-n) % bb
    n_tot = n + n_pad

    xi = x.reshape(n, 28, 28)
    xi = jnp.pad(xi, ((0, n_pad), (0, 4), (0, 0)))     # (Ntot, 32, 28); pad rows never read
    xi = jnp.transpose(xi, (1, 0, 2))                  # (32, Ntot, 28): h-major, batch-minor

    out = pl.pallas_call(
        _mnist_fused_kernel,
        out_shape=jax.ShapeDtypeStruct((n_tot, 10), jnp.float32),
        grid=(n_tot // bb,),
        in_specs=[
            pl.BlockSpec((32, bb, 28), lambda i: (0, i, 0)),
            pl.BlockSpec((5, 28, 256), lambda i: (0, 0, 0)),
            pl.BlockSpec((1, 240), lambda i: (0, 0)),
            pl.BlockSpec((5, 240, 256), lambda i: (0, 0, 0)),
            pl.BlockSpec((1, 160), lambda i: (0, 0)),
            pl.BlockSpec((4, 160, 10), lambda i: (0, 0, 0)),
            pl.BlockSpec((1, 10), lambda i: (0, 0)),
        ],
        out_specs=pl.BlockSpec((bb, 10), lambda i: (i, 0)),
        compiler_params=pltpu.CompilerParams(dimension_semantics=("parallel",)),
    )(xi, w1mat, bias1, w2mat, bias2, w3sel, bias3)
    return out[:n]


mnist_net_forward = jax.jit(_mnist_forward_impl)


# ---------------------------------------------------------------------------
# Pure-JAX reference with the literal PyTorch semantics (for validation)
# ---------------------------------------------------------------------------
def reference_forward(x, params):
    w1, b1, w2, b2, w3, b3 = params
    n, c, h, w = x.shape
    k = 5
    ho, wo = h - k + 1, w - k + 1

    cols = []
    for cc in range(c):
        for i in range(k):
            for j in range(k):
                cols.append(x[:, cc, i:i + ho, j:j + wo].reshape(n, ho * wo))
    pat = jnp.stack(cols, axis=1).reshape(n, c, k, k, ho * wo)
    pat = jnp.transpose(pat, (0, 4, 1, 2, 3))                 # (N, L, C, k, k)
    ws = pat[:, None] + w1[None, :, None]                     # (N, O, L, C, k, k)
    out1 = (1.0 - jnp.exp(ws)).sum(axis=(3, 4, 5))            # (N, O, L)
    out1 = out1.reshape(n, 10, ho, wo) + b1[None, :, None, None]

    def pool(y):
        nn, cc_, hh, ww = y.shape
        return y.reshape(nn, cc_, hh // 2, 2, ww // 2, 2).max(axis=(3, 5))

    y = jax.nn.relu(pool(out1))
    y = jax.lax.conv_general_dilated(
        y, w2, (1, 1), "VALID", dimension_numbers=("NCHW", "OIHW", "NCHW")
    ) + b2[None, :, None, None]
    y = jax.nn.relu(pool(y))
    flat = y.reshape(n, -1)
    return flat @ w3.T + b3


if __name__ == "__main__":
    key = jax.random.PRNGKey(0)
    kx, k1, k2, kb2, k3, kb3 = jax.random.split(key, 6)

    n = 16  # two batch blocks of 8 -> 2 grid steps (pipelining / megacore sharding)
    # Input spatial shape is forced by Linear(320, 10): 1 channel, 28x28 (MNIST).
    x = 0.1 * jax.random.normal(kx, (n, 1, 28, 28), jnp.float32)

    # Synthetic parameters with the torch module's shapes / init conventions.
    w1 = 0.1 * jax.random.normal(k1, (10, 1, 5, 5), jnp.float32)     # CustomConv2d.weight
    b1 = jnp.zeros((10,), jnp.float32)                               # CustomConv2d.bias (zeros init)
    w2 = 0.1 * jax.random.normal(k2, (20, 10, 5, 5), jnp.float32)    # Conv2d.weight
    b2 = 0.1 * jax.random.normal(kb2, (20,), jnp.float32)            # Conv2d.bias
    w3 = 0.05 * jax.random.normal(k3, (10, 320), jnp.float32)        # Linear.weight
    b3 = 0.05 * jax.random.normal(kb3, (10,), jnp.float32)           # Linear.bias
    params = (w1, b1, w2, b2, w3, b3)

    prepared = prepare_params(params)            # one-time weight prep (hoisted)

    out = jax.block_until_ready(mnist_net_forward(x, prepared))
    assert out.shape == (n, 10), out.shape

    ref = jax.block_until_ready(reference_forward(x, params))
    err = float(jnp.max(jnp.abs(out - ref)))
    assert jnp.allclose(out, ref, atol=5e-2, rtol=5e-2), err

    print("KERNEL_OK")
</pallas_src>

<mosaic_0001>
module attributes {stable_mosaic.version = 11 : i64} {
  func.func @_mnist_fused_kernel(%arg0: i32, %arg1: memref<32x8x28xf32, #tpu.memory_space<vmem>>, %arg2: memref<5x28x256xf32, #tpu.memory_space<vmem>>, %arg3: memref<1x240xf32, #tpu.memory_space<vmem>>, %arg4: memref<5x240x256xf32, #tpu.memory_space<vmem>>, %arg5: memref<1x160xf32, #tpu.memory_space<vmem>>, %arg6: memref<4x160x10xf32, #tpu.memory_space<vmem>>, %arg7: memref<1x10xf32, #tpu.memory_space<vmem>>, %arg8: memref<8x10xf32, #tpu.memory_space<vmem>>) attributes {dimension_semantics = [#tpu.dimension_semantics<parallel>], iteration_bounds = array<i64: 2>, scalar_prefetch = 0 : i64, scratch_operands = 0 : i64, tpu.core_type = #tpu.core_type<tc>, window_params = [{transform_indices = @transform_0, window_bounds = array<i64: 32, 8, 28>}, {pipeline_mode = #tpu.pipeline_mode<synchronous>, transform_indices = @transform_1, window_bounds = array<i64: 5, 28, 256>}, {pipeline_mode = #tpu.pipeline_mode<synchronous>, transform_indices = @transform_2, window_bounds = array<i64: 1, 240>}, {pipeline_mode = #tpu.pipeline_mode<synchronous>, transform_indices = @transform_3, window_bounds = array<i64: 5, 240, 256>}, {pipeline_mode = #tpu.pipeline_mode<synchronous>, transform_indices = @transform_4, window_bounds = array<i64: 1, 160>}, {pipeline_mode = #tpu.pipeline_mode<synchronous>, transform_indices = @transform_5, window_bounds = array<i64: 4, 160, 10>}, {pipeline_mode = #tpu.pipeline_mode<synchronous>, transform_indices = @transform_6, window_bounds = array<i64: 1, 10>}, {transform_indices = @transform_7, window_bounds = array<i64: 8, 10>}]} {
    %c0 = arith.constant 0 : index
    %c0_0 = arith.constant 0 : index
    %c0_1 = arith.constant 0 : index
    %0 = vector.load %arg1[%c0, %c0_0, %c0_1] : memref<32x8x28xf32, #tpu.memory_space<vmem>>, vector<32x8x28xf32>
    %1 = math.exp %0 : vector<32x8x28xf32>
    %2 = vector.shape_cast %1 : vector<32x8x28xf32> to vector<256x28xf32>
    %c0_2 = arith.constant 0 : index
    %c0_3 = arith.constant 0 : index
    %c0_4 = arith.constant 0 : index
    %3 = vector.load %arg2[%c0_2, %c0_3, %c0_4] : memref<5x28x256xf32, #tpu.memory_space<vmem>>, vector<1x28x256xf32>
    %4 = vector.shape_cast %3 : vector<1x28x256xf32> to vector<28x256xf32>
    %cst = arith.constant dense<0.000000e+00> : vector<256x256xf32>
    %5 = tpu.matmul %2, %4, %cst {dimension_numbers = #tpu.dot_dimension_numbers<[1], [0], [0], [1], [0, 0, 1, 1], [], []>} : vector<256x28xf32>, vector<28x256xf32>, vector<256x256xf32> -> vector<256x256xf32>
    %6 = vector.shape_cast %5 : vector<256x256xf32> to vector<32x8x256xf32>
    %7 = vector.extract_strided_slice %6 {offsets = [0, 0, 0], sizes = [25, 8, 241], strides = [1, 1, 1]} : vector<32x8x256xf32> to vector<25x8x241xf32>
    %c1 = arith.constant 1 : index
    %c0_5 = arith.constant 0 : index
    %c0_6 = arith.constant 0 : index
    %8 = vector.load %arg2[%c1, %c0_5, %c0_6] : memref<5x28x256xf32, #tpu.memory_space<vmem>>, vector<1x28x256xf32>
    %9 = vector.shape_cast %8 : vector<1x28x256xf32> to vector<28x256xf32>
    %cst_7 = arith.constant dense<0.000000e+00> : vector<256x256xf32>
    %10 = tpu.matmul %2, %9, %cst_7 {dimension_numbers = #tpu.dot_dimension_numbers<[1], [0], [0], [1], [0, 0, 1, 1], [], []>} : vector<256x28xf32>, vector<28x256xf32>, vector<256x256xf32> -> vector<256x256xf32>
    %11 = vector.shape_cast %10 : vector<256x256xf32> to vector<32x8x256xf32>
    %12 = vector.extract_strided_slice %11 {offsets = [1, 0, 0], sizes = [25, 8, 241], strides = [1, 1, 1]} : vector<32x8x256xf32> to vector<25x8x241xf32>
    %13 = arith.addf %7, %12 : vector<25x8x241xf32>
    %c2 = arith.constant 2 : index
    %c0_8 = arith.constant 0 : index
    %c0_9 = arith.constant 0 : index
    %14 = vector.load %arg2[%c2, %c0_8, %c0_9] : memref<5x28x256xf32, #tpu.memory_space<vmem>>, vector<1x28x256xf32>
    %15 = vector.shape_cast %14 : vector<1x28x256xf32> to vector<28x256xf32>
    %cst_10 = arith.constant dense<0.000000e+00> : vector<256x256xf32>
    %16 = tpu.matmul %2, %15, %cst_10 {dimension_numbers = #tpu.dot_dimension_numbers<[1], [0], [0], [1], [0, 0, 1, 1], [], []>} : vector<256x28xf32>, vector<28x256xf32>, vector<256x256xf32> -> vector<256x256xf32>
    %17 = vector.shape_cast %16 : vector<256x256xf32> to vector<32x8x256xf32>
    %18 = vector.extract_strided_slice %17 {offsets = [2, 0, 0], sizes = [25, 8, 241], strides = [1, 1, 1]} : vector<32x8x256xf32> to vector<25x8x241xf32>
    %19 = arith.addf %13, %18 : vector<25x8x241xf32>
    %c3 = arith.constant 3 : index
    %c0_11 = arith.constant 0 : index
    %c0_12 = arith.constant 0 : index
    %20 = vector.load %arg2[%c3, %c0_11, %c0_12] : memref<5x28x256xf32, #tpu.memory_space<vmem>>, vector<1x28x256xf32>
    %21 = vector.shape_cast %20 : vector<1x28x256xf32> to vector<28x256xf32>
    %cst_13 = arith.constant dense<0.000000e+00> : vector<256x256xf32>
    %22 = tpu.matmul %2, %21, %cst_13 {dimension_numbers = #tpu.dot_dimension_numbers<[1], [0], [0], [1], [0, 0, 1, 1], [], []>} : vector<256x28xf32>, vector<28x256xf32>, vector<256x256xf32> -> vector<256x256xf32>
    %23 = vector.shape_cast %22 : vector<256x256xf32> to vector<32x8x256xf32>
    %24 = vector.extract_strided_slice %23 {offsets = [3, 0, 0], sizes = [25, 8, 241], strides = [1, 1, 1]} : vector<32x8x256xf32> to vector<25x8x241xf32>
    %25 = arith.addf %19, %24 : vector<25x8x241xf32>
    %c4 = arith.constant 4 : index
    %c0_14 = arith.constant 0 : index
    %c0_15 = arith.constant 0 : index
    %26 = vector.load %arg2[%c4, %c0_14, %c0_15] : memref<5x28x256xf32, #tpu.memory_space<vmem>>, vector<1x28x256xf32>
    %27 = vector.shape_cast %26 : vector<1x28x256xf32> to vector<28x256xf32>
    %cst_16 = arith.constant dense<0.000000e+00> : vector<256x256xf32>
    %28 = tpu.matmul %2, %27, %cst_16 {dimension_numbers = #tpu.dot_dimension_numbers<[1], [0], [0], [1], [0, 0, 1, 1], [], []>} : vector<256x28xf32>, vector<28x256xf32>, vector<256x256xf32> -> vector<256x256xf32>
    %29 = vector.shape_cast %28 : vector<256x256xf32> to vector<32x8x256xf32>
    %30 = vector.extract_strided_slice %29 {offsets = [4, 0, 0], sizes = [25, 8, 241], strides = [1, 1, 1]} : vector<32x8x256xf32> to vector<25x8x241xf32>
    %31 = arith.addf %25, %30 : vector<25x8x241xf32>
    %32 = vector.extract_strided_slice %31 {offsets = [0, 0, 0], sizes = [25, 8, 240], strides = [1, 1, 1]} : vector<25x8x241xf32> to vector<25x8x240xf32>
    %33 = vector.extract_strided_slice %31 {offsets = [0, 0, 1], sizes = [25, 8, 240], strides = [1, 1, 1]} : vector<25x8x241xf32> to vector<25x8x240xf32>
    %34 = arith.minimumf %32, %33 : vector<25x8x240xf32>
    %35 = vector.extract_strided_slice %34 {offsets = [0, 0, 0], sizes = [24, 8, 240], strides = [1, 1, 1]} : vector<25x8x240xf32> to vector<24x8x240xf32>
    %36 = vector.extract_strided_slice %34 {offsets = [1, 0, 0], sizes = [24, 8, 240], strides = [1, 1, 1]} : vector<25x8x240xf32> to vector<24x8x240xf32>
    %37 = arith.minimumf %35, %36 : vector<24x8x240xf32>
    %c0_17 = arith.constant 0 : index
    %c0_18 = arith.constant 0 : index
    %38 = vector.load %arg3[%c0_17, %c0_18] : memref<1x240xf32, #tpu.memory_space<vmem>>, vector<1x240xf32>
    %39 = vector.shape_cast %38 : vector<1x240xf32> to vector<1x1x240xf32>
    %40 = vector.broadcast %39 : vector<1x1x240xf32> to vector<24x8x240xf32>
    %41 = arith.subf %40, %37 : vector<24x8x240xf32>
    %cst_19 = arith.constant 0.000000e+00 : f32
    %42 = vector.broadcast %cst_19 : f32 to vector<24x8x240xf32>
    %43 = arith.maximumf %41, %42 : vector<24x8x240xf32>
    %44 = vector.shape_cast %43 : vector<24x8x240xf32> to vector<192x240xf32>
    %c0_20 = arith.constant 0 : index
    %c0_21 = arith.constant 0 : index
    %c0_22 = arith.constant 0 : index
    %45 = vector.load %arg4[%c0_20, %c0_21, %c0_22] : memref<5x240x256xf32, #tpu.memory_space<vmem>>, vector<1x240x256xf32>
    %46 = vector.shape_cast %45 : vector<1x240x256xf32> to vector<240x256xf32>
    %cst_23 = arith.constant dense<0.000000e+00> : vector<192x256xf32>
    %47 = tpu.matmul %44, %46, %cst_23 {dimension_numbers = #tpu.dot_dimension_numbers<[1], [0], [0], [1], [0, 0, 1, 1], [], []>} : vector<192x240xf32>, vector<240x256xf32>, vector<192x256xf32> -> vector<192x256xf32>
    %48 = vector.shape_cast %47 : vector<192x256xf32> to vector<24x8x256xf32>
    %49 = vector.extract_strided_slice %48 {offsets = [0, 0, 0], sizes = [16, 8, 161], strides = [1, 1, 1]} : vector<24x8x256xf32> to vector<16x8x161xf32>
    %c1_24 = arith.constant 1 : index
    %c0_25 = arith.constant 0 : index
    %c0_26 = arith.constant 0 : index
    %50 = vector.load %arg4[%c1_24, %c0_25, %c0_26] : memref<5x240x256xf32, #tpu.memory_space<vmem>>, vector<1x240x256xf32>
    %51 = vector.shape_cast %50 : vector<1x240x256xf32> to vector<240x256xf32>
    %cst_27 = arith.constant dense<0.000000e+00> : vector<192x256xf32>
    %52 = tpu.matmul %44, %51, %cst_27 {dimension_numbers = #tpu.dot_dimension_numbers<[1], [0], [0], [1], [0, 0, 1, 1], [], []>} : vector<192x240xf32>, vector<240x256xf32>, vector<192x256xf32> -> vector<192x256xf32>
    %53 = vector.shape_cast %52 : vector<192x256xf32> to vector<24x8x256xf32>
    %54 = vector.extract_strided_slice %53 {offsets = [2, 0, 0], sizes = [16, 8, 161], strides = [1, 1, 1]} : vector<24x8x256xf32> to vector<16x8x161xf32>
    %55 = arith.addf %49, %54 : vector<16x8x161xf32>
    %c2_28 = arith.constant 2 : index
    %c0_29 = arith.constant 0 : index
    %c0_30 = arith.constant 0 : index
    %56 = vector.load %arg4[%c2_28, %c0_29, %c0_30] : memref<5x240x256xf32, #tpu.memory_space<vmem>>, vector<1x240x256xf32>
    %57 = vector.shape_cast %56 : vector<1x240x256xf32> to vector<240x256xf32>
    %cst_31 = arith.constant dense<0.000000e+00> : vector<192x256xf32>
    %58 = tpu.matmul %44, %57, %cst_31 {dimension_numbers = #tpu.dot_dimension_numbers<[1], [0], [0], [1], [0, 0, 1, 1], [], []>} : vector<192x240xf32>, vector<240x256xf32>, vector<192x256xf32> -> vector<192x256xf32>
    %59 = vector.shape_cast %58 : vector<192x256xf32> to vector<24x8x256xf32>
    %60 = vector.extract_strided_slice %59 {offsets = [4, 0, 0], sizes = [16, 8, 161], strides = [1, 1, 1]} : vector<24x8x256xf32> to vector<16x8x161xf32>
    %61 = arith.addf %55, %60 : vector<16x8x161xf32>
    %c3_32 = arith.constant 3 : index
    %c0_33 = arith.constant 0 : index
    %c0_34 = arith.constant 0 : index
    %62 = vector.load %arg4[%c3_32, %c0_33, %c0_34] : memref<5x240x256xf32, #tpu.memory_space<vmem>>, vector<1x240x256xf32>
    %63 = vector.shape_cast %62 : vector<1x240x256xf32> to vector<240x256xf32>
    %cst_35 = arith.constant dense<0.000000e+00> : vector<192x256xf32>
    %64 = tpu.matmul %44, %63, %cst_35 {dimension_numbers = #tpu.dot_dimension_numbers<[1], [0], [0], [1], [0, 0, 1, 1], [], []>} : vector<192x240xf32>, vector<240x256xf32>, vector<192x256xf32> -> vector<192x256xf32>
    %65 = vector.shape_cast %64 : vector<192x256xf32> to vector<24x8x256xf32>
    %66 = vector.extract_strided_slice %65 {offsets = [6, 0, 0], sizes = [16, 8, 161], strides = [1, 1, 1]} : vector<24x8x256xf32> to vector<16x8x161xf32>
    %67 = arith.addf %61, %66 : vector<16x8x161xf32>
    %c4_36 = arith.constant 4 : index
    %c0_37 = arith.constant 0 : index
    %c0_38 = arith.constant 0 : index
    %68 = vector.load %arg4[%c4_36, %c0_37, %c0_38] : memref<5x240x256xf32, #tpu.memory_space<vmem>>, vector<1x240x256xf32>
    %69 = vector.shape_cast %68 : vector<1x240x256xf32> to vector<240x256xf32>
    %cst_39 = arith.constant dense<0.000000e+00> : vector<192x256xf32>
    %70 = tpu.matmul %44, %69, %cst_39 {dimension_numbers = #tpu.dot_dimension_numbers<[1], [0], [0], [1], [0, 0, 1, 1], [], []>} : vector<192x240xf32>, vector<240x256xf32>, vector<192x256xf32> -> vector<192x256xf32>
    %71 = vector.shape_cast %70 : vector<192x256xf32> to vector<24x8x256xf32>
    %72 = vector.extract_strided_slice %71 {offsets = [8, 0, 0], sizes = [16, 8, 161], strides = [1, 1, 1]} : vector<24x8x256xf32> to vector<16x8x161xf32>
    %73 = arith.addf %67, %72 : vector<16x8x161xf32>
    %74 = vector.extract_strided_slice %73 {offsets = [0, 0, 0], sizes = [14, 8, 161], strides = [1, 1, 1]} : vector<16x8x161xf32> to vector<14x8x161xf32>
    %75 = vector.extract_strided_slice %73 {offsets = [2, 0, 0], sizes = [14, 8, 161], strides = [1, 1, 1]} : vector<16x8x161xf32> to vector<14x8x161xf32>
    %76 = arith.maximumf %74, %75 : vector<14x8x161xf32>
    %77 = vector.extract_strided_slice %76 {offsets = [0, 0, 0], sizes = [14, 8, 160], strides = [1, 1, 1]} : vector<14x8x161xf32> to vector<14x8x160xf32>
    %78 = vector.extract_strided_slice %76 {offsets = [0, 0, 1], sizes = [14, 8, 160], strides = [1, 1, 1]} : vector<14x8x161xf32> to vector<14x8x160xf32>
    %79 = arith.maximumf %77, %78 : vector<14x8x160xf32>
    %c0_40 = arith.constant 0 : index
    %c0_41 = arith.constant 0 : index
    %80 = vector.load %arg5[%c0_40, %c0_41] : memref<1x160xf32, #tpu.memory_space<vmem>>, vector<1x160xf32>
    %81 = vector.shape_cast %80 : vector<1x160xf32> to vector<1x1x160xf32>
    %82 = vector.broadcast %81 : vector<1x1x160xf32> to vector<14x8x160xf32>
    %83 = arith.addf %79, %82 : vector<14x8x160xf32>
    %cst_42 = arith.constant 0.000000e+00 : f32
    %84 = vector.broadcast %cst_42 : f32 to vector<14x8x160xf32>
    %85 = arith.maximumf %83, %84 : vector<14x8x160xf32>
    %c0_43 = arith.constant 0 : index
    %c0_44 = arith.constant 0 : index
    %86 = vector.load %arg7[%c0_43, %c0_44] : memref<1x10xf32, #tpu.memory_space<vmem>>, vector<1x10xf32>
    %87 = vector.extract_strided_slice %85 {offsets = [0, 0, 0], sizes = [1, 8, 160], strides = [1, 1, 1]} : vector<14x8x160xf32> to vector<1x8x160xf32>
    %88 = vector.shape_cast %87 : vector<1x8x160xf32> to vector<8x160xf32>
    %c0_45 = arith.constant 0 : index
    %c0_46 = arith.constant 0 : index
    %c0_47 = arith.constant 0 : index
    %89 = vector.load %arg6[%c0_45, %c0_46, %c0_47] : memref<4x160x10xf32, #tpu.memory_space<vmem>>, vector<1x160x10xf32>
    %90 = vector.shape_cast %89 : vector<1x160x10xf32> to vector<160x10xf32>
    %cst_48 = arith.constant dense<0.000000e+00> : vector<8x10xf32>
    %91 = tpu.matmul %88, %90, %cst_48 {dimension_numbers = #tpu.dot_dimension_numbers<[1], [0], [0], [1], [0, 0, 1, 1], [], []>} : vector<8x160xf32>, vector<160x10xf32>, vector<8x10xf32> -> vector<8x10xf32>
    %92 = vector.broadcast %86 : vector<1x10xf32> to vector<8x10xf32>
    %93 = arith.addf %92, %91 : vector<8x10xf32>
    %94 = vector.extract_strided_slice %85 {offsets = [4, 0, 0], sizes = [1, 8, 160], strides = [1, 1, 1]} : vector<14x8x160xf32> to vector<1x8x160xf32>
    %95 = vector.shape_cast %94 : vector<1x8x160xf32> to vector<8x160xf32>
    %c1_49 = arith.constant 1 : index
    %c0_50 = arith.constant 0 : index
    %c0_51 = arith.constant 0 : index
    %96 = vector.load %arg6[%c1_49, %c0_50, %c0_51] : memref<4x160x10xf32, #tpu.memory_space<vmem>>, vector<1x160x10xf32>
    %97 = vector.shape_cast %96 : vector<1x160x10xf32> to vector<160x10xf32>
    %cst_52 = arith.constant dense<0.000000e+00> : vector<8x10xf32>
    %98 = tpu.matmul %95, %97, %cst_52 {dimension_numbers = #tpu.dot_dimension_numbers<[1], [0], [0], [1], [0, 0, 1, 1], [], []>} : vector<8x160xf32>, vector<160x10xf32>, vector<8x10xf32> -> vector<8x10xf32>
    %99 = arith.addf %93, %98 : vector<8x10xf32>
    %100 = vector.extract_strided_slice %85 {offsets = [8, 0, 0], sizes = [1, 8, 160], strides = [1, 1, 1]} : vector<14x8x160xf32> to vector<1x8x160xf32>
    %101 = vector.shape_cast %100 : vector<1x8x160xf32> to vector<8x160xf32>
    %c2_53 = arith.constant 2 : index
    %c0_54 = arith.constant 0 : index
    %c0_55 = arith.constant 0 : index
    %102 = vector.load %arg6[%c2_53, %c0_54, %c0_55] : memref<4x160x10xf32, #tpu.memory_space<vmem>>, vector<1x160x10xf32>
    %103 = vector.shape_cast %102 : vector<1x160x10xf32> to vector<160x10xf32>
    %cst_56 = arith.constant dense<0.000000e+00> : vector<8x10xf32>
    %104 = tpu.matmul %101, %103, %cst_56 {dimension_numbers = #tpu.dot_dimension_numbers<[1], [0], [0], [1], [0, 0, 1, 1], [], []>} : vector<8x160xf32>, vector<160x10xf32>, vector<8x10xf32> -> vector<8x10xf32>
    %105 = arith.addf %99, %104 : vector<8x10xf32>
    %106 = vector.extract_strided_slice %85 {offsets = [12, 0, 0], sizes = [1, 8, 160], strides = [1, 1, 1]} : vector<14x8x160xf32> to vector<1x8x160xf32>
    %107 = vector.shape_cast %106 : vector<1x8x160xf32> to vector<8x160xf32>
    %c3_57 = arith.constant 3 : index
    %c0_58 = arith.constant 0 : index
    %c0_59 = arith.constant 0 : index
    %108 = vector.load %arg6[%c3_57, %c0_58, %c0_59] : memref<4x160x10xf32, #tpu.memory_space<vmem>>, vector<1x160x10xf32>
    %109 = vector.shape_cast %108 : vector<1x160x10xf32> to vector<160x10xf32>
    %cst_60 = arith.constant dense<0.000000e+00> : vector<8x10xf32>
    %110 = tpu.matmul %107, %109, %cst_60 {dimension_numbers = #tpu.dot_dimension_numbers<[1], [0], [0], [1], [0, 0, 1, 1], [], []>} : vector<8x160xf32>, vector<160x10xf32>, vector<8x10xf32> -> vector<8x10xf32>
    %111 = arith.addf %105, %110 : vector<8x10xf32>
    %c0_61 = arith.constant 0 : index
    %c0_62 = arith.constant 0 : index
    %112 = vector.load %arg8[%c0_61, %c0_62] : memref<8x10xf32, #tpu.memory_space<vmem>>, vector<8x10xf32>
    tpu.vector_store %arg8[%c0_61, %c0_62], %111 {strides = array<i32>} : memref<8x10xf32, #tpu.memory_space<vmem>>, vector<8x10xf32>,
    return
  }
  func.func @transform_0(%arg0: i32) -> (i32, i32, i32) {
    %c0_i32 = arith.constant 0 : i32
    %c0_i32_0 = arith.constant 0 : i32
    %c0_i32_1 = arith.constant 0 : i32
    return %c0_i32, %arg0, %c0_i32_0 : i32, i32, i32
  }
  func.func @transform_1(%arg0: i32) -> (i32, i32, i32) {
    %c0_i32 = arith.constant 0 : i32
    %c0_i32_0 = arith.constant 0 : i32
    %c0_i32_1 = arith.constant 0 : i32
    %c0_i32_2 = arith.constant 0 : i32
    return %c0_i32, %c0_i32_0, %c0_i32_1 : i32, i32, i32
  }
  func.func @transform_2(%arg0: i32) -> (i32, i32) {
    %c0_i32 = arith.constant 0 : i32
    %c0_i32_0 = arith.constant 0 : i32
    %c0_i32_1 = arith.constant 0 : i32
    return %c0_i32, %c0_i32_0 : i32, i32
  }
  func.func @transform_3(%arg0: i32) -> (i32, i32, i32) {
    %c0_i32 = arith.constant 0 : i32
    %c0_i32_0 = arith.constant 0 : i32
    %c0_i32_1 = arith.constant 0 : i32
    %c0_i32_2 = arith.constant 0 : i32
    return %c0_i32, %c0_i32_0, %c0_i32_1 : i32, i32, i32
  }
  func.func @transform_4(%arg0: i32) -> (i32, i32) {
    %c0_i32 = arith.constant 0 : i32
    %c0_i32_0 = arith.constant 0 : i32
    %c0_i32_1 = arith.constant 0 : i32
    return %c0_i32, %c0_i32_0 : i32, i32
  }
  func.func @transform_5(%arg0: i32) -> (i32, i32, i32) {
    %c0_i32 = arith.constant 0 : i32
    %c0_i32_0 = arith.constant 0 : i32
    %c0_i32_1 = arith.constant 0 : i32
    %c0_i32_2 = arith.constant 0 : i32
    return %c0_i32, %c0_i32_0, %c0_i32_1 : i32, i32, i32
  }
  func.func @transform_6(%arg0: i32) -> (i32, i32) {
    %c0_i32 = arith.constant 0 : i32
    %c0_i32_0 = arith.constant 0 : i32
    %c0_i32_1 = arith.constant 0 : i32
    return %c0_i32, %c0_i32_0 : i32, i32
  }
  func.func @transform_7(%arg0: i32) -> (i32, i32) {
    %c0_i32 = arith.constant 0 : i32
    %c0_i32_0 = arith.constant 0 : i32
    return %arg0, %c0_i32 : i32, i32
  }
}

</mosaic_0001>

<bundles_post_ra>
// kernel: _mnist_forward_impl.1
= control target key start
LH: loop header
LB: loop body
LE: loop exit
PB: predicated region body
PF: predicated region fallthrough
CT: control target
= control target key end

     0   :  { %12 = vsyncpa [#allocation4], 0  ;;  %s8921_s0 = inlined_call_operand.vmem [shape: f32[32,16,28], index: 0, kind: input, shape index: {}]   ;;  %s8922_s1 = inlined_call_operand.hbm [shape: f32[5,28,256], index: 1, kind: input, shape index: {}]   ;;  %s8923_s2 = inlined_call_operand.vmem [shape: f32[1,240], index: 2, kind: input, shape index: {}]   ;;  %s8924_s3 = inlined_call_operand.vmem [shape: f32[5,240,256], index: 3, kind: input, shape index: {}]   ;;  %s8925_s4 = inlined_call_operand.vmem [shape: f32[1,160], index: 4, kind: input, shape index: {}]   ;;  %s8926_s5 = inlined_call_operand.vmem [shape: f32[4,160,10], index: 5, kind: input, shape index: {}]   ;;  %s8927_s6 = inlined_call_operand.vmem [shape: f32[1,10], index: 6, kind: input, shape index: {}]   ;;  %s8928_s7 = inlined_call_operand.hbm [shape: f32[16,10], index: 7, kind: output, shape index: {}]  }
   0x1   :  { %13 = vsyncpa [#allocation5], 0 }
   0x2   :  { %15 = vsyncpa [#allocation5 + $0x1], 0  ;;  %s6064_s24 = smov 0   ;;  %s6066_s25 = smov 0  }
   0x3   :  { %s6068_s26 = smov 0   ;;  %s6070_s27 = smov 0  }
   0x4 LB: > { %s6085_s28 = sadd.s32 4294967295, %s6014_s27   ;;  %s4451_s29 = sadd.s32 4294967294, %s6014_s27   ;;  %s6014_s27 = sphi %s6070_s27, %s8979_s27   ;;  %s6010_s26 = sphi %s6068_s26, %s8978_s26   ;;  %s6006_s25 = sphi %s6066_s25, %s8977_s25   ;;  %s6002_s24 = sphi %s6064_s24, %s8976_s24  }
   0x5   : > { %s6089_s30 = sadd.s32 1, %s6014_s27   ;;  %s28_s8 = sadd.s32 1, %s6010_s26 }
   0x6   : > { %s25_s9 = ssub.s32 %s6014_s27, %s6089_s30  ;;  %p35_p0 = scmp.ne.s32.totalorder %s6010_s26, %s6006_s25 }
   0x7   : > { %p26_p1 = scmp.eq.s32.totalorder %s25_s9, 0  ;;  %p36_p2 = scmp.eq.s32.totalorder %s6014_s27, 0 }
   0x8   : > { %p191_p3 = scmp.eq.s32.totalorder %s6085_s28, 1  ;;  %p196_p4 = scmp.ne.s32.totalorder %s6006_s25, %s6002_s24 }
   0x9   : > { %s6101_s10 = scalar_select %p26_p1, %s6010_s26, %s28_s8  }
   0xa   : > { %p6103_p5 = por %p36_p2, %p35_p0  ;;  %p6107_p6 = por %p191_p3, %p35_p0 }
   0xb   : > { %p197_p7 = scmp.eq.s32.totalorder %s4451_s29, 1  ;;  %p4452_p8 = scmp.ge.s32.totalorder %s6014_s27, 1 }
   0xc   : > { %s8945_s11 = scalar_select %p6103_p5, 1, 0 }
   0xd   : > { %s8946_s12 = scalar_select %p6107_p6, 1, 0 }
   0xe   : > { %p204_p9 = scmp.lt.s32.totalorder %s6014_s27, 3  ;;  %p6113_p10 = por %p197_p7, %p196_p4 }
   0xf   : > { %p8929_p11 = scmp.eq.s32.totalorder %s6085_s28, 0  ;;  %s6016_s15 = smov [#allocation3]  }
  0x10   : > { %s8947_s13 = scalar_select %p6113_p10, 1, 0 }
  0x11   : > { %p6118_p12 = pnand %p4452_p8, %p204_p9  ;;  %s216_s16 = sshll.u32 %s6016_s15, 4  ;;  %s217_s16 = int_to_ptr.vmem [resolvable:$true] %s216_s16 }
  0x12   : > { %s5920_s20 = scalar_lea.hbm %s8922_s1, 5120 }
  0x13   : > { %s8948_s14 = scalar_select %p6118_p12, 1, 0 }
  0x14   : > { %p5806_p13 = pneg %p6118_p12  ;;  %p5921_p1 = scmp.ne.s32.totalorder %s8922_s1, %s5920_s20 }
  0x15   : > { %p5927_p7 = scmp.lt.u32.totalorder %s5920_s20, %s8922_s1 }
  0x16   : > { %p6126_p0 = pnand %p8929_p11, %p5806_p13 }
  0x18   : > { %p5922_p2 = pneg %p6126_p0 }
  0x1a   : > { %p5923_p3 = pnand %p5922_p2, %p5921_p1 }
  0x1c   : > { %p5924_p4 = pneg %p5923_p3 }
  0x1e   : > { %p5929_p8 = pnand %p5927_p7, %p5924_p4 }
  0x20   : > { %5932 = shalt.err (!%p5929_p8)
}
  0x21   : > { %s5933_s8 = scalar_lea.vmem %s217_s16, 5120  ;;  %p5941_p10 = scmp.lt.s32.totalorder %s217_s16, %s217_s16 }
  0x22   : > { %p5934_p9 = scmp.ne.s32.totalorder %s217_s16, %s5933_s8  ;;  %p5942_p6 = scmp.lt.s32.totalorder %s5933_s8, %s5933_s8 }
  0x24   : > { %p5936_p13 = pnand %p5934_p9, %p5922_p2  ;;  %p5943_p12 = por %p5942_p6, %p5941_p10 }
  0x26   : > { %p5937_p11 = pneg %p5936_p13 }
  0x28   : > { %p5944_p5 = pnand %p5943_p12, %p5937_p11 }
  0x2a   : > { %5947 = shalt.err (!%p5944_p5)
}
  0x2b   : > { %s6017_s9 = smov 256   ;;  %s6018_s15 = smov 16  }
  0x2c   : > { %5809 = dma.hbm_to_vmem [thread:$0]  (!%p6126_p0), %s8922_s1, 5120, %s217_s16, [#allocation4], %s6017_s9, %s6017_s9, %s6018_s15  }
  0x2d   : > { %p4454_p1 = scmp.ge.s32.totalorder %s6014_s27, 2 }
  0x2e   : > { %p8950_p2 = scmp.ne.s32.totalorder (!%p4454_p1), %s8945_s11, 0 }
  0x2f   : > { %241 = sbr.rel (%p4454_p1) target bundleno = 74 (0x4a), region = 40 }
  0x36   : > { %244 = sbr.rel (!%p8950_p2) target bundleno = 74 (0x4a), region = 44  ;;  %s246_s20 = sand.u32 (%p8950_p2), 1, %s6010_s26  }
  0x37   : > { %s4456_s21 = sshll.u32 (%p8950_p2), %s6014_s27, 3  ;;  %s4455_s22 = sshll.u32 (%p8950_p2), %s246_s20, 8 }
  0x38   : > { %s6156_s17 = scalar_lea.vmem (%p8950_p2), %s8921_s0, %s4456_s21  ;;  %s6161_s11 = scalar_lea.vmem (%p8950_p2), [#allocation2], %s4455_s22 }
  0x39   : > { %v340_v0 = vld [vmem:[%s6156_s17] sm:$0xff] (%p8950_p2)  ;;  %v342_v1 = vld [vmem:[%s6156_s17 + $0x10] sm:$0xff] (%p8950_p2) }
  0x3a   : > { %v344_v2 = vld [vmem:[%s6156_s17 + $0x20] sm:$0xff] (%p8950_p2)  ;;  %341 = vst [vmem:[%s6161_s11] sm:$0xff] (%p8950_p2), %v340_v0  ;;  %343 = vst [vmem:[%s6161_s11 + $0x8] sm:$0xff] (%p8950_p2), %v342_v1  ;;  %v346_v3 = vld [vmem:[%s6156_s17 + $0x30] sm:$0xff] (%p8950_p2) }
  0x3b   : > { %345 = vst [vmem:[%s6161_s11 + $0x10] sm:$0xff] (%p8950_p2), %v344_v2  ;;  %v348_v4 = vld [vmem:[%s6156_s17 + $0x40] sm:$0xff] (%p8950_p2)  ;;  %v350_v5 = vld [vmem:[%s6156_s17 + $0x50] sm:$0xff] (%p8950_p2)  ;;  %347 = vst [vmem:[%s6161_s11 + $0x18] sm:$0xff] (%p8950_p2), %v346_v3 }
  0x3c   : > { %349 = vst [vmem:[%s6161_s11 + $0x20] sm:$0xff] (%p8950_p2), %v348_v4  ;;  %351 = vst [vmem:[%s6161_s11 + $0x28] sm:$0xff] (%p8950_p2), %v350_v5  ;;  %v352_v6 = vld [vmem:[%s6156_s17 + $0x60] sm:$0xff] (%p8950_p2)  ;;  %v354_v7 = vld [vmem:[%s6156_s17 + $0x70] sm:$0xff] (%p8950_p2) }
  0x3d   : > { %v356_v8 = vld [vmem:[%s6156_s17 + $0x80] sm:$0xff]  ;;  %353 = vst [vmem:[%s6161_s11 + $0x30] sm:$0xff] %v352_v6  ;;  %355 = vst [vmem:[%s6161_s11 + $0x38] sm:$0xff] %v354_v7  ;;  %v358_v9 = vld [vmem:[%s6156_s17 + $0x90] sm:$0xff] }
  0x3e   : > { %357 = vst [vmem:[%s6161_s11 + $0x40] sm:$0xff] %v356_v8  ;;  %v360_v10 = vld [vmem:[%s6156_s17 + $0xa0] sm:$0xff]  ;;  %v362_v11 = vld [vmem:[%s6156_s17 + $0xb0] sm:$0xff]  ;;  %359 = vst [vmem:[%s6161_s11 + $0x48] sm:$0xff] %v358_v9 }
  0x3f   : > { %361 = vst [vmem:[%s6161_s11 + $0x50] sm:$0xff] %v360_v10  ;;  %363 = vst [vmem:[%s6161_s11 + $0x58] sm:$0xff] %v362_v11  ;;  %v364_v12 = vld [vmem:[%s6156_s17 + $0xc0] sm:$0xff]  ;;  %v366_v13 = vld [vmem:[%s6156_s17 + $0xd0] sm:$0xff] }
  0x40   : > { %v368_v14 = vld [vmem:[%s6156_s17 + $0xe0] sm:$0xff]  ;;  %365 = vst [vmem:[%s6161_s11 + $0x60] sm:$0xff] %v364_v12  ;;  %367 = vst [vmem:[%s6161_s11 + $0x68] sm:$0xff] %v366_v13  ;;  %v370_v15 = vld [vmem:[%s6156_s17 + $0xf0] sm:$0xff] }
  0x41   : > { %369 = vst [vmem:[%s6161_s11 + $0x70] sm:$0xff] %v368_v14  ;;  %v372_v16 = vld [vmem:[%s6156_s17 + $0x100] sm:$0xff]  ;;  %v374_v17 = vld [vmem:[%s6156_s17 + $0x110] sm:$0xff]  ;;  %371 = vst [vmem:[%s6161_s11 + $0x78] sm:$0xff] %v370_v15 }
  0x42   : > { %373 = vst [vmem:[%s6161_s11 + $0x80] sm:$0xff] %v372_v16  ;;  %375 = vst [vmem:[%s6161_s11 + $0x88] sm:$0xff] %v374_v17  ;;  %v376_v18 = vld [vmem:[%s6156_s17 + $0x120] sm:$0xff]  ;;  %v378_v19 = vld [vmem:[%s6156_s17 + $0x130] sm:$0xff] }
  0x43   : > { %v380_v20 = vld [vmem:[%s6156_s17 + $0x140] sm:$0xff]  ;;  %377 = vst [vmem:[%s6161_s11 + $0x90] sm:$0xff] %v376_v18  ;;  %379 = vst [vmem:[%s6161_s11 + $0x98] sm:$0xff] %v378_v19  ;;  %v382_v21 = vld [vmem:[%s6156_s17 + $0x150] sm:$0xff] }
  0x44   : > { %381 = vst [vmem:[%s6161_s11 + $0xa0] sm:$0xff] %v380_v20  ;;  %v384_v22 = vld [vmem:[%s6156_s17 + $0x160] sm:$0xff]  ;;  %v386_v23 = vld [vmem:[%s6156_s17 + $0x170] sm:$0xff]  ;;  %383 = vst [vmem:[%s6161_s11 + $0xa8] sm:$0xff] %v382_v21 }
  0x45   : > { %385 = vst [vmem:[%s6161_s11 + $0xb0] sm:$0xff] %v384_v22  ;;  %387 = vst [vmem:[%s6161_s11 + $0xb8] sm:$0xff] %v386_v23  ;;  %v388_v24 = vld [vmem:[%s6156_s17 + $0x180] sm:$0xff]  ;;  %v390_v25 = vld [vmem:[%s6156_s17 + $0x190] sm:$0xff] }
  0x46   : > { %v392_v26 = vld [vmem:[%s6156_s17 + $0x1a0] sm:$0xff]  ;;  %389 = vst [vmem:[%s6161_s11 + $0xc0] sm:$0xff] %v388_v24  ;;  %391 = vst [vmem:[%s6161_s11 + $0xc8] sm:$0xff] %v390_v25  ;;  %v394_v27 = vld [vmem:[%s6156_s17 + $0x1b0] sm:$0xff] }
  0x47   : > { %393 = vst [vmem:[%s6161_s11 + $0xd0] sm:$0xff] %v392_v26  ;;  %v396_v28 = vld [vmem:[%s6156_s17 + $0x1c0] sm:$0xff]  ;;  %v398_v29 = vld [vmem:[%s6156_s17 + $0x1d0] sm:$0xff]  ;;  %395 = vst [vmem:[%s6161_s11 + $0xd8] sm:$0xff] %v394_v27 }
  0x48   : > { %397 = vst [vmem:[%s6161_s11 + $0xe0] sm:$0xff] %v396_v28  ;;  %399 = vst [vmem:[%s6161_s11 + $0xe8] sm:$0xff] %v398_v29  ;;  %v400_v30 = vld [vmem:[%s6156_s17 + $0x1e0] sm:$0xff]  ;;  %v402_v31 = vld [vmem:[%s6156_s17 + $0x1f0] sm:$0xff] }
  0x49   : > { %401 = vst [vmem:[%s6161_s11 + $0xf0] sm:$0xff] %v400_v30  ;;  %403 = vst [vmem:[%s6161_s11 + $0xf8] sm:$0xff] %v402_v31 }
  0x4a PF: > { %p8951_p5 = scmp.ne.s32.totalorder %s8948_s14, 0 }
  0x4c   : > { %412 = sbr.rel (%p8951_p5) target bundleno = 2062 (0x80e), region = 82 }
  0x53   : > { %s6227_s16 = sand.u32 1, %s6006_s25   ;;  %p8952_p6 = scmp.eq.s32.totalorder %s6085_s28, 0 }
  0x54   : > { %s4458_s8 = sshll.u32 %s6227_s16, 8 }
  0x55   : > { %s6230_s9 = scalar_lea.vmem [#allocation2], %s4458_s8 }
  0x56   : > { %5993 = dma.done.wait (%p8952_p6), [#allocation4], 5120   ;;  %p8953_p10 = pmov %p8952_p6 }
  0x57   : > { %v6019_v32 = vmov 0.0   ;;  %vm651_vm0 = vcmask 1043456   ;;  %vm6020_vm1 = vmmov 1   ;;  %v547_v34 = vld [vmem:[#allocation3 + $0x8] sm:$0xff]  ;;  %v549_v35 = vld [vmem:[#allocation3 + $0x18] sm:$0xff]  ;;  %v546_v36 = vld [vmem:[#allocation3] sm:$0xff] }
  0x58   : > { %5995 = vsyncadd (%p8953_p10), [#allocation4], 4294962176  ;;  %722 = vmatprep.mubr.f32.mxu0 %v6019_v32  ;;  %v5060_v37 = vpack.c.bf16 %v549_v35, %v547_v34  ;;  %v548_v38 = vld [vmem:[#allocation3 + $0x10] sm:$0xff]  ;;  %v551_v39 = vld [vmem:[#allocation3 + $0x28] sm:$0xff]  ;;  %vm554_vm3 = vcmask 228352   ;;  %s6021_s19 = smov 127  }
  0x59   : > { %vm6237_vm2 = vmpackc.low %vm651_vm0, %vm6020_vm1  ;;  %v553_v40 = vld [vmem:[#allocation3 + $0x38] sm:$0xf]  ;;  %v5062_v41 = vpack.c.bf16 %v548_v38, %v546_v36  ;;  %v550_v43 = vld [vmem:[#allocation3 + $0x20] sm:$0xff]  ;;  %vm2283_vm4 = vcmask 1039360   ;;  %vm2625_vm5 = vcmask 916480   ;;  %vm3992_vm6 = vcmask 261120  }
  0x5a   : > { %v5064_v42 = vpack.c.bf16 %v553_v40, %v551_v39  ;;  %v552_v44 = vld [vmem:[#allocation3 + $0x30] sm:$0xf]  ;;  %v903_v45 = vld [vmem:[#allocation3 + $0x48] sm:$0xff]  ;;  %5061 = vmatprep.subr.bf16.mxu0 %v5060_v37  ;;  %v905_v46 = vld [vmem:[#allocation3 + $0x58] sm:$0xff]  ;;  %s4460_s21 = sshll.u32 %s6227_s16, 3  ;;  %s5057_s29 = sshll.u32 %s6085_s28, 7 }
  0x5b   : > { %v450_v47 = vld [vmem:[%s6230_s9] sm:$0xff]  ;;  %5063 = vmatpush1.bf16.msra.mxu0 %v5062_v41  ;;  %v5067_v48 = vpack.c.bf16 %v552_v44, %v550_v43  ;;  %v451_v50 = vld [vmem:[%s6230_s9 + $0x8] sm:$0xff]  ;;  %v5070_v51 = vpack.c.bf16 %v905_v46, %v903_v45  ;;  %v452_v53 = vld [vmem:[%s6230_s9 + $0x10] sm:$0xff]  ;;  %s449_s17 = scalar_lea.vmem [#allocation6], %s4460_s21  ;;  %vm4358_vm7 = vcmask 80896   ;;  %s8877_s14 = scalar_lea.hbm %s8928_s7, %s5057_s29 }
  0x5c   : > { %v482_v49 = vmul.f32 1.442695, %v450_v47  ;;  %5066 = vmatprep.subr.msk.bf16.mxu0 %vm6237_vm2, %v5064_v42  ;;  %v484_v52 = vmul.f32 1.442695, %v451_v50  ;;  %v486_v54 = vmul.f32 1.442695, %v452_v53 }
  0x5d   : > { %v453_v55 = vld [vmem:[%s6230_s9 + $0x18] sm:$0xff]  ;;  %v902_v56 = vld [vmem:[#allocation3 + $0x40] sm:$0xff]  ;;  %v904_v57 = vld [vmem:[#allocation3 + $0x50] sm:$0xff]  ;;  %s4374_s11 = sshll.u32 %s449_s17, 4  ;;  %s4361_s15 = scalar_lea.sflag [#allocation5], %s6227_s16  ;;  %s8879_s11 = int_to_ptr.vmem [resolvable:$true] %s4374_s11 }
  0x5e   : > { %5856 = vpow2.f32 %v482_v49  ;;  %v488_v58 = vmul.f32 1.442695, %v453_v55  ;;  %v907_v59 = vld [vmem:[#allocation3 + $0x68] sm:$0xff]  ;;  %v909_v60 = vld [vmem:[#allocation3 + $0x78] sm:$0xf]  ;;  %v454_v61 = vld [vmem:[%s6230_s9 + $0x20] sm:$0xff]  ;;  %v5072_v62 = vpack.c.bf16 %v904_v57, %v902_v56 }
  0x5f   : > { %5069 = vmatpush1.bf16.msk.msra.mxu0 %vm6237_vm2, %v5067_v48  ;;  %5858 = vpow2.f32 %v484_v52  ;;  %v5074_v63 = vpack.c.bf16 %v909_v60, %v907_v59  ;;  %v906_v0 = vld [vmem:[#allocation3 + $0x60] sm:$0xff]  ;;  %v908_v1 = vld [vmem:[#allocation3 + $0x70] sm:$0xf]  ;;  %v490_v3 = vmul.f32 1.442695, %v454_v61  ;;  %v455_v4 = vld [vmem:[%s6230_s9 + $0x28] sm:$0xff] }
  0x60   : > { %5071 = vmatprep.subr.bf16.mxu0 %v5070_v51  ;;  %5860 = vpow2.f32 %v486_v54  ;;  %v5077_v6 = vpack.c.bf16 %v908_v1, %v906_v0  ;;  %v492_v7 = vmul.f32 1.442695, %v455_v4  ;;  %v1211_v8 = vld [vmem:[#allocation3 + $0x88] sm:$0xff]  ;;  %v456_v9 = vld [vmem:[%s6230_s9 + $0x30] sm:$0xff]  ;;  %v1213_v10 = vld [vmem:[#allocation3 + $0x98] sm:$0xff]  ;;  %s5948_s28 = scalar_lea.vmem %s8879_s11, 128 }
  0x61   : > { %5862 = vpow2.f32 %v488_v58  ;;  %v5080_v12 = vpack.c.bf16 %v1213_v10, %v1211_v8  ;;  %v494_v13 = vmul.f32 1.442695, %v456_v9  ;;  %v457_v14 = vld [vmem:[%s6230_s9 + $0x38] sm:$0xff]  ;;  %v458_v17 = vld [vmem:[%s6230_s9 + $0x40] sm:$0xff]  ;;  %v459_v20 = vld [vmem:[%s6230_s9 + $0x48] sm:$0xff]  ;;  %p5949_p11 = scmp.ne.s32.totalorder %s8879_s11, %s5948_s28  ;;  %p8974_p12 = scmp.ne.s32.totalorder %s8946_s12, 0 }
  0x62   : > { %5864 = vpow2.f32 %v490_v3  ;;  %v496_v16 = vmul.f32 1.442695, %v457_v14  ;;  %v498_v19 = vmul.f32 1.442695, %v458_v17  ;;  %v500_v22 = vmul.f32 1.442695, %v459_v20 }
  0x63   : > { %5866 = vpow2.f32 %v492_v7  ;;  %v460_v23 = vld [vmem:[%s6230_s9 + $0x50] sm:$0xff]  ;;  %v461_v26 = vld [vmem:[%s6230_s9 + $0x58] sm:$0xff]  ;;  %v462_v29 = vld [vmem:[%s6230_s9 + $0x60] sm:$0xff]  ;;  %p5950_p0 = pnand %p5949_p11, %p8974_p12  ;;  %s6023_s18 = smov [#allocation6]  }
  0x64   : > { %5868 = vpow2.f32 %v494_v13  ;;  %v502_v25 = vmul.f32 1.442695, %v460_v23  ;;  %v504_v28 = vmul.f32 1.442695, %v461_v26  ;;  %v506_v31 = vmul.f32 1.442695, %v462_v29 }
  0x65   : > { %5870 = vpow2.f32 %v496_v16  ;;  %v463_v34 = vld [vmem:[%s6230_s9 + $0x68] sm:$0xff]  ;;  %v464_v37 = vld [vmem:[%s6230_s9 + $0x70] sm:$0xff]  ;;  %v465_v40 = vld [vmem:[%s6230_s9 + $0x78] sm:$0xff]  ;;  %p5951_p3 = pneg %p5950_p0 }
  0x66   : > { %5872 = vpow2.f32 %v498_v19  ;;  %v508_v36 = vmul.f32 1.442695, %v463_v34  ;;  %v510_v39 = vmul.f32 1.442695, %v464_v37  ;;  %v512_v42 = vmul.f32 1.442695, %v465_v40 }
  0x67   : > { %5874 = vpow2.f32 %v500_v22  ;;  %v466_v43 = vld [vmem:[%s6230_s9 + $0x80] sm:$0xff]  ;;  %v467_v46 = vld [vmem:[%s6230_s9 + $0x88] sm:$0xff]  ;;  %v468_v49 = vld [vmem:[%s6230_s9 + $0x90] sm:$0xff] }
  0x68   : > { %v6250_v2 = vpop.eup %5856  ;;  %5876 = vpow2.f32 %v502_v25  ;;  %v514_v45 = vmul.f32 1.442695, %v466_v43  ;;  %v516_v48 = vmul.f32 1.442695, %v467_v46  ;;  %v518_v51 = vmul.f32 1.442695, %v468_v49 }
  0x69   : > { %4463 = vmatmul.mubr.msk.f32.vlgmr.msra.gmra.mrb[0].mxu0 %vm554_vm3, %v6250_v2  ;;  %v6255_v5 = vpop.eup %5858  ;;  %5878 = vpow2.f32 %v504_v28  ;;  %v469_v52 = vld [vmem:[%s6230_s9 + $0x98] sm:$0xff]  ;;  %v470_v55 = vld [vmem:[%s6230_s9 + $0xa0] sm:$0xff]  ;;  %v471_v58 = vld [vmem:[%s6230_s9 + $0xa8] sm:$0xff] }
  0x6a   : > { %5073 = vmatpush1.bf16.msra.mxu0 %v5072_v62  ;;  %728 = vmatprep.mubr.f32.mxu0 %v6019_v32  ;;  %v6263_v11 = vpop.eup %5860  ;;  %5880 = vpow2.f32 %v506_v31  ;;  %v520_v54 = vmul.f32 1.442695, %v469_v52  ;;  %v522_v57 = vmul.f32 1.442695, %v470_v55  ;;  %v524_v60 = vmul.f32 1.442695, %v471_v58 }
  0x6b   : > { %5076 = vmatprep.subr.msk.bf16.mxu0 %vm6237_vm2, %v5074_v63  ;;  %v6271_v15 = vpop.eup %5862  ;;  %5882 = vpow2.f32 %v508_v36  ;;  %v472_v61 = vld [vmem:[%s6230_s9 + $0xb0] sm:$0xff]  ;;  %v473_v0 = vld [vmem:[%s6230_s9 + $0xb8] sm:$0xff]  ;;  %v474_v4 = vld [vmem:[%s6230_s9 + $0xc0] sm:$0xff] }
  0x6c   : > { %v6277_v18 = vpop.eup %5864  ;;  %5884 = vpow2.f32 %v510_v39  ;;  %v526_v63 = vmul.f32 1.442695, %v472_v61  ;;  %v528_v3 = vmul.f32 1.442695, %v473_v0  ;;  %v530_v7 = vmul.f32 1.442695, %v474_v4 }
  0x6d   : > { %4464 = vmatmul.mubr.msk.f32.gmra.mrb[2].mxu0 %vm554_vm3, %v6255_v5  ;;  %v6283_v21 = vpop.eup %5866  ;;  %5886 = vpow2.f32 %v512_v42  ;;  %v475_v8 = vld [vmem:[%s6230_s9 + $0xc8] sm:$0xff]  ;;  %v477_v16 = vld [vmem:[%s6230_s9 + $0xd8] sm:$0xff]  ;;  %v478_v20 = vld [vmem:[%s6230_s9 + $0xe0] sm:$0xff] }
  0x6e   : > { %734 = vmatprep.mubr.f32.mxu0 %v6019_v32  ;;  %5079 = vmatpush1.bf16.msk.msra.mxu0 %vm6237_vm2, %v5077_v6  ;;  %v6289_v24 = vpop.eup %5868  ;;  %5888 = vpow2.f32 %v514_v45  ;;  %v532_v10 = vmul.f32 1.442695, %v475_v8  ;;  %v536_v19 = vmul.f32 1.442695, %v477_v16  ;;  %v538_v23 = vmul.f32 1.442695, %v478_v20 }
  0x6f   : > { %5081 = vmatprep.subr.bf16.mxu0 %v5080_v12  ;;  %v6295_v27 = vpop.eup %5870  ;;  %5890 = vpow2.f32 %v516_v48  ;;  %v476_v12 = vld [vmem:[%s6230_s9 + $0xd0] sm:$0xff]  ;;  %v479_v25 = vld [vmem:[%s6230_s9 + $0xe8] sm:$0xff]  ;;  %v481_v36 = vld [vmem:[%s6230_s9 + $0xf8] sm:$0xff] }
  0x70   : > { %v6301_v30 = vpop.eup %5872  ;;  %5892 = vpow2.f32 %v518_v51  ;;  %v534_v14 = vmul.f32 1.442695, %v476_v12  ;;  %v540_v28 = vmul.f32 1.442695, %v479_v25  ;;  %v480_v29 = vld [vmem:[%s6230_s9 + $0xf0] sm:$0xff]  ;;  %v1210_v46 = vld [vmem:[#allocation3 + $0x80] sm:$0xff] }
  0x71   : > { %4465 = vmatmul.mubr.msk.f32.gmra.mrb[4].mxu0 %vm554_vm3, %v6263_v11  ;;  %v6307_v35 = vpop.eup %5874  ;;  %5894 = vpow2.f32 %v520_v54  ;;  %v542_v34 = vmul.f32 1.442695, %v480_v29  ;;  %v544_v39 = vmul.f32 1.442695, %v481_v36  ;;  %v1212_v48 = vld [vmem:[#allocation3 + $0x90] sm:$0xff]  ;;  %v1215_v49 = vld [vmem:[#allocation3 + $0xa8] sm:$0xff] }
  0x72   : > { %740 = vmatprep.mubr.f32.mxu0 %v6019_v32  ;;  %v6313_v38 = vpop.eup %5876  ;;  %5896 = vpow2.f32 %v522_v57  ;;  %v1217_v51 = vld [vmem:[#allocation3 + $0xb8] sm:$0xf]  ;;  %v5082_v52 = vpack.c.bf16 %v1212_v48, %v1210_v46  ;;  %v1214_v55 = vld [vmem:[#allocation3 + $0xa0] sm:$0xff]  ;;  %v1216_v57 = vld [vmem:[#allocation3 + $0xb0] sm:$0xf] }
  0x73   : > { %v6319_v41 = vpop.eup %5878  ;;  %5898 = vpow2.f32 %v524_v60  ;;  %v5084_v54 = vpack.c.bf16 %v1217_v51, %v1215_v49  ;;  %v1519_v58 = vld [vmem:[#allocation3 + $0xc8] sm:$0xff]  ;;  %v1521_v60 = vld [vmem:[#allocation3 + $0xd8] sm:$0xff]  ;;  %v5087_v61 = vpack.c.bf16 %v1216_v57, %v1214_v55  ;;  %v1518_v0 = vld [vmem:[#allocation3 + $0xc0] sm:$0xff] }
  0x74   : > { %v6325_v44 = vpop.eup %5880  ;;  %5900 = vpow2.f32 %v526_v63  ;;  %v5090_v63 = vpack.c.bf16 %v1521_v60, %v1519_v58  ;;  %v1523_v4 = vld [vmem:[#allocation3 + $0xe8] sm:$0xff]  ;;  %v1522_v12 = vld [vmem:[#allocation3 + $0xe0] sm:$0xff] }
  0x75   : > { %4466 = vmatmul.mubr.msk.f32.gmra.mrb[6].mxu0 %vm554_vm3, %v6271_v15  ;;  %v6331_v47 = vpop.eup %5882  ;;  %5902 = vpow2.f32 %v528_v3  ;;  %v1520_v3 = vld [vmem:[#allocation3 + $0xd0] sm:$0xff]  ;;  %v1827_v16 = vld [vmem:[#allocation3 + $0x108] sm:$0xff] }
  0x76   : > { %746 = vmatprep.mubr.f32.mxu0 %v6019_v32  ;;  %v6337_v50 = vpop.eup %5884  ;;  %5904 = vpow2.f32 %v530_v7  ;;  %v1525_v7 = vld [vmem:[#allocation3 + $0xf8] sm:$0xf]  ;;  %v5092_v8 = vpack.c.bf16 %v1520_v3, %v1518_v0  ;;  %v1831_v0 = vld [vmem:[#allocation3 + $0x128] sm:$0xff] }
  0x77   : > { %v6343_v53 = vpop.eup %5886  ;;  %5906 = vpow2.f32 %v532_v10  ;;  %v5094_v10 = vpack.c.bf16 %v1525_v7, %v1523_v4  ;;  %v1833_v3 = vld [vmem:[#allocation3 + $0x138] sm:$0xf] }
  0x78   : > { %v6349_v56 = vpop.eup %5888  ;;  %5908 = vpow2.f32 %v534_v14  ;;  %v1524_v14 = vld [vmem:[#allocation3 + $0xf0] sm:$0xf]  ;;  %v5104_v7 = vpack.c.bf16 %v1833_v3, %v1831_v0  ;;  %v2584_v0 = vld [vmem:[%s8924_s3 + $0x98] sm:$0xff] }
  0x79   : > { %4467 = vmatmul.mubr.msk.f32.gmra.mrb[8].mxu0 %vm554_vm3, %v6277_v18  ;;  %v6355_v59 = vpop.eup %5890  ;;  %5910 = vpow2.f32 %v536_v19  ;;  %v1829_v19 = vld [vmem:[#allocation3 + $0x118] sm:$0xff]  ;;  %v5097_v20 = vpack.c.bf16 %v1524_v14, %v1522_v12 }
  0x7a   : > { %752 = vmatprep.mubr.f32.mxu0 %v6019_v32  ;;  %v6361_v62 = vpop.eup %5892  ;;  %5912 = vpow2.f32 %v538_v23  ;;  %v5100_v23 = vpack.c.bf16 %v1829_v19, %v1827_v16 }
  0x7b   : > { %v6367_v1 = vpop.eup %5894  ;;  %5914 = vpow2.f32 %v540_v28 }
  0x7c   : > { %v6373_v6 = vpop.eup %5896  ;;  %5916 = vpow2.f32 %v542_v34 }
  0x7d   : > { %4468 = vmatmul.mubr.msk.f32.gmra.mrb[10].mxu0 %vm554_vm3, %v6283_v21  ;;  %v6379_v9 = vpop.eup %5898  ;;  %5918 = vpow2.f32 %v544_v39 }
  0x7e   : > { %758 = vmatprep.mubr.f32.mxu0 %v6019_v32  ;;  %v6385_v13 = vpop.eup %5900 }
  0x7f   : > { %v6391_v17 = vpop.eup %5902 }
  0x80   : > { %v6397_v22 = vpop.eup %5904 }
  0x81   : > { %4469 = vmatmul.mubr.msk.f32.gmra.mrb[12].mxu0 %vm554_vm3, %v6289_v24  ;;  %v6403_v26 = vpop.eup %5906 }
  0x82   : > { %764 = vmatprep.mubr.f32.mxu0 %v6019_v32  ;;  %v6409_v31 = vpop.eup %5908 }
  0x83   : > { %v6415_v37 = vpop.eup %5910 }
  0x84   : > { %v6420_v40 = vpop.eup %5912 }
  0x85   : > { %4470 = vmatmul.mubr.msk.f32.gmra.mrb[14].mxu0 %vm554_vm3, %v6295_v27  ;;  %v6425_v42 = vpop.eup %5914 }
  0x86   : > { %770 = vmatprep.mubr.f32.mxu0 %v6019_v32  ;;  %v6430_v43 = vpop.eup %5916 }
  0x87   : > { %v6435_v45 = vpop.eup %5918 }
  0x89   : > { %4471 = vmatmul.mubr.msk.f32.gmra.mrb[16].mxu0 %vm554_vm3, %v6301_v30 }
  0x8a   : > { %776 = vmatprep.mubr.f32.mxu0 %v6019_v32 }
  0x8d   : > { %4472 = vmatmul.mubr.msk.f32.gmra.mrb[18].mxu0 %vm554_vm3, %v6307_v35 }
  0x8e   : > { %782 = vmatprep.mubr.f32.mxu0 %v6019_v32 }
  0x91   : > { %4473 = vmatmul.mubr.msk.f32.gmra.mrb[20].mxu0 %vm554_vm3, %v6313_v38 }
  0x92   : > { %788 = vmatprep.mubr.f32.mxu0 %v6019_v32 }
  0x95   : > { %4474 = vmatmul.mubr.msk.f32.gmra.mrb[22].mxu0 %vm554_vm3, %v6319_v41 }
  0x96   : > { %794 = vmatprep.mubr.f32.mxu0 %v6019_v32 }
  0x99   : > { %4475 = vmatmul.mubr.msk.f32.gmra.mrb[24].mxu0 %vm554_vm3, %v6325_v44 }
  0x9a   : > { %800 = vmatprep.mubr.f32.mxu0 %v6019_v32 }
  0x9d   : > { %4476 = vmatmul.mubr.msk.f32.gmra.mrb[26].mxu0 %vm554_vm3, %v6331_v47 }
  0x9e   : > { %806 = vmatprep.mubr.f32.mxu0 %v6019_v32 }
  0xa1   : > { %4477 = vmatmul.mubr.msk.f32.gmra.mrb[28].mxu0 %vm554_vm3, %v6337_v50 }
  0xa2   : > { %812 = vmatprep.mubr.f32.mxu0 %v6019_v32 }
  0xa5   : > { %4478 = vmatmul.mubr.msk.f32.gmra.mrb[30].mxu0 %vm554_vm3, %v6343_v53 }
  0xa6   : > { %818 = vmatprep.mubr.f32.mxu0 %v6019_v32 }
  0xa9   : > { %4479 = vmatmul.mubr.msk.f32.gmra.mrb[32].mxu0 %vm554_vm3, %v6349_v56 }
  0xaa   : > { %824 = vmatprep.mubr.f32.mxu0 %v6019_v32 }
  0xad   : > { %4480 = vmatmul.mubr.msk.f32.gmra.mrb[34].mxu0 %vm554_vm3, %v6355_v59 }
  0xae   : > { %830 = vmatprep.mubr.f32.mxu0 %v6019_v32 }
  0xb1   : > { %4481 = vmatmul.mubr.msk.f32.gmra.mrb[36].mxu0 %vm554_vm3, %v6361_v62 }
  0xb2   : > { %836 = vmatprep.mubr.f32.mxu0 %v6019_v32 }
  0xb5   : > { %4482 = vmatmul.mubr.msk.f32.gmra.mrb[38].mxu0 %vm554_vm3, %v6367_v1 }
  0xb6   : > { %842 = vmatprep.mubr.f32.mxu0 %v6019_v32 }
  0xb9   : > { %4483 = vmatmul.mubr.msk.f32.gmra.mrb[40].mxu0 %vm554_vm3, %v6373_v6 }
  0xba   : > { %848 = vmatprep.mubr.f32.mxu0 %v6019_v32 }
  0xbd   : > { %4484 = vmatmul.mubr.msk.f32.gmra.mrb[42].mxu0 %vm554_vm3, %v6379_v9 }
  0xbe   : > { %854 = vmatprep.mubr.f32.mxu0 %v6019_v32 }
  0xc1   : > { %4485 = vmatmul.mubr.msk.f32.gmra.mrb[44].mxu0 %vm554_vm3, %v6385_v13 }
  0xc2   : > { %860 = vmatprep.mubr.f32.mxu0 %v6019_v32 }
  0xc5   : > { %4486 = vmatmul.mubr.msk.f32.gmra.mrb[46].mxu0 %vm554_vm3, %v6391_v17 }
  0xc6   : > { %866 = vmatprep.mubr.f32.mxu0 %v6019_v32 }
  0xc9   : > { %4487 = vmatmul.mubr.msk.f32.gmra.mrb[48].mxu0 %vm554_vm3, %v6397_v22 }
  0xca   : > { %872 = vmatprep.mubr.f32.mxu0 %v6019_v32 }
  0xcd   : > { %4488 = vmatmul.mubr.msk.f32.gmra.mrb[50].mxu0 %vm554_vm3, %v6403_v26 }
  0xce   : > { %876 = vmatprep.mubr.f32.mxu0 %v6019_v32 }
  0xd1   : > { %4489 = vmatmul.mubr.msk.f32.gmra.mrb[52].mxu0 %vm554_vm3, %v6409_v31 }
  0xd2   : > { %880 = vmatprep.mubr.f32.mxu0 %v6019_v32 }
  0xd5   : > { %4490 = vmatmul.mubr.msk.f32.gmra.mrb[54].mxu0 %vm554_vm3, %v6415_v37 }
  0xd6   : > { %884 = vmatprep.mubr.f32.mxu0 %v6019_v32 }
  0xd9   : > { %4491 = vmatmul.mubr.msk.f32.gmra.mrb[56].mxu0 %vm554_vm3, %v6420_v40 }
  0xda   : > { %888 = vmatprep.mubr.f32.mxu0 %v6019_v32 }
  0xdd   : > { %4492 = vmatmul.mubr.msk.f32.gmra.mrb[58].mxu0 %vm554_vm3, %v6425_v42 }
  0xde   : > { %892 = vmatprep.mubr.f32.mxu0 %v6019_v32 }
  0xe1   : > { %4493 = vmatmul.mubr.msk.f32.gmra.mrb[60].mxu0 %vm554_vm3, %v6430_v43 }
  0xe2   : > { %896 = vmatprep.mubr.f32.mxu0 %v6019_v32 }
  0xe5   : > { %4494 = vmatmul.mubr.msk.f32.gmra.mrb[62].mxu0 %vm554_vm3, %v6435_v45 }
  0xe6   : > { %980 = vmatprep.mubr.f32.mxu0 %v6019_v32 }
  0xe9   : > { %4497 = vmatmul.mubr.msk.f32.vlgmr.msra.gmra.mrb[64].mxu0 %vm554_vm3, %v6250_v2 }
  0xea   : > { %5083 = vmatpush1.bf16.msra.mxu0 %v5082_v52  ;;  %984 = vmatprep.mubr.f32.mxu0 %v6019_v32 }
  0xeb   : > { %5086 = vmatprep.subr.msk.bf16.mxu0 %vm6237_vm2, %v5084_v54 }
  0xed   : > { %4498 = vmatmul.mubr.msk.f32.gmra.mrb[0].mxu0 %vm554_vm3, %v6255_v5 }
  0xee   : > { %990 = vmatprep.mubr.f32.mxu0 %v6019_v32  ;;  %5089 = vmatpush1.bf16.msk.msra.mxu0 %vm6237_vm2, %v5087_v61  ;;  %v1826_v61 = vld [vmem:[#allocation3 + $0x100] sm:$0xff] }
  0xef   : > { %5091 = vmatprep.subr.bf16.mxu0 %v5090_v63  ;;  %v1828_v63 = vld [vmem:[#allocation3 + $0x110] sm:$0xff] }
  0xf0   : > { %v5102_v4 = vpack.c.bf16 %v1828_v63, %v1826_v61  ;;  %v2582_v63 = vld [vmem:[%s8924_s3 + $0x88] sm:$0xff] }
  0xf1   : > { %4499 = vmatmul.mubr.msk.f32.gmra.mrb[2].mxu0 %vm554_vm3, %v6263_v11  ;;  %v5126_v3 = vpack.c.bf16 %v2584_v0, %v2582_v63  ;;  %v2615_v63 = vld [vmem:[%s8924_s3 + $0x190] sm:$0xff] }
  0xf2   : > { %996 = vmatprep.mubr.f32.mxu0 %v6019_v32 }
  0xf5   : > { %4500 = vmatmul.mubr.msk.f32.gmra.mrb[4].mxu0 %vm554_vm3, %v6271_v15 }
  0xf6   : > { %1002 = vmatprep.mubr.f32.mxu0 %v6019_v32 }
  0xf9   : > { %4501 = vmatmul.mubr.msk.f32.gmra.mrb[6].mxu0 %vm554_vm3, %v6277_v18 }
  0xfa   : > { %1008 = vmatprep.mubr.f32.mxu0 %v6019_v32 }
  0xfd   : > { %4502 = vmatmul.mubr.msk.f32.gmra.mrb[8].mxu0 %vm554_vm3, %v6283_v21 }
  0xfe   : > { %1014 = vmatprep.mubr.f32.mxu0 %v6019_v32 }
 0x101   : > { %4503 = vmatmul.mubr.msk.f32.gmra.mrb[10].mxu0 %vm554_vm3, %v6289_v24 }
 0x102   : > { %1020 = vmatprep.mubr.f32.mxu0 %v6019_v32 }
 0x105   : > { %4504 = vmatmul.mubr.msk.f32.gmra.mrb[12].mxu0 %vm554_vm3, %v6295_v27 }
 0x106   : > { %1026 = vmatprep.mubr.f32.mxu0 %v6019_v32 }
 0x109   : > { %4505 = vmatmul.mubr.msk.f32.gmra.mrb[14].mxu0 %vm554_vm3, %v6301_v30 }
 0x10a   : > { %1032 = vmatprep.mubr.f32.mxu0 %v6019_v32 }
 0x10d   : > { %4506 = vmatmul.mubr.msk.f32.gmra.mrb[16].mxu0 %vm554_vm3, %v6307_v35 }
 0x10e   : > { %1038 = vmatprep.mubr.f32.mxu0 %v6019_v32 }
 0x111   : > { %4507 = vmatmul.mubr.msk.f32.gmra.mrb[18].mxu0 %vm554_vm3, %v6313_v38 }
 0x112   : > { %1044 = vmatprep.mubr.f32.mxu0 %v6019_v32 }
 0x115   : > { %4508 = vmatmul.mubr.msk.f32.gmra.mrb[20].mxu0 %vm554_vm3, %v6319_v41 }
 0x116   : > { %1050 = vmatprep.mubr.f32.mxu0 %v6019_v32 }
 0x119   : > { %4509 = vmatmul.mubr.msk.f32.gmra.mrb[22].mxu0 %vm554_vm3, %v6325_v44 }
 0x11a   : > { %1056 = vmatprep.mubr.f32.mxu0 %v6019_v32 }
 0x11d   : > { %4510 = vmatmul.mubr.msk.f32.gmra.mrb[24].mxu0 %vm554_vm3, %v6331_v47 }
 0x11e   : > { %1062 = vmatprep.mubr.f32.mxu0 %v6019_v32 }
 0x121   : > { %4511 = vmatmul.mubr.msk.f32.gmra.mrb[26].mxu0 %vm554_vm3, %v6337_v50 }
 0x122   : > { %1068 = vmatprep.mubr.f32.mxu0 %v6019_v32 }
 0x125   : > { %4512 = vmatmul.mubr.msk.f32.gmra.mrb[28].mxu0 %vm554_vm3, %v6343_v53 }
 0x126   : > { %1074 = vmatprep.mubr.f32.mxu0 %v6019_v32 }
 0x129   : > { %4513 = vmatmul.mubr.msk.f32.gmra.mrb[30].mxu0 %vm554_vm3, %v6349_v56 }
 0x12a   : > { %1080 = vmatprep.mubr.f32.mxu0 %v6019_v32 }
 0x12d   : > { %4514 = vmatmul.mubr.msk.f32.gmra.mrb[32].mxu0 %vm554_vm3, %v6355_v59 }
 0x12e   : > { %1086 = vmatprep.mubr.f32.mxu0 %v6019_v32 }
 0x131   : > { %4515 = vmatmul.mubr.msk.f32.gmra.mrb[34].mxu0 %vm554_vm3, %v6361_v62 }
 0x132   : > { %1092 = vmatprep.mubr.f32.mxu0 %v6019_v32 }
 0x135   : > { %4516 = vmatmul.mubr.msk.f32.gmra.mrb[36].mxu0 %vm554_vm3, %v6367_v1 }
 0x136   : > { %1098 = vmatprep.mubr.f32.mxu0 %v6019_v32 }
 0x139   : > { %4517 = vmatmul.mubr.msk.f32.gmra.mrb[38].mxu0 %vm554_vm3, %v6373_v6 }
 0x13a   : > { %1104 = vmatprep.mubr.f32.mxu0 %v6019_v32 }
 0x13d   : > { %4518 = vmatmul.mubr.msk.f32.gmra.mrb[40].mxu0 %vm554_vm3, %v6379_v9 }
 0x13e   : > { %1110 = vmatprep.mubr.f32.mxu0 %v6019_v32 }
 0x141   : > { %4519 = vmatmul.mubr.msk.f32.gmra.mrb[42].mxu0 %vm554_vm3, %v6385_v13 }
 0x142   : > { %1116 = vmatprep.mubr.f32.mxu0 %v6019_v32 }
 0x145   : > { %4520 = vmatmul.mubr.msk.f32.gmra.mrb[44].mxu0 %vm554_vm3, %v6391_v17 }
 0x146   : > { %1122 = vmatprep.mubr.f32.mxu0 %v6019_v32 }
 0x149   : > { %4521 = vmatmul.mubr.msk.f32.gmra.mrb[46].mxu0 %vm554_vm3, %v6397_v22 }
 0x14a   : > { %1128 = vmatprep.mubr.f32.mxu0 %v6019_v32 }
 0x14d   : > { %4522 = vmatmul.mubr.msk.f32.gmra.mrb[48].mxu0 %vm554_vm3, %v6403_v26 }
 0x14e   : > { %1134 = vmatprep.mubr.f32.mxu0 %v6019_v32 }
 0x151   : > { %4523 = vmatmul.mubr.msk.f32.gmra.mrb[66].mxu0 %vm554_vm3, %v6409_v31 }
 0x152   : > { %1138 = vmatprep.mubr.f32.mxu0 %v6019_v32 }
 0x155   : > { %4524 = vmatmul.mubr.msk.f32.gmra.mrb[68].mxu0 %vm554_vm3, %v6415_v37 }
 0x156   : > { %1142 = vmatprep.mubr.f32.mxu0 %v6019_v32 }
 0x159   : > { %4525 = vmatmul.mubr.msk.f32.gmra.mrb[70].mxu0 %vm554_vm3, %v6420_v40 }
 0x15a   : > { %1146 = vmatprep.mubr.f32.mxu0 %v6019_v32 }
 0x15d   : > { %4526 = vmatmul.mubr.msk.f32.gmra.mrb[72].mxu0 %vm554_vm3, %v6425_v42 }
 0x15e   : > { %1150 = vmatprep.mubr.f32.mxu0 %v6019_v32 }
 0x161   : > { %4527 = vmatmul.mubr.msk.f32.gmra.mrb[74].mxu0 %vm554_vm3, %v6430_v43 }
 0x162   : > { %1154 = vmatprep.mubr.f32.mxu0 %v6019_v32 }
 0x165   : > { %4528 = vmatmul.mubr.msk.f32.gmra.mrb[76].mxu0 %vm554_vm3, %v6435_v45 }
 0x166   : > { %1288 = vmatprep.mubr.f32.mxu0 %v6019_v32 }
 0x169   : > { %4531 = vmatmul.mubr.msk.f32.vlgmr.msra.gmra.mrb[78].mxu0 %vm554_vm3, %v6250_v2 }
 0x16a   : > { %5093 = vmatpush1.bf16.msra.mxu0 %v5092_v8  ;;  %1292 = vmatprep.mubr.f32.mxu0 %v6019_v32  ;;  %v1830_v8 = vld [vmem:[#allocation3 + $0x120] sm:$0xff] }
 0x16b   : > { %5096 = vmatprep.subr.msk.bf16.mxu0 %vm6237_vm2, %v5094_v10  ;;  %v1832_v10 = vld [vmem:[#allocation3 + $0x130] sm:$0xf] }
 0x16c   : > { %v5107_v12 = vpack.c.bf16 %v1832_v10, %v1830_v8  ;;  %v2586_v10 = vld [vmem:[%s8924_s3 + $0xa8] sm:$0xff] }
 0x16d   : > { %4532 = vmatmul.mubr.msk.f32.gmra.mrb[80].mxu0 %vm554_vm3, %v6255_v5 }
 0x16e   : > { %1296 = vmatprep.mubr.f32.mxu0 %v6019_v32  ;;  %5099 = vmatpush1.bf16.msk.msra.mxu0 %vm6237_vm2, %v5097_v20 }
 0x16f   : > { %5101 = vmatprep.subr.bf16.mxu0 %v5100_v23 }
 0x171   : > { %4533 = vmatmul.mubr.msk.f32.gmra.mrb[0].mxu0 %vm554_vm3, %v6263_v11 }
 0x172   : > { %1302 = vmatprep.mubr.f32.mxu0 %v6019_v32 }
 0x175   : > { %4534 = vmatmul.mubr.msk.f32.gmra.mrb[2].mxu0 %vm554_vm3, %v6271_v15 }
 0x176   : > { %1308 = vmatprep.mubr.f32.mxu0 %v6019_v32 }
 0x179   : > { %4535 = vmatmul.mubr.msk.f32.gmra.mrb[4].mxu0 %vm554_vm3, %v6277_v18 }
 0x17a   : > { %1314 = vmatprep.mubr.f32.mxu0 %v6019_v32 }
 0x17d   : > { %4536 = vmatmul.mubr.msk.f32.gmra.mrb[6].mxu0 %vm554_vm3, %v6283_v21 }
 0x17e   : > { %1320 = vmatprep.mubr.f32.mxu0 %v6019_v32 }
 0x181   : > { %4537 = vmatmul.mubr.msk.f32.gmra.mrb[8].mxu0 %vm554_vm3, %v6289_v24 }
 0x182   : > { %1326 = vmatprep.mubr.f32.mxu0 %v6019_v32 }
 0x185   : > { %4538 = vmatmul.mubr.msk.f32.gmra.mrb[10].mxu0 %vm554_vm3, %v6295_v27 }
 0x186   : > { %1332 = vmatprep.mubr.f32.mxu0 %v6019_v32 }
 0x189   : > { %4539 = vmatmul.mubr.msk.f32.gmra.mrb[12].mxu0 %vm554_vm3, %v6301_v30 }
 0x18a   : > { %1338 = vmatprep.mubr.f32.mxu0 %v6019_v32 }
 0x18d   : > { %4540 = vmatmul.mubr.msk.f32.gmra.mrb[14].mxu0 %vm554_vm3, %v6307_v35 }
 0x18e   : > { %1344 = vmatprep.mubr.f32.mxu0 %v6019_v32 }
 0x191   : > { %4541 = vmatmul.mubr.msk.f32.gmra.mrb[16].mxu0 %vm554_vm3, %v6313_v38 }
 0x192   : > { %1350 = vmatprep.mubr.f32.mxu0 %v6019_v32 }
 0x195   : > { %4542 = vmatmul.mubr.msk.f32.gmra.mrb[18].mxu0 %vm554_vm3, %v6319_v41 }
 0x196   : > { %1356 = vmatprep.mubr.f32.mxu0 %v6019_v32 }
 0x199   : > { %4543 = vmatmul.mubr.msk.f32.gmra.mrb[20].mxu0 %vm554_vm3, %v6325_v44 }
 0x19a   : > { %1362 = vmatprep.mubr.f32.mxu0 %v6019_v32 }
 0x19d   : > { %4544 = vmatmul.mubr.msk.f32.gmra.mrb[22].mxu0 %vm554_vm3, %v6331_v47 }
 0x19e   : > { %1368 = vmatprep.mubr.f32.mxu0 %v6019_v32 }
 0x1a0   : > { %v874_v25 = vpop.f32.mrb[50].mxu0 }
 0x1a1   : > { %v875_v28 = vpop.f32.mrb[51].mxu0  ;;  %4545 = vmatmul.mubr.msk.f32.gmra.mrb[24].mxu0 %vm554_vm3, %v6337_v50 }
 0x1a2   : > { %1374 = vmatprep.mubr.f32.mxu0 %v6019_v32 }
 0x1a4   : > { %v878_v29 = vpop.f32.mrb[52].mxu0 }
 0x1a5   : > { %v879_v34 = vpop.f32.mrb[53].mxu0  ;;  %4546 = vmatmul.mubr.msk.f32.gmra.mrb[26].mxu0 %vm554_vm3, %v6343_v53 }
 0x1a6   : > { %1380 = vmatprep.mubr.f32.mxu0 %v6019_v32 }
 0x1a8   : > { %v882_v36 = vpop.f32.mrb[54].mxu0 }
 0x1a9   : > { %v883_v39 = vpop.f32.mrb[55].mxu0  ;;  %4547 = vmatmul.mubr.msk.f32.gmra.mrb[28].mxu0 %vm554_vm3, %v6349_v56 }
 0x1aa   : > { %1386 = vmatprep.mubr.f32.mxu0 %v6019_v32 }
 0x1ac   : > { %v886_v46 = vpop.f32.mrb[56].mxu0 }
 0x1ad   : > { %v887_v48 = vpop.f32.mrb[57].mxu0  ;;  %4548 = vmatmul.mubr.msk.f32.gmra.mrb[30].mxu0 %vm554_vm3, %v6355_v59 }
 0x1ae   : > { %1392 = vmatprep.mubr.f32.mxu0 %v6019_v32 }
 0x1b0   : > { %v890_v49 = vpop.f32.mrb[58].mxu0 }
 0x1b1   : > { %v891_v51 = vpop.f32.mrb[59].mxu0  ;;  %4549 = vmatmul.mubr.msk.f32.gmra.mrb[32].mxu0 %vm554_vm3, %v6361_v62 }
 0x1b2   : > { %1398 = vmatprep.mubr.f32.mxu0 %v6019_v32 }
 0x1b4   : > { %v894_v52 = vpop.f32.mrb[60].mxu0 }
 0x1b5   : > { %v895_v54 = vpop.f32.mrb[61].mxu0  ;;  %4550 = vmatmul.mubr.msk.f32.gmra.mrb[34].mxu0 %vm554_vm3, %v6367_v1 }
 0x1b6   : > { %1404 = vmatprep.mubr.f32.mxu0 %v6019_v32  ;;  %v2578_v54 = vld [vmem:[%s8924_s3 + $0x68] sm:$0xff] }
 0x1b8   : > { %v898_v55 = vpop.f32.mrb[62].mxu0 }
 0x1b9   : > { %v899_v57 = vpop.f32.mrb[63].mxu0  ;;  %4551 = vmatmul.mubr.msk.f32.gmra.mrb[36].mxu0 %vm554_vm3, %v6373_v6  ;;  %v2580_v55 = vld [vmem:[%s8924_s3 + $0x78] sm:$0xff] }
 0x1ba   : > { %1410 = vmatprep.mubr.f32.mxu0 %v6019_v32  ;;  %v5122_v57 = vpack.c.bf16 %v2580_v55, %v2578_v54 }
 0x1bc   : > { %v982_v58 = vpop.f32.mrb[64].mxu0 }
 0x1bd   : > { %v983_v60 = vpop.f32.mrb[65].mxu0  ;;  %4552 = vmatmul.mubr.msk.f32.gmra.mrb[38].mxu0 %vm554_vm3, %v6379_v9  ;;  %v2577_v58 = vld [vmem:[%s8924_s3 + $0x60] sm:$0xff] }
 0x1be   : > { %1416 = vmatprep.mubr.f32.mxu0 %v6019_v32  ;;  %v2579_v60 = vld [vmem:[%s8924_s3 + $0x70] sm:$0xff] }
 0x1bf   : > { %v5124_v61 = vpack.c.bf16 %v2579_v60, %v2577_v58  ;;  %v2616_v58 = vld [vmem:[%s8924_s3 + $0x198] sm:$0xff] }
 0x1c1   : > { %4553 = vmatmul.mubr.msk.f32.gmra.mrb[40].mxu0 %vm554_vm3, %v6385_v13 }
 0x1c2   : > { %1422 = vmatprep.mubr.f32.mxu0 %v6019_v32 }
 0x1c5   : > { %4554 = vmatmul.mubr.msk.f32.gmra.mrb[42].mxu0 %vm554_vm3, %v6391_v17 }
 0x1c6   : > { %1428 = vmatprep.mubr.f32.mxu0 %v6019_v32 }
 0x1c9   : > { %4555 = vmatmul.mubr.msk.f32.gmra.mrb[44].mxu0 %vm554_vm3, %v6397_v22 }
 0x1ca   : > { %1434 = vmatprep.mubr.f32.mxu0 %v6019_v32 }
 0x1cd   : > { %4556 = vmatmul.mubr.msk.f32.gmra.mrb[46].mxu0 %vm554_vm3, %v6403_v26 }
 0x1ce   : > { %1440 = vmatprep.mubr.f32.mxu0 %v6019_v32 }
 0x1d1   : > { %4557 = vmatmul.mubr.msk.f32.gmra.mrb[48].mxu0 %vm554_vm3, %v6409_v31 }
 0x1d2   : > { %1446 = vmatprep.mubr.f32.mxu0 %v6019_v32 }
 0x1d5   : > { %4558 = vmatmul.mubr.msk.f32.gmra.mrb[82].mxu0 %vm554_vm3, %v6415_v37 }
 0x1d6   : > { %1450 = vmatprep.mubr.f32.mxu0 %v6019_v32 }
 0x1d9   : > { %4559 = vmatmul.mubr.msk.f32.gmra.mrb[84].mxu0 %vm554_vm3, %v6420_v40 }
 0x1da   : > { %1454 = vmatprep.mubr.f32.mxu0 %v6019_v32 }
 0x1dd   : > { %4560 = vmatmul.mubr.msk.f32.gmra.mrb[86].mxu0 %vm554_vm3, %v6425_v42 }
 0x1de   : > { %1458 = vmatprep.mubr.f32.mxu0 %v6019_v32 }
 0x1e1   : > { %4561 = vmatmul.mubr.msk.f32.gmra.mrb[88].mxu0 %vm554_vm3, %v6430_v43 }
 0x1e2   : > { %1462 = vmatprep.mubr.f32.mxu0 %v6019_v32 }
 0x1e5   : > { %4562 = vmatmul.mubr.msk.f32.gmra.mrb[90].mxu0 %vm554_vm3, %v6435_v45 }
 0x1e6   : > { %1596 = vmatprep.mubr.f32.mxu0 %v6019_v32 }
 0x1e9   : > { %4565 = vmatmul.mubr.msk.f32.vlgmr.msra.gmra.mrb[92].mxu0 %vm554_vm3, %v6250_v2 }
 0x1ea   : > { %5103 = vmatpush1.bf16.msra.mxu0 %v5102_v4  ;;  %1600 = vmatprep.mubr.f32.mxu0 %v6019_v32  ;;  %v2581_v4 = vld [vmem:[%s8924_s3 + $0x80] sm:$0xff] }
 0x1eb   : > { %5106 = vmatprep.subr.msk.bf16.mxu0 %vm6237_vm2, %v5104_v7  ;;  %v2583_v7 = vld [vmem:[%s8924_s3 + $0x90] sm:$0xff] }
 0x1ec   : > { %v5128_v8 = vpack.c.bf16 %v2583_v7, %v2581_v4  ;;  %v2618_v7 = vld [vmem:[%s8924_s3 + $0x1a8] sm:$0xff] }
 0x1ed   : > { %4566 = vmatmul.mubr.msk.f32.gmra.mrb[94].mxu0 %vm554_vm3, %v6255_v5 }
 0x1ee   : > { %1604 = vmatprep.mubr.f32.mxu0 %v6019_v32  ;;  %5109 = vmatpush1.bf16.msk.msra.mxu0 %vm6237_vm2, %v5107_v12  ;;  %v2588_v12 = vld [vmem:[%s8924_s3 + $0xb8] sm:$0xff] }
 0x1f1   : > { %4567 = vmatmul.mubr.msk.f32.gmra.mrb[96].mxu0 %vm554_vm3, %v6263_v11 }
 0x1f2   : > { %1608 = vmatprep.mubr.f32.mxu0 %v6019_v32 }
 0x1f5   : > { %4568 = vmatmul.mubr.msk.f32.gmra.mrb[0].mxu0 %vm554_vm3, %v6271_v15 }
 0x1f6   : > { %1614 = vmatprep.mubr.f32.mxu0 %v6019_v32 }
 0x1f9   : > { %4569 = vmatmul.mubr.msk.f32.gmra.mrb[2].mxu0 %vm554_vm3, %v6277_v18 }
 0x1fa   : > { %1620 = vmatprep.mubr.f32.mxu0 %v6019_v32 }
 0x1fd   : > { %4570 = vmatmul.mubr.msk.f32.gmra.mrb[4].mxu0 %vm554_vm3, %v6283_v21 }
 0x1fe   : > { %1626 = vmatprep.mubr.f32.mxu0 %v6019_v32 }
 0x201   : > { %4571 = vmatmul.mubr.msk.f32.gmra.mrb[6].mxu0 %vm554_vm3, %v6289_v24 }
 0x202   : > { %1632 = vmatprep.mubr.f32.mxu0 %v6019_v32 }
 0x205   : > { %4572 = vmatmul.mubr.msk.f32.gmra.mrb[8].mxu0 %vm554_vm3, %v6295_v27 }
 0x206   : > { %1638 = vmatprep.mubr.f32.mxu0 %v6019_v32 }
 0x209   : > { %4573 = vmatmul.mubr.msk.f32.gmra.mrb[10].mxu0 %vm554_vm3, %v6301_v30 }
 0x20a   : > { %1644 = vmatprep.mubr.f32.mxu0 %v6019_v32 }
 0x20d   : > { %4574 = vmatmul.mubr.msk.f32.gmra.mrb[12].mxu0 %vm554_vm3, %v6307_v35 }
 0x20e   : > { %1650 = vmatprep.mubr.f32.mxu0 %v6019_v32 }
 0x211   : > { %4575 = vmatmul.mubr.msk.f32.gmra.mrb[14].mxu0 %vm554_vm3, %v6313_v38 }
 0x212   : > { %1656 = vmatprep.mubr.f32.mxu0 %v6019_v32 }
 0x215   : > { %4576 = vmatmul.mubr.msk.f32.gmra.mrb[16].mxu0 %vm554_vm3, %v6319_v41 }
 0x216   : > { %1662 = vmatprep.mubr.f32.mxu0 %v6019_v32 }
 0x219   : > { %4577 = vmatmul.mubr.msk.f32.gmra.mrb[18].mxu0 %vm554_vm3, %v6325_v44 }
 0x21a   : > { %1668 = vmatprep.mubr.f32.mxu0 %v6019_v32 }
 0x21d   : > { %4578 = vmatmul.mubr.msk.f32.gmra.mrb[20].mxu0 %vm554_vm3, %v6331_v47 }
 0x21e   : > { %1674 = vmatprep.mubr.f32.mxu0 %v6019_v32 }
 0x221   : > { %4579 = vmatmul.mubr.msk.f32.gmra.mrb[22].mxu0 %vm554_vm3, %v6337_v50 }
 0x222   : > { %1680 = vmatprep.mubr.f32.mxu0 %v6019_v32 }
 0x224   : > { %v1136_v33 = vpop.f32.mrb[66].mxu0 }
 0x225   : > { %v1137_v14 = vpop.f32.mrb[67].mxu0  ;;  %4580 = vmatmul.mubr.msk.f32.gmra.mrb[24].mxu0 %vm554_vm3, %v6343_v53  ;;  %v5130_v33 = vpack.c.bf16 %v2588_v12, %v2586_v10  ;;  %v2617_v12 = vld [vmem:[%s8924_s3 + $0x1a0] sm:$0xff] }
 0x226   : > { %1686 = vmatprep.mubr.f32.mxu0 %v6019_v32  ;;  %v2585_v14 = vld [vmem:[%s8924_s3 + $0xa0] sm:$0xff] }
 0x228   : > { %v1140_v16 = vpop.f32.mrb[68].mxu0 }
 0x229   : > { %v1141_v19 = vpop.f32.mrb[69].mxu0  ;;  %4581 = vmatmul.mubr.msk.f32.gmra.mrb[26].mxu0 %vm554_vm3, %v6349_v56  ;;  %v2587_v16 = vld [vmem:[%s8924_s3 + $0xb0] sm:$0xff] }
 0x22a   : > { %1692 = vmatprep.mubr.f32.mxu0 %v6019_v32  ;;  %v5132_v19 = vpack.c.bf16 %v2587_v16, %v2585_v14 }
 0x22c   : > { %v1144_v20 = vpop.f32.mrb[70].mxu0 }
 0x22d   : > { %v1145_v23 = vpop.f32.mrb[71].mxu0  ;;  %4582 = vmatmul.mubr.msk.f32.gmra.mrb[28].mxu0 %vm554_vm3, %v6355_v59  ;;  %v2590_v20 = vld [vmem:[%s8924_s3 + $0xc8] sm:$0xff] }
 0x22e   : > { %1698 = vmatprep.mubr.f32.mxu0 %v6019_v32  ;;  %v2592_v23 = vld [vmem:[%s8924_s3 + $0xd8] sm:$0xff] }
 0x230   : > { %v1148_v25 = vpop.f32.mrb[72].mxu0 }
 0x231   : > { %v1149_v28 = vpop.f32.mrb[73].mxu0  ;;  %4583 = vmatmul.mubr.msk.f32.gmra.mrb[30].mxu0 %vm554_vm3, %v6361_v62  ;;  %v5134_v25 = vpack.c.bf16 %v2592_v23, %v2590_v20  ;;  %v2622_v20 = vld [vmem:[%s8924_s3 + $0x1c8] sm:$0xff]  ;;  %v2624_v23 = vld [vmem:[%s8924_s3 + $0x1d8] sm:$0xff] }
 0x232   : > { %1704 = vmatprep.mubr.f32.mxu0 %v6019_v32  ;;  %v2589_v28 = vld [vmem:[%s8924_s3 + $0xc0] sm:$0xff] }
 0x234   : > { %v1152_v29 = vpop.f32.mrb[74].mxu0 }
 0x235   : > { %v1153_v34 = vpop.f32.mrb[75].mxu0  ;;  %4584 = vmatmul.mubr.msk.f32.gmra.mrb[32].mxu0 %vm554_vm3, %v6367_v1  ;;  %v2591_v29 = vld [vmem:[%s8924_s3 + $0xd0] sm:$0xff] }
 0x236   : > { %1710 = vmatprep.mubr.f32.mxu0 %v6019_v32 }
 0x238   : > { %v1156_v36 = vpop.f32.mrb[76].mxu0 }
 0x239   : > { %v1157_v39 = vpop.f32.mrb[77].mxu0  ;;  %4585 = vmatmul.mubr.msk.f32.gmra.mrb[34].mxu0 %vm554_vm3, %v6373_v6  ;;  %v5136_v36 = vpack.c.bf16 %v2591_v29, %v2589_v28  ;;  %v2621_v28 = vld [vmem:[%s8924_s3 + $0x1c0] sm:$0xff]  ;;  %v2623_v29 = vld [vmem:[%s8924_s3 + $0x1d0] sm:$0xff] }
 0x23a   : > { %1716 = vmatprep.mubr.f32.mxu0 %v6019_v32 }
 0x23c   : > { %v1290_v46 = vpop.f32.mrb[78].mxu0 }
 0x23d   : > { %v1291_v48 = vpop.f32.mrb[79].mxu0  ;;  %4586 = vmatmul.mubr.msk.f32.gmra.mrb[36].mxu0 %vm554_vm3, %v6379_v9  ;;  %v2594_v46 = vld [vmem:[%s8924_s3 + $0xe8] sm:$0xff] }
 0x23e   : > { %1722 = vmatprep.mubr.f32.mxu0 %v6019_v32  ;;  %v2596_v48 = vld [vmem:[%s8924_s3 + $0xf8] sm:$0xff] }
 0x240   : > { %v1294_v49 = vpop.f32.mrb[80].mxu0 }
 0x241   : > { %v1295_v51 = vpop.f32.mrb[81].mxu0  ;;  %4587 = vmatmul.mubr.msk.f32.gmra.mrb[38].mxu0 %vm554_vm3, %v6385_v13  ;;  %v2593_v49 = vld [vmem:[%s8924_s3 + $0xe0] sm:$0xff] }
 0x242   : > { %1728 = vmatprep.mubr.f32.mxu0 %v6019_v32  ;;  %v5138_v51 = vpack.c.bf16 %v2596_v48, %v2594_v46 }
 0x245   : > { %4588 = vmatmul.mubr.msk.f32.gmra.mrb[40].mxu0 %vm554_vm3, %v6391_v17 }
 0x246   : > { %1734 = vmatprep.mubr.f32.mxu0 %v6019_v32 }
 0x249   : > { %4589 = vmatmul.mubr.msk.f32.gmra.mrb[42].mxu0 %vm554_vm3, %v6397_v22 }
 0x24a   : > { %1740 = vmatprep.mubr.f32.mxu0 %v6019_v32 }
 0x24d   : > { %4590 = vmatmul.mubr.msk.f32.gmra.mrb[44].mxu0 %vm554_vm3, %v6403_v26 }
 0x24e   : > { %1746 = vmatprep.mubr.f32.mxu0 %v6019_v32 }
 0x251   : > { %4591 = vmatmul.mubr.msk.f32.gmra.mrb[46].mxu0 %vm554_vm3, %v6409_v31 }
 0x252   : > { %1752 = vmatprep.mubr.f32.mxu0 %v6019_v32 }
 0x255   : > { %4592 = vmatmul.mubr.msk.f32.gmra.mrb[48].mxu0 %vm554_vm3, %v6415_v37 }
 0x256   : > { %1758 = vmatprep.mubr.f32.mxu0 %v6019_v32 }
 0x259   : > { %4593 = vmatmul.mubr.msk.f32.gmra.mrb[98].mxu0 %vm554_vm3, %v6420_v40 }
 0x25a   : > { %1762 = vmatprep.mubr.f32.mxu0 %v6019_v32 }
 0x25d   : > { %4594 = vmatmul.mubr.msk.f32.gmra.mrb[100].mxu0 %vm554_vm3, %v6425_v42 }
 0x25e   : > { %1766 = vmatprep.mubr.f32.mxu0 %v6019_v32 }
 0x261   : > { %4595 = vmatmul.mubr.msk.f32.gmra.mrb[102].mxu0 %vm554_vm3, %v6430_v43 }
 0x262   : > { %1770 = vmatprep.mubr.f32.mxu0 %v6019_v32 }
 0x265   : > { %4596 = vmatmul.mubr.msk.f32.gmra.mrb[104].mxu0 %vm554_vm3, %v6435_v45 }
 0x266   : > { %1904 = vmatprep.mubr.f32.mxu0 %v6019_v32 }
 0x269   : > { %4599 = vmatmul.mubr.msk.f32.vlgmr.msra.gmra.mrb[106].mxu0 %vm554_vm3, %v6250_v2 }
 0x26a   : > { %1908 = vmatprep.mubr.f32.mxu0 %v6019_v32 }
 0x26d   : > { %4600 = vmatmul.mubr.msk.f32.gmra.mrb[108].mxu0 %vm554_vm3, %v6255_v5 }
 0x26e   : > { %1912 = vmatprep.mubr.f32.mxu0 %v6019_v32 }
 0x271   : > { %4601 = vmatmul.mubr.msk.f32.gmra.mrb[110].mxu0 %vm554_vm3, %v6263_v11 }
 0x272   : > { %1916 = vmatprep.mubr.f32.mxu0 %v6019_v32 }
 0x275   : > { %4602 = vmatmul.mubr.msk.f32.gmra.mrb[112].mxu0 %vm554_vm3, %v6271_v15 }
 0x276   : > { %1920 = vmatprep.mubr.f32.mxu0 %v6019_v32 }
 0x279   : > { %4603 = vmatmul.mubr.msk.f32.gmra.mrb[0].mxu0 %vm554_vm3, %v6277_v18 }
 0x27a   : > { %1926 = vmatprep.mubr.f32.mxu0 %v6019_v32 }
 0x27d   : > { %4604 = vmatmul.mubr.msk.f32.gmra.mrb[2].mxu0 %vm554_vm3, %v6283_v21 }
 0x27e   : > { %1932 = vmatprep.mubr.f32.mxu0 %v6019_v32 }
 0x281   : > { %4605 = vmatmul.mubr.msk.f32.gmra.mrb[4].mxu0 %vm554_vm3, %v6289_v24 }
 0x282   : > { %1938 = vmatprep.mubr.f32.mxu0 %v6019_v32 }
 0x285   : > { %4606 = vmatmul.mubr.msk.f32.gmra.mrb[6].mxu0 %vm554_vm3, %v6295_v27 }
 0x286   : > { %1944 = vmatprep.mubr.f32.mxu0 %v6019_v32 }
 0x289   : > { %4607 = vmatmul.mubr.msk.f32.gmra.mrb[8].mxu0 %vm554_vm3, %v6301_v30 }
 0x28a   : > { %1950 = vmatprep.mubr.f32.mxu0 %v6019_v32 }
 0x28d   : > { %4608 = vmatmul.mubr.msk.f32.gmra.mrb[10].mxu0 %vm554_vm3, %v6307_v35 }
 0x28e   : > { %1956 = vmatprep.mubr.f32.mxu0 %v6019_v32 }
 0x291   : > { %4609 = vmatmul.mubr.msk.f32.gmra.mrb[12].mxu0 %vm554_vm3, %v6313_v38 }
 0x292   : > { %1962 = vmatprep.mubr.f32.mxu0 %v6019_v32 }
 0x295   : > { %4610 = vmatmul.mubr.msk.f32.gmra.mrb[14].mxu0 %vm554_vm3, %v6319_v41 }
 0x296   : > { %1968 = vmatprep.mubr.f32.mxu0 %v6019_v32 }
 0x299   : > { %4611 = vmatmul.mubr.msk.f32.gmra.mrb[16].mxu0 %vm554_vm3, %v6325_v44 }
 0x29a   : > { %1974 = vmatprep.mubr.f32.mxu0 %v6019_v32 }
 0x29d   : > { %4612 = vmatmul.mubr.msk.f32.gmra.mrb[18].mxu0 %vm554_vm3, %v6331_v47 }
 0x29e   : > { %1980 = vmatprep.mubr.f32.mxu0 %v6019_v32 }
 0x2a1   : > { %4613 = vmatmul.mubr.msk.f32.gmra.mrb[20].mxu0 %vm554_vm3, %v6337_v50 }
 0x2a2   : > { %1986 = vmatprep.mubr.f32.mxu0 %v6019_v32 }
 0x2a5   : > { %4614 = vmatmul.mubr.msk.f32.gmra.mrb[22].mxu0 %vm554_vm3, %v6343_v53 }
 0x2a6   : > { %1992 = vmatprep.mubr.f32.mxu0 %v6019_v32 }
 0x2a8   : > { %v1448_v2 = vpop.f32.mrb[82].mxu0 }
 0x2a9   : > { %v1449_v5 = vpop.f32.mrb[83].mxu0  ;;  %4615 = vmatmul.mubr.msk.f32.gmra.mrb[24].mxu0 %vm554_vm3, %v6349_v56  ;;  %v2566_v56 = vld [vmem:[%s8924_s3 + $0x8] sm:$0xff]  ;;  %v2595_v2 = vld [vmem:[%s8924_s3 + $0xf0] sm:$0xff] }
 0x2aa   : > { %1998 = vmatprep.mubr.f32.mxu0 %v6019_v32  ;;  %v5140_v5 = vpack.c.bf16 %v2595_v2, %v2593_v49  ;;  %v4656_v2 = vld [vmem:[%s8924_s3 + $0x1e8] sm:$0xff] }
 0x2ac   : > { %v1452_v11 = vpop.f32.mrb[84].mxu0 }
 0x2ad   : > { %v1453_v15 = vpop.f32.mrb[85].mxu0  ;;  %4616 = vmatmul.mubr.msk.f32.gmra.mrb[26].mxu0 %vm554_vm3, %v6355_v59  ;;  %v2568_v59 = vld [vmem:[%s8924_s3 + $0x18] sm:$0xff] }
 0x2ae   : > { %2004 = vmatprep.mubr.f32.mxu0 %v6019_v32 }
 0x2b0   : > { %v1456_v18 = vpop.f32.mrb[86].mxu0 }
 0x2b1   : > { %v1457_v21 = vpop.f32.mrb[87].mxu0  ;;  %4617 = vmatmul.mubr.msk.f32.gmra.mrb[28].mxu0 %vm554_vm3, %v6361_v62  ;;  %v5110_v62 = vpack.c.bf16 %v2568_v59, %v2566_v56  ;;  %v2598_v18 = vld [vmem:[%s8924_s3 + $0x108] sm:$0xff]  ;;  %v2608_v59 = vld [vmem:[%s8924_s3 + $0x158] sm:$0xff] }
 0x2b2   : > { %2010 = vmatprep.mubr.f32.mxu0 %v6019_v32  ;;  %v2600_v21 = vld [vmem:[%s8924_s3 + $0x118] sm:$0xff]  ;;  %v2606_v56 = vld [vmem:[%s8924_s3 + $0x148] sm:$0xff] }
 0x2b3   : > { %5111 = vmatprep.subr.bf16.mxu1 %v5110_v62 }
 0x2b4   : > { %v1460_v24 = vpop.f32.mrb[88].mxu0 }
 0x2b5   : > { %v1461_v27 = vpop.f32.mrb[89].mxu0  ;;  %4618 = vmatmul.mubr.msk.f32.gmra.mrb[30].mxu0 %vm554_vm3, %v6367_v1  ;;  %v2565_v1 = vld [vmem:[%s8924_s3] sm:$0xff] }
 0x2b6   : > { %2016 = vmatprep.mubr.f32.mxu0 %v6019_v32  ;;  %v2597_v24 = vld [vmem:[%s8924_s3 + $0x100] sm:$0xff]  ;;  %v5142_v27 = vpack.c.bf16 %v2600_v21, %v2598_v18 }
 0x2b8   : > { %v1464_v30 = vpop.f32.mrb[90].mxu0 }
 0x2b9   : > { %v1465_v35 = vpop.f32.mrb[91].mxu0  ;;  %4619 = vmatmul.mubr.msk.f32.gmra.mrb[32].mxu0 %vm554_vm3, %v6373_v6  ;;  %v2599_v30 = vld [vmem:[%s8924_s3 + $0x110] sm:$0xff] }
 0x2ba   : > { %2022 = vmatprep.mubr.f32.mxu0 %v6019_v32  ;;  %v2602_v35 = vld [vmem:[%s8924_s3 + $0x128] sm:$0xff] }
 0x2bc   : > { %v1598_v38 = vpop.f32.mrb[92].mxu0 }
 0x2bd   : > { %v1599_v41 = vpop.f32.mrb[93].mxu0  ;;  %4620 = vmatmul.mubr.msk.f32.gmra.mrb[34].mxu0 %vm554_vm3, %v6379_v9  ;;  %v2570_v9 = vld [vmem:[%s8924_s3 + $0x28] sm:$0xff]  ;;  %v2604_v38 = vld [vmem:[%s8924_s3 + $0x138] sm:$0xff] }
 0x2be   : > { %2028 = vmatprep.mubr.f32.mxu0 %v6019_v32  ;;  %v5144_v41 = vpack.c.bf16 %v2599_v30, %v2597_v24 }
 0x2c0   : > { %v1602_v44 = vpop.f32.mrb[94].mxu0 }
 0x2c1   : > { %v1603_v47 = vpop.f32.mrb[95].mxu0  ;;  %4621 = vmatmul.mubr.msk.f32.gmra.mrb[36].mxu0 %vm554_vm3, %v6385_v13  ;;  %v2572_v13 = vld [vmem:[%s8924_s3 + $0x38] sm:$0xff]  ;;  %v5146_v44 = vpack.c.bf16 %v2604_v38, %v2602_v35 }
 0x2c2   : > { %2034 = vmatprep.mubr.f32.mxu0 %v6019_v32  ;;  %v2601_v47 = vld [vmem:[%s8924_s3 + $0x120] sm:$0xff] }
 0x2c4   : > { %v1606_v50 = vpop.f32.mrb[96].mxu0 }
 0x2c5   : > { %v1607_v53 = vpop.f32.mrb[97].mxu0  ;;  %4622 = vmatmul.mubr.msk.f32.gmra.mrb[38].mxu0 %vm554_vm3, %v6391_v17  ;;  %v5114_v17 = vpack.c.bf16 %v2572_v13, %v2570_v9  ;;  %v2603_v50 = vld [vmem:[%s8924_s3 + $0x130] sm:$0xff] }
 0x2c6   : > { %2040 = vmatprep.mubr.f32.mxu0 %v6019_v32  ;;  %v2607_v9 = vld [vmem:[%s8924_s3 + $0x150] sm:$0xff] }
 0x2c9   : > { %4623 = vmatmul.mubr.msk.f32.gmra.mrb[40].mxu0 %vm554_vm3, %v6397_v22  ;;  %v2569_v22 = vld [vmem:[%s8924_s3 + $0x20] sm:$0xff] }
 0x2ca   : > { %2046 = vmatprep.mubr.f32.mxu0 %v6019_v32 }
 0x2cd   : > { %4624 = vmatmul.mubr.msk.f32.gmra.mrb[42].mxu0 %vm554_vm3, %v6403_v26  ;;  %v2571_v26 = vld [vmem:[%s8924_s3 + $0x30] sm:$0xff] }
 0x2ce   : > { %2052 = vmatprep.mubr.f32.mxu0 %v6019_v32 }
 0x2d1   : > { %4625 = vmatmul.mubr.msk.f32.gmra.mrb[44].mxu0 %vm554_vm3, %v6409_v31  ;;  %v5116_v31 = vpack.c.bf16 %v2571_v26, %v2569_v22 }
 0x2d2   : > { %2058 = vmatprep.mubr.f32.mxu0 %v6019_v32 }
 0x2d5   : > { %4626 = vmatmul.mubr.msk.f32.gmra.mrb[46].mxu0 %vm554_vm3, %v6415_v37  ;;  %v2574_v37 = vld [vmem:[%s8924_s3 + $0x48] sm:$0xff] }
 0x2d6   : > { %2064 = vmatprep.mubr.f32.mxu0 %v6019_v32 }
 0x2d9   : > { %4627 = vmatmul.mubr.msk.f32.gmra.mrb[48].mxu0 %vm554_vm3, %v6420_v40  ;;  %v2576_v40 = vld [vmem:[%s8924_s3 + $0x58] sm:$0xff] }
 0x2da   : > { %2070 = vmatprep.mubr.f32.mxu0 %v6019_v32 }
 0x2dd   : > { %4628 = vmatmul.mubr.msk.f32.gmra.mrb[114].mxu0 %vm554_vm3, %v6425_v42  ;;  %v5118_v42 = vpack.c.bf16 %v2576_v40, %v2574_v37  ;;  %v2610_v37 = vld [vmem:[%s8924_s3 + $0x168] sm:$0xff]  ;;  %v2612_v40 = vld [vmem:[%s8924_s3 + $0x178] sm:$0xff] }
 0x2de   : > { %2074 = vmatprep.mubr.f32.mxu0 %v6019_v32 }
 0x2e1   : > { %4629 = vmatmul.mubr.msk.f32.gmra.mrb[116].mxu0 %vm554_vm3, %v6430_v43  ;;  %v2573_v43 = vld [vmem:[%s8924_s3 + $0x40] sm:$0xff] }
 0x2e2   : > { %2078 = vmatprep.mubr.f32.mxu0 %v6019_v32  ;;  %v2567_v32 = vld [vmem:[%s8924_s3 + $0x10] sm:$0xff] }
 0x2e3   : > { %v5112_v6 = vpack.c.bf16 %v2567_v32, %v2565_v1  ;;  %v5148_v1 = vpack.c.bf16 %v2603_v50, %v2601_v47  ;;  %v5150_v32 = vpack.c.bf16 %v2608_v59, %v2606_v56 }
 0x2e5   : > { %4630 = vmatmul.mubr.msk.f32.gmra.mrb[118].mxu0 %vm554_vm3, %v6435_v45  ;;  %5113 = vmatpush1.bf16.msra.mxu1 %v5112_v6  ;;  %v2575_v45 = vld [vmem:[%s8924_s3 + $0x50] sm:$0xff]  ;;  %v2605_v6 = vld [vmem:[%s8924_s3 + $0x140] sm:$0xff] }
 0x2e6   : > { %5115 = vmatprep.subr.bf16.mxu1 %v5114_v17  ;;  %v5120_v52 = vpack.c.bf16 %v2575_v45, %v2573_v43  ;;  %v5152_v22 = vpack.c.bf16 %v2607_v9, %v2605_v6  ;;  %v2609_v43 = vld [vmem:[%s8924_s3 + $0x160] sm:$0xff]  ;;  %v2611_v45 = vld [vmem:[%s8924_s3 + $0x170] sm:$0xff] }
 0x2e7   : > { %v5156_v54 = vpack.c.bf16 %v2611_v45, %v2609_v43 }
 0x2e9   : > { %5117 = vmatpush1.bf16.msra.mxu1 %v5116_v31 }
 0x2ea   : > { %5119 = vmatprep.subr.bf16.mxu1 %v5118_v42  ;;  %v5154_v42 = vpack.c.bf16 %v2612_v40, %v2610_v37 }
 0x2ed   : > { %5121 = vmatpush1.bf16.msra.mxu1 %v5120_v52 }
 0x2ee   : > { %5123 = vmatprep.subr.bf16.mxu1 %v5122_v57  ;;  %v2614_v57 = vld [vmem:[%s8924_s3 + $0x188] sm:$0xff] }
 0x2ef   : > { %v5158_v60 = vpack.c.bf16 %v2616_v58, %v2614_v57 }
 0x2f1   : > { %5125 = vmatpush1.bf16.msra.mxu1 %v5124_v61  ;;  %v2613_v61 = vld [vmem:[%s8924_s3 + $0x180] sm:$0xff] }
 0x2f2   : > { %5127 = vmatprep.subr.bf16.mxu1 %v5126_v3  ;;  %v5160_v3 = vpack.c.bf16 %v2615_v63, %v2613_v61 }
 0x2f5   : > { %5129 = vmatpush1.bf16.msra.mxu1 %v5128_v8  ;;  %v2620_v8 = vld [vmem:[%s8924_s3 + $0x1b8] sm:$0xff] }
 0x2f6   : > { %5131 = vmatprep.subr.bf16.mxu1 %v5130_v33  ;;  %v5162_v10 = vpack.c.bf16 %v2620_v8, %v2618_v7  ;;  %v2619_v33 = vld [vmem:[%s8924_s3 + $0x1b0] sm:$0xff] }
 0x2f7   : > { %v5164_v16 = vpack.c.bf16 %v2619_v33, %v2617_v12 }
 0x2f9   : > { %5133 = vmatpush1.bf16.msra.mxu1 %v5132_v19 }
 0x2fa   : > { %5135 = vmatprep.subr.bf16.mxu1 %v5134_v25  ;;  %v5166_v25 = vpack.c.bf16 %v2624_v23, %v2622_v20  ;;  %v2459_v23 = vlaneseq }
 0x2fd   : > { %5137 = vmatpush1.bf16.msra.mxu1 %v5136_v36  ;;  %v5168_v36 = vpack.c.bf16 %v2623_v29, %v2621_v28  ;;  %v7222_v28 = vshrl.u32 %v2459_v23, 7 }
 0x2fe   : > { %5139 = vmatprep.subr.bf16.mxu1 %v5138_v51 }
 0x2ff   : > { %8961 = vst [vmem:[#allocation14_spill] sm:$0xff] %v7222_v28 }
 0x301   : > { %5141 = vmatpush1.bf16.msra.mxu1 %v5140_v5  ;;  %v4658_v5 = vld [vmem:[%s8924_s3 + $0x1f8] sm:$0xff] }
 0x302   : > { %5143 = vmatprep.subr.bf16.mxu1 %v5142_v27 }
 0x305   : > { %5145 = vmatpush1.bf16.msra.mxu1 %v5144_v41 }
 0x306   : > { %5147 = vmatprep.subr.bf16.mxu1 %v5146_v44 }
 0x309   : > { %5149 = vmatpush1.bf16.msra.mxu1 %v5148_v1 }
 0x30a   : > { %5151 = vmatprep.subr.bf16.mxu1 %v5150_v32 }
 0x30d   : > { %5153 = vmatpush1.bf16.msra.mxu1 %v5152_v22 }
 0x30e   : > { %5155 = vmatprep.subr.bf16.mxu1 %v5154_v42 }
 0x311   : > { %5157 = vmatpush1.bf16.msra.mxu1 %v5156_v54 }
 0x312   : > { %5159 = vmatprep.subr.bf16.mxu1 %v5158_v60 }
 0x315   : > { %5161 = vmatpush1.bf16.msra.mxu1 %v5160_v3 }
 0x316   : > { %5163 = vmatprep.subr.bf16.mxu1 %v5162_v10 }
 0x319   : > { %5165 = vmatpush1.bf16.msra.mxu1 %v5164_v16 }
 0x31a   : > { %5167 = vmatprep.subr.bf16.mxu1 %v5166_v25 }
 0x31d   : > { %5169 = vmatpush1.bf16.msra.mxu1 %v5168_v36 }
 0x32c   : > { %v1760_v34 = vpop.f32.mrb[98].mxu0 }
 0x32d   : > { %v1761_v39 = vpop.f32.mrb[99].mxu0 }
 0x330   : > { %v1764_v11 = vpop.f32.mrb[100].mxu0 }
 0x331   : > { %v1765_v15 = vpop.f32.mrb[101].mxu0 }
 0x332   : > { %v5170_v15 = vpack.c.bf16 %v4658_v5, %v4656_v2  ;;  %v8938_v2 = vsub.s32 1, %v7222_v28  ;;  %v2457_v5 = vld [vmem:[%s8923_s2] sm:$0x3] }
 0x334   : > { %v1768_v53 = vpop.f32.mrb[102].mxu0  ;;  %5171 = vmatprep.subr.bf16.mxu1 %v5170_v15  ;;  %v8937_v15 = vsub.s32 0, %v7222_v28  ;;  %v4659_v28 = vld [vmem:[%s8924_s3 + $0x200] sm:$0xff] }
 0x335   : > { %v1769_v62 = vpop.f32.mrb[103].mxu0 }
 0x338   : > { %v1772_v13 = vpop.f32.mrb[104].mxu0 }
 0x339   : > { %v1773_v17 = vpop.f32.mrb[105].mxu0 }
 0x33c   : > { %v1906_v26 = vpop.f32.mrb[106].mxu0 }
 0x33d   : > { %v1907_v31 = vpop.f32.mrb[107].mxu0 }
 0x340   : > { %v1910_v52 = vpop.f32.mrb[108].mxu0 }
 0x341   : > { %v1911_v55 = vpop.f32.mrb[109].mxu0 }
 0x344   : > { %v1914_v0 = vpop.f32.mrb[110].mxu0 }
 0x345   : > { %v1915_v4 = vpop.f32.mrb[111].mxu0 }
 0x348   : > { %v1918_v14 = vpop.f32.mrb[112].mxu0 }
 0x349   : > { %v1919_v19 = vpop.f32.mrb[113].mxu0 }
 0x34c   : > { %v7016_v34 = vpop.f32.mrb[0].mxu0 }
 0x34d   : > { %2183 = vrot.lane.b32.xlu0 %v7016_v34, %s6021_s19  ;;  %v7020_v39 = vpop.f32.mrb[1].mxu0 }
 0x350   : > { %v7022_v46 = vpop.f32.mrb[2].mxu0 }
 0x351   : > { %2185 = vrot.lane.b32.xlu0 %v7020_v39, %s6021_s19  ;;  %2187 = vrot.lane.b32.xlu1 %v7022_v46, %s6021_s19  ;;  %v7028_v48 = vpop.f32.mrb[3].mxu0 }
 0x354   : > { %v7030_v49 = vpop.f32.mrb[4].mxu0 }
 0x355   : > { %2189 = vrot.lane.b32.xlu1 %v7028_v48, %s6021_s19  ;;  %2191 = vrot.lane.b32.xlu0 %v7030_v49, %s6021_s19  ;;  %v7036_v51 = vpop.f32.mrb[5].mxu0 }
 0x358   : > { %v7044_v11 = vpop.f32.mrb[6].mxu0 }
 0x359   : > { %2193 = vrot.lane.b32.xlu1 %v7036_v51, %s6021_s19  ;;  %2195 = vrot.lane.b32.xlu0 %v7044_v11, %s6021_s19  ;;  %v7050_v18 = vpop.f32.mrb[7].mxu0 }
 0x35c   : > { %v7052_v21 = vpop.f32.mrb[8].mxu0 }
 0x35d   : > { %2197 = vrot.lane.b32.xlu1 %v7050_v18, %s6021_s19  ;;  %2199 = vrot.lane.b32.xlu0 %v7052_v21, %s6021_s19  ;;  %v7058_v24 = vpop.f32.mrb[9].mxu0 }
 0x360   : > { %v7060_v27 = vpop.f32.mrb[10].mxu0 }
 0x361   : > { %2201 = vrot.lane.b32.xlu1 %v7058_v24, %s6021_s19  ;;  %2203 = vrot.lane.b32.xlu0 %v7060_v27, %s6021_s19  ;;  %v7066_v30 = vpop.f32.mrb[11].mxu0 }
 0x364   : > { %v7068_v35 = vpop.f32.mrb[12].mxu0 }
 0x365   : > { %2205 = vrot.lane.b32.xlu1 %v7066_v30, %s6021_s19  ;;  %2207 = vrot.lane.b32.xlu0 %v7068_v35, %s6021_s19  ;;  %v7074_v38 = vpop.f32.mrb[13].mxu0 }
 0x368   : > { %v7076_v41 = vpop.f32.mrb[14].mxu0 }
 0x369   : > { %2209 = vrot.lane.b32.xlu1 %v7074_v38, %s6021_s19  ;;  %2211 = vrot.lane.b32.xlu0 %v7076_v41, %s6021_s19  ;;  %v7082_v44 = vpop.f32.mrb[15].mxu0 }
 0x36c   : > { %v7084_v47 = vpop.f32.mrb[16].mxu0 }
 0x36d   : > { %2213 = vrot.lane.b32.xlu1 %v7082_v44, %s6021_s19  ;;  %2215 = vrot.lane.b32.xlu0 %v7084_v47, %s6021_s19  ;;  %v7090_v50 = vpop.f32.mrb[17].mxu0 }
 0x370   : > { %v7092_v53 = vpop.f32.mrb[18].mxu0 }
 0x371   : > { %2217 = vrot.lane.b32.xlu1 %v7090_v50, %s6021_s19  ;;  %2219 = vrot.lane.b32.xlu0 %v7092_v53, %s6021_s19  ;;  %v7098_v56 = vpop.f32.mrb[19].mxu0 }
 0x374   : > { %v7100_v59 = vpop.f32.mrb[20].mxu0 }
 0x375   : > { %2221 = vrot.lane.b32.xlu1 %v7098_v56, %s6021_s19  ;;  %2223 = vrot.lane.b32.xlu0 %v7100_v59, %s6021_s19  ;;  %v7106_v62 = vpop.f32.mrb[21].mxu0 }
 0x378   : > { %v7108_v1 = vpop.f32.mrb[22].mxu0 }
 0x379   : > { %2225 = vrot.lane.b32.xlu1 %v7106_v62, %s6021_s19  ;;  %2227 = vrot.lane.b32.xlu0 %v7108_v1, %s6021_s19  ;;  %v7114_v32 = vpop.f32.mrb[23].mxu0 }
 0x37c   : > { %v7116_v6 = vpop.f32.mrb[24].mxu0 }
 0x37d   : > { %2229 = vrot.lane.b32.xlu1 %v7114_v32, %s6021_s19  ;;  %2231 = vrot.lane.b32.xlu0 %v7116_v6, %s6021_s19  ;;  %v7122_v9 = vpop.f32.mrb[25].mxu0 }
 0x380   : > { %v7124_v13 = vpop.f32.mrb[26].mxu0 }
 0x381   : > { %2233 = vrot.lane.b32.xlu1 %v7122_v9, %s6021_s19  ;;  %2235 = vrot.lane.b32.xlu0 %v7124_v13, %s6021_s19  ;;  %v7130_v17 = vpop.f32.mrb[27].mxu0 }
 0x384   : > { %v7132_v22 = vpop.f32.mrb[28].mxu0 }
 0x385   : > { %2237 = vrot.lane.b32.xlu1 %v7130_v17, %s6021_s19  ;;  %2239 = vrot.lane.b32.xlu0 %v7132_v22, %s6021_s19  ;;  %v7138_v26 = vpop.f32.mrb[29].mxu0 }
 0x388   : > { %v7140_v31 = vpop.f32.mrb[30].mxu0 }
 0x389   : > { %2241 = vrot.lane.b32.xlu1 %v7138_v26, %s6021_s19  ;;  %2243 = vrot.lane.b32.xlu0 %v7140_v31, %s6021_s19  ;;  %v7146_v37 = vpop.f32.mrb[31].mxu0 }
 0x38c   : > { %v7148_v40 = vpop.f32.mrb[32].mxu0 }
 0x38d   : > { %2245 = vrot.lane.b32.xlu1 %v7146_v37, %s6021_s19  ;;  %2247 = vrot.lane.b32.xlu0 %v7148_v40, %s6021_s19  ;;  %v7154_v42 = vpop.f32.mrb[33].mxu0 }
 0x390   : > { %v7156_v43 = vpop.f32.mrb[34].mxu0 }
 0x391   : > { %2249 = vrot.lane.b32.xlu1 %v7154_v42, %s6021_s19  ;;  %2251 = vrot.lane.b32.xlu0 %v7156_v43, %s6021_s19  ;;  %v7162_v45 = vpop.f32.mrb[35].mxu0 }
 0x394   : > { %v7164_v52 = vpop.f32.mrb[36].mxu0 }
 0x395   : > { %2253 = vrot.lane.b32.xlu1 %v7162_v45, %s6021_s19  ;;  %2255 = vrot.lane.b32.xlu0 %v7164_v52, %s6021_s19  ;;  %v7170_v54 = vpop.f32.mrb[37].mxu0 }
 0x398   : > { %v7172_v55 = vpop.f32.mrb[38].mxu0 }
 0x399   : > { %2257 = vrot.lane.b32.xlu1 %v7170_v54, %s6021_s19  ;;  %2259 = vrot.lane.b32.xlu0 %v7172_v55, %s6021_s19  ;;  %v7178_v57 = vpop.f32.mrb[39].mxu0 }
 0x39c   : > { %v7180_v58 = vpop.f32.mrb[40].mxu0 }
 0x39d   : > { %2261 = vrot.lane.b32.xlu1 %v7178_v57, %s6021_s19  ;;  %2263 = vrot.lane.b32.xlu0 %v7180_v58, %s6021_s19  ;;  %v7186_v60 = vpop.f32.mrb[41].mxu0 }
 0x3a0   : > { %v7188_v61 = vpop.f32.mrb[42].mxu0 }
 0x3a1   : > { %2265 = vrot.lane.b32.xlu1 %v7186_v60, %s6021_s19  ;;  %2267 = vrot.lane.b32.xlu0 %v7188_v61, %s6021_s19  ;;  %v7194_v63 = vpop.f32.mrb[43].mxu0 }
 0x3a4   : > { %v7196_v0 = vpop.f32.mrb[44].mxu0 }
 0x3a5   : > { %8956 = vst [vmem:[#allocation9_spill] sm:$0xff] %v7196_v0  ;;  %2269 = vrot.lane.b32.xlu1 %v7194_v63, %s6021_s19  ;;  %2271 = vrot.lane.b32.xlu0 %v7196_v0, %s6021_s19  ;;  %v7202_v3 = vpop.f32.mrb[45].mxu0 }
 0x3a8   : > { %v7204_v4 = vpop.f32.mrb[46].mxu0 }
 0x3a9   : > { %8957 = vst [vmem:[#allocation10_spill] sm:$0xff] %v7204_v4  ;;  %2273 = vrot.lane.b32.xlu1 %v7202_v3, %s6021_s19  ;;  %2275 = vrot.lane.b32.xlu0 %v7204_v4, %s6021_s19  ;;  %v7210_v7 = vpop.f32.mrb[47].mxu0 }
 0x3aa   : > { %8958 = vst [vmem:[#allocation11_spill] sm:$0xff] %v7210_v7 }
 0x3ac   : > { %v7212_v8 = vpop.f32.mrb[48].mxu0 }
 0x3ad   : > { %8959 = vst [vmem:[#allocation12_spill] sm:$0xff] %v7212_v8  ;;  %2277 = vrot.lane.b32.xlu1 %v7210_v7, %s6021_s19  ;;  %2279 = vrot.lane.b32.xlu0 %v7212_v8, %s6021_s19  ;;  %v7218_v10 = vpop.f32.mrb[49].mxu0 }
 0x3ae   : > { %8960 = vst [vmem:[#allocation13_spill] sm:$0xff] %v7218_v10 }
 0x3b0   : > { %v2072_v12 = vpop.f32.mrb[114].mxu0 }
 0x3b1   : > { %2281 = vrot.lane.b32.xlu1 %v7218_v10, %s6021_s19  ;;  %v2073_v33 = vpop.f32.mrb[115].mxu0  ;;  %v7240_v10 = vrot.slane %v2457_v5, %v8937_v15 }
 0x3b4   : > { %v2076_v14 = vpop.f32.mrb[116].mxu0 }
 0x3b5   : > { %v2077_v16 = vpop.f32.mrb[117].mxu0 }
 0x3b8   : > { %v2080_v19 = vpop.f32.mrb[118].mxu0 }
 0x3b9   : > { %v2081_v20 = vpop.f32.mrb[119].mxu0  ;;  %v7233_v19 = vrot.slane %v2457_v5, %v8938_v2 }
 0x3bf   : > { %v2184_v25 = vpop.permute.xlu0 %2183 }
 0x3c3   : > { %v2186_v29 = vpop.permute.xlu0 %2185  ;;  %v2188_v36 = vpop.permute.xlu1 %2187 }
 0x3c4   : > { %v2284_v12 = vsel %vm2283_vm4, %v2184_v25, %v2186_v29  ;;  %v2360_v16 = vmin.f32 %v7020_v39, %v2186_v29  ;;  %v4655_v29 = vld [vmem:[%s8924_s3 + $0x1e0] sm:$0xff] }
 0x3c5   : > { %v2359_v8 = vmin.f32 %v7016_v34, %v2284_v12 }
 0x3c7   : > { %v2190_v33 = vpop.permute.xlu1 %2189  ;;  %v2192_v14 = vpop.permute.xlu0 %2191 }
 0x3c8   : > { %v2285_v20 = vsel %vm2283_vm4, %v2188_v36, %v2190_v33  ;;  %v2362_v23 = vmin.f32 %v7028_v48, %v2190_v33  ;;  %v4657_v48 = vld [vmem:[%s8924_s3 + $0x1f0] sm:$0xff] }
 0x3c9   : > { %v2361_v25 = vmin.f32 %v7022_v46, %v2285_v20  ;;  %v4660_v46 = vld [vmem:[%s8924_s3 + $0x208] sm:$0xff]  ;;  %v5172_v20 = vpack.c.bf16 %v4657_v48, %v4655_v29  ;;  %v4666_v29 = vld [vmem:[%s8924_s3 + $0x238] sm:$0xff] }
 0x3ca   : > { %v2410_v4 = vmin.f32 %v2360_v16, %v2362_v23 }
 0x3cb   : > { %v2409_v7 = vmin.f32 %v2359_v8, %v2361_v25  ;;  %v2194_v0 = vpop.permute.xlu1 %2193  ;;  %v2196_v39 = vpop.permute.xlu0 %2195  ;;  %v4662_v8 = vld [vmem:[%s8924_s3 + $0x218] sm:$0xff] }
 0x3cc   : > { %v2470_v34 = vsub.f32 %v7233_v19, %v2410_v4  ;;  %v2286_v36 = vsel %vm2283_vm4, %v2192_v14, %v2194_v0  ;;  %v2364_v5 = vmin.f32 %v7036_v51, %v2194_v0  ;;  %v5174_v2 = vpack.c.bf16 %v4662_v8, %v4660_v46 }
 0x3cd   : > { %v2469_v12 = vsub.f32 %v7240_v10, %v2409_v7  ;;  %v2363_v33 = vmin.f32 %v7030_v49, %v2286_v36  ;;  %v4661_v7 = vld [vmem:[%s8924_s3 + $0x210] sm:$0xff] }
 0x3ce   : > { %v7260_v16 = vmax.f32 %v2470_v34, 0.0  ;;  %v2412_v4 = vmin.f32 %v2362_v23, %v2364_v5  ;;  %v5176_v46 = vpack.c.bf16 %v4661_v7, %v4659_v28 }
 0x3cf   : > { %v7262_v14 = vmax.f32 %v2469_v12, 0.0  ;;  %v2411_v51 = vmin.f32 %v2361_v25, %v2363_v33  ;;  %v2198_v0 = vpop.permute.xlu1 %2197  ;;  %v2200_v15 = vpop.permute.xlu0 %2199  ;;  %v4664_v25 = vld [vmem:[%s8924_s3 + $0x228] sm:$0xff] }
 0x3d0   : > { %8962 = vst [vmem:[#allocation15_spill] sm:$0xff] %v7260_v16  ;;  %v2472_v49 = vsub.f32 %v7233_v19, %v2412_v4  ;;  %v2287_v34 = vsel %vm2283_vm4, %v2196_v39, %v2198_v0  ;;  %v2366_v23 = vmin.f32 %v7050_v18, %v2198_v0  ;;  %4631 = vmatprep.mubr.msk.f32.mxu1 %vm2625_vm5, %v7260_v16 }
 0x3d1   : > { %v2471_v48 = vsub.f32 %v7240_v10, %v2411_v51  ;;  %v2365_v36 = vmin.f32 %v7044_v11, %v2287_v34  ;;  %2763 = vmatmul.mubr.f32.vlgmr.msra.gmra.mrb[0].mxu1 %v7262_v14  ;;  %v5178_v16 = vpack.c.bf16 %v4666_v29, %v4664_v25  ;;  %v4663_v51 = vld [vmem:[%s8924_s3 + $0x220] sm:$0xff]  ;;  %v4665_v11 = vld [vmem:[%s8924_s3 + $0x230] sm:$0xff] }
 0x3d2   : > { %v7284_v39 = vmax.f32 %v2472_v49, 0.0  ;;  %v2414_v18 = vmin.f32 %v2364_v5, %v2366_v23  ;;  %5173 = vmatpush1.bf16.msra.mxu1 %v5172_v20  ;;  %v5180_v34 = vpack.c.bf16 %v4665_v11, %v4663_v51 }
 0x3d3   : > { %v7286_v8 = vmax.f32 %v2471_v48, 0.0  ;;  %v2413_v12 = vmin.f32 %v2363_v33, %v2365_v36  ;;  %v2202_v4 = vpop.permute.xlu1 %2201  ;;  %v2204_v0 = vpop.permute.xlu0 %2203  ;;  %5175 = vmatprep.subr.bf16.mxu1 %v5174_v2  ;;  %v4668_v2 = vld [vmem:[%s8924_s3 + $0x248] sm:$0xff]  ;;  %v4670_v33 = vld [vmem:[%s8924_s3 + $0x258] sm:$0xff] }
 0x3d4   : > { %v2474_v49 = vsub.f32 %v7233_v19, %v2414_v18  ;;  %v2288_v5 = vsel %vm2283_vm4, %v2200_v15, %v2202_v4  ;;  %v2368_v28 = vmin.f32 %v7058_v24, %v2202_v4  ;;  %4632 = vmatprep.mubr.msk.f32.mxu1 %vm2625_vm5, %v7284_v39  ;;  %v5182_v4 = vpack.c.bf16 %v4670_v33, %v4668_v2 }
 0x3d5   : > { %v2473_v20 = vsub.f32 %v7240_v10, %v2413_v12  ;;  %v2367_v7 = vmin.f32 %v7052_v21, %v2288_v5  ;;  %2769 = vmatmul.mubr.f32.gmra.mrb[2].mxu1 %v7286_v8  ;;  %v4667_v12 = vld [vmem:[%s8924_s3 + $0x240] sm:$0xff]  ;;  %v4669_v21 = vld [vmem:[%s8924_s3 + $0x250] sm:$0xff] }
 0x3d6   : > { %v7308_v15 = vmax.f32 %v2474_v49, 0.0  ;;  %v2416_v24 = vmin.f32 %v2366_v23, %v2368_v28  ;;  %5177 = vmatpush1.bf16.msra.mxu1 %v5176_v46  ;;  %v5184_v5 = vpack.c.bf16 %v4669_v21, %v4667_v12 }
 0x3d7   : > { %v7310_v25 = vmax.f32 %v2473_v20, 0.0  ;;  %v2415_v29 = vmin.f32 %v2365_v36, %v2367_v7  ;;  %v2206_v48 = vpop.permute.xlu1 %2205  ;;  %v2208_v18 = vpop.permute.xlu0 %2207  ;;  %5179 = vmatprep.subr.bf16.mxu1 %v5178_v16  ;;  %v4672_v16 = vld [vmem:[%s8924_s3 + $0x268] sm:$0xff]  ;;  %v4674_v36 = vld [vmem:[%s8924_s3 + $0x278] sm:$0xff] }
 0x3d8   : > { %v2476_v49 = vsub.f32 %v7233_v19, %v2416_v24  ;;  %v2289_v23 = vsel %vm2283_vm4, %v2204_v0, %v2206_v48  ;;  %v2370_v46 = vmin.f32 %v7066_v30, %v2206_v48  ;;  %4633 = vmatprep.mubr.msk.f32.mxu1 %vm2625_vm5, %v7308_v15  ;;  %v5186_v48 = vpack.c.bf16 %v4674_v36, %v4672_v16 }
 0x3d9   : > { %v2475_v51 = vsub.f32 %v7240_v10, %v2415_v29  ;;  %v2369_v11 = vmin.f32 %v7060_v27, %v2289_v23  ;;  %2773 = vmatmul.mubr.f32.gmra.mrb[4].mxu1 %v7310_v25  ;;  %v4671_v29 = vld [vmem:[%s8924_s3 + $0x260] sm:$0xff]  ;;  %v4673_v27 = vld [vmem:[%s8924_s3 + $0x270] sm:$0xff] }
 0x3da   : > { %v7332_v0 = vmax.f32 %v2476_v49, 0.0  ;;  %v2418_v30 = vmin.f32 %v2368_v28, %v2370_v46  ;;  %5181 = vmatpush1.bf16.msra.mxu1 %v5180_v34  ;;  %v5188_v23 = vpack.c.bf16 %v4673_v27, %v4671_v29 }
 0x3db   : > { %v7334_v2 = vmax.f32 %v2475_v51, 0.0  ;;  %v2417_v33 = vmin.f32 %v2367_v7, %v2369_v11  ;;  %v2210_v20 = vpop.permute.xlu1 %2209  ;;  %v2212_v24 = vpop.permute.xlu0 %2211  ;;  %5183 = vmatprep.subr.bf16.mxu1 %v5182_v4  ;;  %v4676_v7 = vld [vmem:[%s8924_s3 + $0x288] sm:$0xff]  ;;  %v4678_v4 = vld [vmem:[%s8924_s3 + $0x298] sm:$0xff] }
 0x3dc   : > { %v2478_v49 = vsub.f32 %v7233_v19, %v2418_v30  ;;  %v2290_v28 = vsel %vm2283_vm4, %v2208_v18, %v2210_v20  ;;  %v2372_v34 = vmin.f32 %v7074_v38, %v2210_v20  ;;  %4634 = vmatprep.mubr.msk.f32.mxu1 %vm2625_vm5, %v7332_v0  ;;  %v5190_v20 = vpack.c.bf16 %v4678_v4, %v4676_v7 }
 0x3dd   : > { %v2477_v12 = vsub.f32 %v7240_v10, %v2417_v33  ;;  %v2371_v21 = vmin.f32 %v7068_v35, %v2290_v28  ;;  %2779 = vmatmul.mubr.f32.gmra.mrb[6].mxu1 %v7334_v2  ;;  %v4675_v33 = vld [vmem:[%s8924_s3 + $0x280] sm:$0xff]  ;;  %v4677_v35 = vld [vmem:[%s8924_s3 + $0x290] sm:$0xff] }
 0x3de   : > { %v7356_v18 = vmax.f32 %v2478_v49, 0.0  ;;  %v2420_v38 = vmin.f32 %v2370_v46, %v2372_v34  ;;  %5185 = vmatpush1.bf16.msra.mxu1 %v5184_v5  ;;  %v5192_v28 = vpack.c.bf16 %v4677_v35, %v4675_v33 }
 0x3df   : > { %v7358_v16 = vmax.f32 %v2477_v12, 0.0  ;;  %v2419_v36 = vmin.f32 %v2369_v11, %v2371_v21  ;;  %v2214_v51 = vpop.permute.xlu1 %2213  ;;  %v2216_v30 = vpop.permute.xlu0 %2215  ;;  %5187 = vmatprep.subr.bf16.mxu1 %v5186_v48  ;;  %v4680_v11 = vld [vmem:[%s8924_s3 + $0x2a8] sm:$0xff]  ;;  %v4682_v48 = vld [vmem:[%s8924_s3 + $0x2b8] sm:$0xff] }
 0x3e0   : > { %v2480_v49 = vsub.f32 %v7233_v19, %v2420_v38  ;;  %v2291_v46 = vsel %vm2283_vm4, %v2212_v24, %v2214_v51  ;;  %v2374_v5 = vmin.f32 %v7082_v44, %v2214_v51  ;;  %4635 = vmatprep.mubr.msk.f32.mxu1 %vm2625_vm5, %v7356_v18  ;;  %v5194_v51 = vpack.c.bf16 %v4682_v48, %v4680_v11 }
 0x3e1   : > { %v2479_v29 = vsub.f32 %v7240_v10, %v2419_v36  ;;  %v2373_v27 = vmin.f32 %v7076_v41, %v2291_v46  ;;  %2783 = vmatmul.mubr.f32.gmra.mrb[8].mxu1 %v7358_v16  ;;  %v4679_v36 = vld [vmem:[%s8924_s3 + $0x2a0] sm:$0xff]  ;;  %v4681_v41 = vld [vmem:[%s8924_s3 + $0x2b0] sm:$0xff] }
 0x3e2   : > { %v7380_v24 = vmax.f32 %v2480_v49, 0.0  ;;  %v2422_v44 = vmin.f32 %v2372_v34, %v2374_v5  ;;  %5189 = vmatpush1.bf16.msra.mxu1 %v5188_v23  ;;  %v5196_v46 = vpack.c.bf16 %v4681_v41, %v4679_v36 }
 0x3e3   : > { %v7382_v7 = vmax.f32 %v2479_v29, 0.0  ;;  %v2421_v4 = vmin.f32 %v2371_v21, %v2373_v27  ;;  %v2218_v12 = vpop.permute.xlu1 %2217  ;;  %v2220_v38 = vpop.permute.xlu0 %2219  ;;  %5191 = vmatprep.subr.bf16.mxu1 %v5190_v20  ;;  %v4684_v21 = vld [vmem:[%s8924_s3 + $0x2c8] sm:$0xff]  ;;  %v4686_v20 = vld [vmem:[%s8924_s3 + $0x2d8] sm:$0xff] }
 0x3e4   : > { %v2482_v49 = vsub.f32 %v7233_v19, %v2422_v44  ;;  %v2292_v34 = vsel %vm2283_vm4, %v2216_v30, %v2218_v12  ;;  %v2376_v23 = vmin.f32 %v7090_v50, %v2218_v12  ;;  %4636 = vmatprep.mubr.msk.f32.mxu1 %vm2625_vm5, %v7380_v24  ;;  %v5198_v12 = vpack.c.bf16 %v4686_v20, %v4684_v21 }
 0x3e5   : > { %v2481_v33 = vsub.f32 %v7240_v10, %v2421_v4  ;;  %v2375_v35 = vmin.f32 %v7084_v47, %v2292_v34  ;;  %2789 = vmatmul.mubr.f32.gmra.mrb[10].mxu1 %v7382_v7  ;;  %v4683_v4 = vld [vmem:[%s8924_s3 + $0x2c0] sm:$0xff]  ;;  %v4685_v47 = vld [vmem:[%s8924_s3 + $0x2d0] sm:$0xff] }
 0x3e6   : > { %v7404_v30 = vmax.f32 %v2482_v49, 0.0  ;;  %v2424_v50 = vmin.f32 %v2374_v5, %v2376_v23  ;;  %5193 = vmatpush1.bf16.msra.mxu1 %v5192_v28  ;;  %v5200_v34 = vpack.c.bf16 %v4685_v47, %v4683_v4 }
 0x3e7   : > { %v7406_v11 = vmax.f32 %v2481_v33, 0.0  ;;  %v2423_v48 = vmin.f32 %v2373_v27, %v2375_v35  ;;  %v2222_v29 = vpop.permute.xlu1 %2221  ;;  %v2224_v44 = vpop.permute.xlu0 %2223  ;;  %5195 = vmatprep.subr.bf16.mxu1 %v5194_v51  ;;  %v4688_v27 = vld [vmem:[%s8924_s3 + $0x2e8] sm:$0xff]  ;;  %v4690_v51 = vld [vmem:[%s8924_s3 + $0x2f8] sm:$0xff] }
 0x3e8   : > { %v2484_v49 = vsub.f32 %v7233_v19, %v2424_v50  ;;  %v2293_v5 = vsel %vm2283_vm4, %v2220_v38, %v2222_v29  ;;  %v2378_v28 = vmin.f32 %v7098_v56, %v2222_v29  ;;  %4637 = vmatprep.mubr.msk.f32.mxu1 %vm2625_vm5, %v7404_v30  ;;  %v5202_v29 = vpack.c.bf16 %v4690_v51, %v4688_v27 }
 0x3e9   : > { %v2483_v36 = vsub.f32 %v7240_v10, %v2423_v48  ;;  %v2377_v41 = vmin.f32 %v7092_v53, %v2293_v5  ;;  %2793 = vmatmul.mubr.f32.gmra.mrb[12].mxu1 %v7406_v11  ;;  %v4687_v48 = vld [vmem:[%s8924_s3 + $0x2e0] sm:$0xff]  ;;  %v4689_v53 = vld [vmem:[%s8924_s3 + $0x2f0] sm:$0xff] }
 0x3ea   : > { %v7428_v38 = vmax.f32 %v2484_v49, 0.0  ;;  %v2426_v56 = vmin.f32 %v2376_v23, %v2378_v28  ;;  %5197 = vmatpush1.bf16.msra.mxu1 %v5196_v46  ;;  %v5204_v5 = vpack.c.bf16 %v4689_v53, %v4687_v48 }
 0x3eb   : > { %v7430_v21 = vmax.f32 %v2483_v36, 0.0  ;;  %v2425_v20 = vmin.f32 %v2375_v35, %v2377_v41  ;;  %v2226_v33 = vpop.permute.xlu1 %2225  ;;  %v2228_v50 = vpop.permute.xlu0 %2227  ;;  %5199 = vmatprep.subr.bf16.mxu1 %v5198_v12  ;;  %v4692_v35 = vld [vmem:[%s8924_s3 + $0x308] sm:$0xff]  ;;  %v4694_v12 = vld [vmem:[%s8924_s3 + $0x318] sm:$0xff] }
 0x3ec   : > { %v2486_v49 = vsub.f32 %v7233_v19, %v2426_v56  ;;  %v2294_v23 = vsel %vm2283_vm4, %v2224_v44, %v2226_v33  ;;  %v2380_v46 = vmin.f32 %v7106_v62, %v2226_v33  ;;  %4638 = vmatprep.mubr.msk.f32.mxu1 %vm2625_vm5, %v7428_v38  ;;  %v5206_v33 = vpack.c.bf16 %v4694_v12, %v4692_v35 }
 0x3ed   : > { %v2485_v4 = vsub.f32 %v7240_v10, %v2425_v20  ;;  %v2379_v47 = vmin.f32 %v7100_v59, %v2294_v23  ;;  %2799 = vmatmul.mubr.f32.gmra.mrb[14].mxu1 %v7430_v21  ;;  %v4691_v20 = vld [vmem:[%s8924_s3 + $0x300] sm:$0xff]  ;;  %v4693_v59 = vld [vmem:[%s8924_s3 + $0x310] sm:$0xff] }
 0x3ee   : > { %v7452_v44 = vmax.f32 %v2486_v49, 0.0  ;;  %v2428_v62 = vmin.f32 %v2378_v28, %v2380_v46  ;;  %5201 = vmatpush1.bf16.msra.mxu1 %v5200_v34  ;;  %v5208_v23 = vpack.c.bf16 %v4693_v59, %v4691_v20 }
 0x3ef   : > { %v7454_v27 = vmax.f32 %v2485_v4, 0.0  ;;  %v2427_v51 = vmin.f32 %v2377_v41, %v2379_v47  ;;  %v2230_v36 = vpop.permute.xlu1 %2229  ;;  %v2232_v56 = vpop.permute.xlu0 %2231  ;;  %5203 = vmatprep.subr.bf16.mxu1 %v5202_v29  ;;  %v4696_v41 = vld [vmem:[%s8924_s3 + $0x328] sm:$0xff]  ;;  %v4698_v29 = vld [vmem:[%s8924_s3 + $0x338] sm:$0xff] }
 0x3f0   : > { %v2488_v49 = vsub.f32 %v7233_v19, %v2428_v62  ;;  %v2295_v28 = vsel %vm2283_vm4, %v2228_v50, %v2230_v36  ;;  %v2382_v34 = vmin.f32 %v7114_v32, %v2230_v36  ;;  %4639 = vmatprep.mubr.msk.f32.mxu1 %vm2625_vm5, %v7452_v44  ;;  %v5210_v36 = vpack.c.bf16 %v4698_v29, %v4696_v41 }
 0x3f1   : > { %v2487_v48 = vsub.f32 %v7240_v10, %v2427_v51  ;;  %v2381_v53 = vmin.f32 %v7108_v1, %v2295_v28  ;;  %2803 = vmatmul.mubr.f32.gmra.mrb[16].mxu1 %v7454_v27  ;;  %v4695_v51 = vld [vmem:[%s8924_s3 + $0x320] sm:$0xff]  ;;  %v4697_v1 = vld [vmem:[%s8924_s3 + $0x330] sm:$0xff] }
 0x3f2   : > { %v7476_v50 = vmax.f32 %v2488_v49, 0.0  ;;  %v2430_v32 = vmin.f32 %v2380_v46, %v2382_v34  ;;  %5205 = vmatpush1.bf16.msra.mxu1 %v5204_v5  ;;  %v5212_v28 = vpack.c.bf16 %v4697_v1, %v4695_v51 }
 0x3f3   : > { %v7478_v35 = vmax.f32 %v2487_v48, 0.0  ;;  %v2429_v12 = vmin.f32 %v2379_v47, %v2381_v53  ;;  %v2234_v4 = vpop.permute.xlu1 %2233  ;;  %v2236_v62 = vpop.permute.xlu0 %2235  ;;  %5207 = vmatprep.subr.bf16.mxu1 %v5206_v33  ;;  %v4700_v47 = vld [vmem:[%s8924_s3 + $0x348] sm:$0xff]  ;;  %v4702_v33 = vld [vmem:[%s8924_s3 + $0x358] sm:$0xff] }
 0x3f4   : > { %v2490_v49 = vsub.f32 %v7233_v19, %v2430_v32  ;;  %v2296_v46 = vsel %vm2283_vm4, %v2232_v56, %v2234_v4  ;;  %v2384_v5 = vmin.f32 %v7122_v9, %v2234_v4  ;;  %4640 = vmatprep.mubr.msk.f32.mxu1 %vm2625_vm5, %v7476_v50  ;;  %v5214_v4 = vpack.c.bf16 %v4702_v33, %v4700_v47 }
 0x3f5   : > { %v2489_v20 = vsub.f32 %v7240_v10, %v2429_v12  ;;  %v2383_v59 = vmin.f32 %v7116_v6, %v2296_v46  ;;  %2809 = vmatmul.mubr.f32.gmra.mrb[18].mxu1 %v7478_v35  ;;  %v4699_v12 = vld [vmem:[%s8924_s3 + $0x340] sm:$0xff]  ;;  %v4701_v6 = vld [vmem:[%s8924_s3 + $0x350] sm:$0xff] }
 0x3f6   : > { %v7500_v56 = vmax.f32 %v2490_v49, 0.0  ;;  %v2432_v9 = vmin.f32 %v2382_v34, %v2384_v5  ;;  %5209 = vmatpush1.bf16.msra.mxu1 %v5208_v23  ;;  %v5216_v46 = vpack.c.bf16 %v4701_v6, %v4699_v12 }
 0x3f7   : > { %v7502_v41 = vmax.f32 %v2489_v20, 0.0  ;;  %v2431_v29 = vmin.f32 %v2381_v53, %v2383_v59  ;;  %v2238_v48 = vpop.permute.xlu1 %2237  ;;  %v2240_v32 = vpop.permute.xlu0 %2239  ;;  %5211 = vmatprep.subr.bf16.mxu1 %v5210_v36  ;;  %v4704_v53 = vld [vmem:[%s8924_s3 + $0x368] sm:$0xff]  ;;  %v4706_v36 = vld [vmem:[%s8924_s3 + $0x378] sm:$0xff] }
 0x3f8   : > { %v2492_v49 = vsub.f32 %v7233_v19, %v2432_v9  ;;  %v2297_v34 = vsel %vm2283_vm4, %v2236_v62, %v2238_v48  ;;  %v2386_v23 = vmin.f32 %v7130_v17, %v2238_v48  ;;  %4641 = vmatprep.mubr.msk.f32.mxu1 %vm2625_vm5, %v7500_v56  ;;  %v5218_v48 = vpack.c.bf16 %v4706_v36, %v4704_v53 }
 0x3f9   : > { %v2491_v51 = vsub.f32 %v7240_v10, %v2431_v29  ;;  %v2385_v1 = vmin.f32 %v7124_v13, %v2297_v34  ;;  %2813 = vmatmul.mubr.f32.gmra.mrb[20].mxu1 %v7502_v41  ;;  %v4703_v29 = vld [vmem:[%s8924_s3 + $0x360] sm:$0xff]  ;;  %v4705_v13 = vld [vmem:[%s8924_s3 + $0x370] sm:$0xff] }
 0x3fa   : > { %v7524_v62 = vmax.f32 %v2492_v49, 0.0  ;;  %v2434_v17 = vmin.f32 %v2384_v5, %v2386_v23  ;;  %5213 = vmatpush1.bf16.msra.mxu1 %v5212_v28  ;;  %v5220_v34 = vpack.c.bf16 %v4705_v13, %v4703_v29 }
 0x3fb   : > { %v7526_v47 = vmax.f32 %v2491_v51, 0.0  ;;  %v2433_v33 = vmin.f32 %v2383_v59, %v2385_v1  ;;  %v2242_v20 = vpop.permute.xlu1 %2241  ;;  %v2244_v9 = vpop.permute.xlu0 %2243  ;;  %5215 = vmatprep.subr.bf16.mxu1 %v5214_v4  ;;  %v4708_v59 = vld [vmem:[%s8924_s3 + $0x388] sm:$0xff]  ;;  %v4710_v4 = vld [vmem:[%s8924_s3 + $0x398] sm:$0xff] }
 0x3fc   : > { %v2494_v49 = vsub.f32 %v7233_v19, %v2434_v17  ;;  %v2298_v5 = vsel %vm2283_vm4, %v2240_v32, %v2242_v20  ;;  %v2388_v28 = vmin.f32 %v7138_v26, %v2242_v20  ;;  %4642 = vmatprep.mubr.msk.f32.mxu1 %vm2625_vm5, %v7524_v62  ;;  %v5222_v20 = vpack.c.bf16 %v4710_v4, %v4708_v59 }
 0x3fd   : > { %v2493_v12 = vsub.f32 %v7240_v10, %v2433_v33  ;;  %v2387_v6 = vmin.f32 %v7132_v22, %v2298_v5  ;;  %2819 = vmatmul.mubr.f32.gmra.mrb[22].mxu1 %v7526_v47  ;;  %v4707_v33 = vld [vmem:[%s8924_s3 + $0x380] sm:$0xff]  ;;  %v4709_v22 = vld [vmem:[%s8924_s3 + $0x390] sm:$0xff] }
 0x3fe   : > { %v7548_v32 = vmax.f32 %v2494_v49, 0.0  ;;  %v2436_v26 = vmin.f32 %v2386_v23, %v2388_v28  ;;  %5217 = vmatpush1.bf16.msra.mxu1 %v5216_v46  ;;  %v5224_v5 = vpack.c.bf16 %v4709_v22, %v4707_v33 }
 0x3ff   : > { %v7550_v53 = vmax.f32 %v2493_v12, 0.0  ;;  %v2435_v36 = vmin.f32 %v2385_v1, %v2387_v6  ;;  %v2246_v51 = vpop.permute.xlu1 %2245  ;;  %v2248_v17 = vpop.permute.xlu0 %2247  ;;  %5219 = vmatprep.subr.bf16.mxu1 %v5218_v48  ;;  %v4712_v1 = vld [vmem:[%s8924_s3 + $0x3a8] sm:$0xff]  ;;  %v4714_v48 = vld [vmem:[%s8924_s3 + $0x3b8] sm:$0xff] }
 0x400   : > { %v2496_v49 = vsub.f32 %v7233_v19, %v2436_v26  ;;  %v2299_v23 = vsel %vm2283_vm4, %v2244_v9, %v2246_v51  ;;  %v2390_v46 = vmin.f32 %v7146_v37, %v2246_v51  ;;  %4643 = vmatprep.mubr.msk.f32.mxu1 %vm2625_vm5, %v7548_v32  ;;  %v5226_v51 = vpack.c.bf16 %v4714_v48, %v4712_v1 }
 0x401   : > { %v2495_v29 = vsub.f32 %v7240_v10, %v2435_v36  ;;  %v2389_v13 = vmin.f32 %v7140_v31, %v2299_v23  ;;  %2823 = vmatmul.mubr.f32.gmra.mrb[24].mxu1 %v7550_v53  ;;  %v4711_v36 = vld [vmem:[%s8924_s3 + $0x3a0] sm:$0xff]  ;;  %v4713_v31 = vld [vmem:[%s8924_s3 + $0x3b0] sm:$0xff] }
 0x402   : > { %v7572_v9 = vmax.f32 %v2496_v49, 0.0  ;;  %v2438_v37 = vmin.f32 %v2388_v28, %v2390_v46  ;;  %5221 = vmatpush1.bf16.msra.mxu1 %v5220_v34  ;;  %v5228_v23 = vpack.c.bf16 %v4713_v31, %v4711_v36 }
 0x403   : > { %v7574_v59 = vmax.f32 %v2495_v29, 0.0  ;;  %v2437_v4 = vmin.f32 %v2387_v6, %v2389_v13  ;;  %v2250_v12 = vpop.permute.xlu1 %2249  ;;  %v2252_v26 = vpop.permute.xlu0 %2251  ;;  %5223 = vmatprep.subr.bf16.mxu1 %v5222_v20  ;;  %v4740_v6 = vld [vmem:[%s8924_s3 + $0x3c8] sm:$0xff]  ;;  %v4742_v20 = vld [vmem:[%s8924_s3 + $0x3d8] sm:$0xff] }
 0x404   : > { %8963 = vst [vmem:[#allocation16_spill] sm:$0xff] %v7572_v9  ;;  %v2498_v49 = vsub.f32 %v7233_v19, %v2438_v37  ;;  %v2300_v28 = vsel %vm2283_vm4, %v2248_v17, %v2250_v12  ;;  %v2392_v34 = vmin.f32 %v7154_v42, %v2250_v12  ;;  %4644 = vmatprep.mubr.msk.f32.mxu1 %vm2625_vm5, %v7572_v9 }
 0x405   : > { %v2497_v33 = vsub.f32 %v7240_v10, %v2437_v4  ;;  %v2391_v22 = vmin.f32 %v7148_v40, %v2300_v28  ;;  %2829 = vmatmul.mubr.f32.gmra.mrb[26].mxu1 %v7574_v59  ;;  %v5230_v12 = vpack.c.bf16 %v4742_v20, %v4740_v6 }
 0x406   : > { %v7596_v17 = vmax.f32 %v2498_v49, 0.0  ;;  %v2440_v42 = vmin.f32 %v2390_v46, %v2392_v34  ;;  %5225 = vmatpush1.bf16.msra.mxu1 %v5224_v5 }
 0x407   : > { %v7598_v1 = vmax.f32 %v2497_v33, 0.0  ;;  %v2439_v48 = vmin.f32 %v2389_v13, %v2391_v22  ;;  %v2254_v29 = vpop.permute.xlu1 %2253  ;;  %v2256_v37 = vpop.permute.xlu0 %2255  ;;  %5227 = vmatprep.subr.bf16.mxu1 %v5226_v51 }
 0x408   : > { %v2500_v9 = vsub.f32 %v7233_v19, %v2440_v42  ;;  %v2301_v4 = vsel %vm2283_vm4, %v2252_v26, %v2254_v29  ;;  %v2394_v40 = vmin.f32 %v7162_v45, %v2254_v29  ;;  %4645 = vmatprep.mubr.msk.f32.mxu1 %vm2625_vm5, %v7596_v17 }
 0x409   : > { %v2499_v46 = vsub.f32 %v7240_v10, %v2439_v48  ;;  %v2393_v5 = vmin.f32 %v7156_v43, %v2301_v4  ;;  %2833 = vmatmul.mubr.f32.gmra.mrb[28].mxu1 %v7598_v1 }
 0x40a   : > { %v7608_v13 = vmax.f32 %v2500_v9, 0.0  ;;  %v2442_v36 = vmin.f32 %v2392_v34, %v2394_v40  ;;  %5229 = vmatpush1.bf16.msra.mxu1 %v5228_v23 }
 0x40b   : > { %v7610_v51 = vmax.f32 %v2499_v46, 0.0  ;;  %v2441_v31 = vmin.f32 %v2391_v22, %v2393_v5  ;;  %v2258_v49 = vpop.permute.xlu1 %2257  ;;  %v2260_v26 = vpop.permute.xlu0 %2259  ;;  %5231 = vmatprep.subr.bf16.mxu1 %v5230_v12 }
 0x40c   : > { %v2502_v45 = vsub.f32 %v7233_v19, %v2442_v36  ;;  %v2302_v28 = vsel %vm2283_vm4, %v2256_v37, %v2258_v49  ;;  %v2396_v6 = vmin.f32 %v7170_v54, %v2258_v49  ;;  %4646 = vmatprep.mubr.msk.f32.mxu1 %vm2625_vm5, %v7608_v13 }
 0x40d   : > { %v2501_v43 = vsub.f32 %v7240_v10, %v2441_v31  ;;  %v2395_v9 = vmin.f32 %v7164_v52, %v2302_v28  ;;  %2839 = vmatmul.mubr.f32.gmra.mrb[30].mxu1 %v7610_v51 }
 0x40e   : > { %v7620_v34 = vmax.f32 %v2502_v45, 0.0  ;;  %v2444_v20 = vmin.f32 %v2394_v40, %v2396_v6 }
 0x40f   : > { %v7622_v33 = vmax.f32 %v2501_v43, 0.0  ;;  %v2443_v22 = vmin.f32 %v2393_v5, %v2395_v9  ;;  %v2262_v42 = vpop.permute.xlu1 %2261  ;;  %v2264_v23 = vpop.permute.xlu0 %2263 }
 0x410   : > { %v2504_v48 = vsub.f32 %v7233_v19, %v2444_v20  ;;  %v2303_v54 = vsel %vm2283_vm4, %v2260_v26, %v2262_v42  ;;  %v2398_v29 = vmin.f32 %v7178_v57, %v2262_v42  ;;  %4647 = vmatprep.mubr.msk.f32.mxu1 %vm2625_vm5, %v7620_v34 }
 0x411   : > { %v2503_v52 = vsub.f32 %v7240_v10, %v2443_v22  ;;  %v2397_v37 = vmin.f32 %v7172_v55, %v2303_v54  ;;  %2843 = vmatmul.mubr.f32.gmra.mrb[32].mxu1 %v7622_v33 }
 0x412   : > { %v7632_v12 = vmax.f32 %v2504_v48, 0.0  ;;  %v2446_v4 = vmin.f32 %v2396_v6, %v2398_v29 }
 0x413   : > { %v7634_v40 = vmax.f32 %v2503_v52, 0.0  ;;  %v2445_v46 = vmin.f32 %v2395_v9, %v2397_v37  ;;  %v2266_v5 = vpop.permute.xlu1 %2265  ;;  %v2268_v36 = vpop.permute.xlu0 %2267 }
 0x414   : > { %v2506_v31 = vsub.f32 %v7233_v19, %v2446_v4  ;;  %v2304_v57 = vsel %vm2283_vm4, %v2264_v23, %v2266_v5  ;;  %v2400_v49 = vmin.f32 %v7186_v60, %v2266_v5  ;;  %4648 = vmatprep.mubr.msk.f32.mxu1 %vm2625_vm5, %v7632_v12  ;;  %v8964_v5 = vld [vmem:[#allocation9_spill] sm:$0xff] }
 0x415   : > { %v2505_v55 = vsub.f32 %v7240_v10, %v2445_v46  ;;  %v2399_v26 = vmin.f32 %v7180_v58, %v2304_v57  ;;  %2847 = vmatmul.mubr.f32.gmra.mrb[34].mxu1 %v7634_v40 }
 0x416   : > { %v7644_v45 = vmax.f32 %v2506_v31, 0.0  ;;  %v2448_v28 = vmin.f32 %v2398_v29, %v2400_v49 }
 0x417   : > { %v7646_v6 = vmax.f32 %v2505_v55, 0.0  ;;  %v2447_v43 = vmin.f32 %v2397_v37, %v2399_v26  ;;  %v2270_v9 = vpop.permute.xlu1 %2269  ;;  %v2272_v20 = vpop.permute.xlu0 %2271 }
 0x418   : > { %v2508_v22 = vsub.f32 %v7233_v19, %v2448_v28  ;;  %v2305_v60 = vsel %vm2283_vm4, %v2268_v36, %v2270_v9  ;;  %v2402_v42 = vmin.f32 %v7194_v63, %v2270_v9  ;;  %4649 = vmatprep.mubr.msk.f32.mxu1 %vm2625_vm5, %v7644_v45  ;;  %v8965_v9 = vld [vmem:[#allocation11_spill] sm:$0xff] }
 0x419   : > { %v2507_v58 = vsub.f32 %v7240_v10, %v2447_v43  ;;  %v2401_v23 = vmin.f32 %v7188_v61, %v2305_v60  ;;  %2851 = vmatmul.mubr.f32.gmra.mrb[36].mxu1 %v7646_v6  ;;  %v8966_v60 = vld [vmem:[#allocation10_spill] sm:$0xff] }
 0x41a   : > { %v7656_v48 = vmax.f32 %v2508_v22, 0.0  ;;  %v2450_v54 = vmin.f32 %v2400_v49, %v2402_v42 }
 0x41b   : > { %v7658_v29 = vmax.f32 %v2507_v58, 0.0  ;;  %v2449_v52 = vmin.f32 %v2399_v26, %v2401_v23  ;;  %v2274_v37 = vpop.permute.xlu1 %2273  ;;  %v2276_v31 = vpop.permute.xlu0 %2275 }
 0x41c   : > { %v2510_v4 = vsub.f32 %v7233_v19, %v2450_v54  ;;  %v2306_v63 = vsel %vm2283_vm4, %v2272_v20, %v2274_v37  ;;  %v2404_v46 = vmin.f32 %v7202_v3, %v2274_v37  ;;  %4650 = vmatprep.mubr.msk.f32.mxu1 %vm2625_vm5, %v7656_v48 }
 0x41d   : > { %v2509_v61 = vsub.f32 %v7240_v10, %v2449_v52  ;;  %v2403_v36 = vmin.f32 %v8964_v5, %v2306_v63  ;;  %2855 = vmatmul.mubr.f32.gmra.mrb[38].mxu1 %v7658_v29  ;;  %v8967_v5 = vld [vmem:[#allocation13_spill] sm:$0xff] }
 0x41e   : > { %v7668_v57 = vmax.f32 %v2510_v4, 0.0  ;;  %v2452_v49 = vmin.f32 %v2402_v42, %v2404_v46 }
 0x41f   : > { %v7670_v55 = vmax.f32 %v2509_v61, 0.0  ;;  %v2451_v26 = vmin.f32 %v2401_v23, %v2403_v36  ;;  %v2278_v28 = vpop.permute.xlu1 %2277  ;;  %v2280_v37 = vpop.permute.xlu0 %2279 }
 0x420   : > { %v2512_v43 = vsub.f32 %v7233_v19, %v2452_v49  ;;  %v2307_v3 = vsel %vm2283_vm4, %v2276_v31, %v2278_v28  ;;  %v2406_v20 = vmin.f32 %v8965_v9, %v2278_v28  ;;  %4651 = vmatprep.mubr.msk.f32.mxu1 %vm2625_vm5, %v7668_v57 }
 0x421   : > { %v2511_v22 = vsub.f32 %v7240_v10, %v2451_v26  ;;  %v2405_v58 = vmin.f32 %v8966_v60, %v2307_v3  ;;  %2859 = vmatmul.mubr.f32.gmra.mrb[40].mxu1 %v7670_v55  ;;  %v8968_v26 = vld [vmem:[#allocation12_spill] sm:$0xff] }
 0x422   : > { %v7680_v42 = vmax.f32 %v2512_v43, 0.0  ;;  %v2454_v54 = vmin.f32 %v2404_v46, %v2406_v20 }
 0x423   : > { %v7682_v23 = vmax.f32 %v2511_v22, 0.0  ;;  %v2453_v52 = vmin.f32 %v2403_v36, %v2405_v58  ;;  %v2282_v4 = vpop.permute.xlu1 %2281 }
 0x424   : > { %v2514_v63 = vsub.f32 %v7233_v19, %v2454_v54  ;;  %v2308_v61 = vsel %vm2283_vm4, %v2280_v37, %v2282_v4  ;;  %v2408_v31 = vmin.f32 %v8967_v5, %v2282_v4  ;;  %4652 = vmatprep.mubr.msk.f32.mxu1 %vm2625_vm5, %v7680_v42  ;;  %v4748_v5 = vld [vmem:[%s8924_s3 + $0x408] sm:$0xff] }
 0x425   : > { %v2513_v49 = vsub.f32 %v7240_v10, %v2453_v52  ;;  %v2407_v28 = vmin.f32 %v8968_v26, %v2308_v61  ;;  %2863 = vmatmul.mubr.f32.gmra.mrb[42].mxu1 %v7682_v23  ;;  %v8969_v52 = vld [vmem:[#allocation15_spill] sm:$0xff]  ;;  %v4745_v61 = vld [vmem:[%s8924_s3 + $0x3f0] sm:$0xff] }
 0x426   : > { %v7692_v46 = vmax.f32 %v2514_v63, 0.0  ;;  %v2456_v36 = vmin.f32 %v2406_v20, %v2408_v31  ;;  %v4739_v20 = vld [vmem:[%s8924_s3 + $0x3c0] sm:$0xff]  ;;  %v4750_v31 = vld [vmem:[%s8924_s3 + $0x418] sm:$0xff] }
 0x427   : > { %v7694_v43 = vmax.f32 %v2513_v49, 0.0  ;;  %v2455_v3 = vmin.f32 %v2405_v58, %v2407_v28  ;;  %v4741_v58 = vld [vmem:[%s8924_s3 + $0x3d0] sm:$0xff]  ;;  %v4743_v63 = vld [vmem:[%s8924_s3 + $0x3e0] sm:$0xff]  ;;  %v5238_v26 = vpack.c.bf16 %v4750_v31, %v4748_v5  ;;  %v4760_v31 = vld [vmem:[%s8924_s3 + $0x468] sm:$0xff] }
 0x428   : > { %v2516_v9 = vsub.f32 %v7233_v19, %v2456_v36  ;;  %4653 = vmatprep.mubr.msk.f32.mxu1 %vm2625_vm5, %v7692_v46  ;;  %v4746_v19 = vld [vmem:[%s8924_s3 + $0x3f8] sm:$0xff]  ;;  %v5232_v37 = vpack.c.bf16 %v4741_v58, %v4739_v20  ;;  %v5236_v49 = vpack.c.bf16 %v4745_v61, %v4743_v63  ;;  %v4747_v28 = vld [vmem:[%s8924_s3 + $0x400] sm:$0xff]  ;;  %v4749_v36 = vld [vmem:[%s8924_s3 + $0x410] sm:$0xff] }
 0x429   : > { %v2515_v22 = vsub.f32 %v7240_v10, %v2455_v3  ;;  %2867 = vmatmul.mubr.f32.gmra.mrb[44].mxu1 %v7694_v43  ;;  %v4744_v10 = vld [vmem:[%s8924_s3 + $0x3e8] sm:$0xff]  ;;  %v4751_v58 = vld [vmem:[%s8924_s3 + $0x420] sm:$0xff]  ;;  %v4757_v5 = vld [vmem:[%s8924_s3 + $0x450] sm:$0xff] }
 0x42a   : > { %v7701_v60 = vmax.f32 %v2516_v9, 0.0  ;;  %v5234_v4 = vpack.c.bf16 %v4746_v19, %v4744_v10  ;;  %v4752_v3 = vld [vmem:[%s8924_s3 + $0x428] sm:$0xff]  ;;  %v4754_v9 = vld [vmem:[%s8924_s3 + $0x438] sm:$0xff]  ;;  %v4753_v10 = vld [vmem:[%s8924_s3 + $0x430] sm:$0xff] }
 0x42b   : > { %v7703_v54 = vmax.f32 %v2515_v22, 0.0  ;;  %v5240_v22 = vpack.c.bf16 %v4749_v36, %v4747_v28  ;;  %v5242_v20 = vpack.c.bf16 %v4754_v9, %v4752_v3  ;;  %v4756_v19 = vld [vmem:[%s8924_s3 + $0x448] sm:$0xff]  ;;  %v4755_v61 = vld [vmem:[%s8924_s3 + $0x440] sm:$0xff]  ;;  %v4761_v3 = vld [vmem:[%s8924_s3 + $0x470] sm:$0xff] }
 0x42c   : > { %4654 = vmatprep.mubr.msk.f32.mxu1 %vm2625_vm5, %v7701_v60  ;;  %v4759_v36 = vld [vmem:[%s8924_s3 + $0x460] sm:$0xff]  ;;  %v4764_v9 = vld [vmem:[%s8924_s3 + $0x488] sm:$0xff] }
 0x42d   : > { %2871 = vmatmul.mubr.f32.gmra.mrb[46].mxu1 %v7703_v54 }
 0x42e   : > { %4715 = vmatprep.mubr.msk.f32.mxu1 %vm2625_vm5, %v8969_v52 }
 0x431   : > { %3001 = vmatmul.mubr.f32.vlgmr.msra.gmra.mrb[48].mxu1 %v7262_v14 }
 0x432   : > { %5233 = vmatpush1.bf16.msra.mxu1 %v5232_v37  ;;  %4716 = vmatprep.mubr.msk.f32.mxu1 %vm2625_vm5, %v7284_v39  ;;  %v4758_v37 = vld [vmem:[%s8924_s3 + $0x458] sm:$0xff] }
 0x433   : > { %5235 = vmatprep.subr.bf16.mxu1 %v5234_v4  ;;  %v5244_v4 = vpack.c.bf16 %v4753_v10, %v4751_v58  ;;  %v5246_v63 = vpack.c.bf16 %v4758_v37, %v4756_v19  ;;  %v4763_v10 = vld [vmem:[%s8924_s3 + $0x480] sm:$0xff]  ;;  %v4765_v19 = vld [vmem:[%s8924_s3 + $0x490] sm:$0xff]  ;;  %v4768_v37 = vld [vmem:[%s8924_s3 + $0x4a8] sm:$0xff] }
 0x435   : > { %3005 = vmatmul.mubr.f32.gmra.mrb[50].mxu1 %v7286_v8 }
 0x436   : > { %4717 = vmatprep.mubr.msk.f32.mxu1 %vm2625_vm5, %v7308_v15  ;;  %5237 = vmatpush1.bf16.msra.mxu1 %v5236_v49  ;;  %v4762_v49 = vld [vmem:[%s8924_s3 + $0x478] sm:$0xff] }
 0x437   : > { %5239 = vmatprep.subr.bf16.mxu1 %v5238_v26  ;;  %v5248_v26 = vpack.c.bf16 %v4757_v5, %v4755_v61  ;;  %v5250_v28 = vpack.c.bf16 %v4762_v49, %v4760_v31  ;;  %v4767_v5 = vld [vmem:[%s8924_s3 + $0x4a0] sm:$0xff]  ;;  %v4769_v31 = vld [vmem:[%s8924_s3 + $0x4b0] sm:$0xff]  ;;  %v4772_v49 = vld [vmem:[%s8924_s3 + $0x4c8] sm:$0xff] }
 0x439   : > { %3009 = vmatmul.mubr.f32.gmra.mrb[0].mxu1 %v7310_v25 }
 0x43a   : > { %4718 = vmatprep.mubr.msk.f32.mxu1 %vm2625_vm5, %v7332_v0  ;;  %5241 = vmatpush1.bf16.msra.mxu1 %v5240_v22  ;;  %v4766_v22 = vld [vmem:[%s8924_s3 + $0x498] sm:$0xff] }
 0x43b   : > { %5243 = vmatprep.subr.bf16.mxu1 %v5242_v20  ;;  %v5252_v20 = vpack.c.bf16 %v4761_v3, %v4759_v36  ;;  %v5254_v58 = vpack.c.bf16 %v4766_v22, %v4764_v9  ;;  %v4771_v3 = vld [vmem:[%s8924_s3 + $0x4c0] sm:$0xff]  ;;  %v4773_v9 = vld [vmem:[%s8924_s3 + $0x4d0] sm:$0xff]  ;;  %v4776_v22 = vld [vmem:[%s8924_s3 + $0x4e8] sm:$0xff] }
 0x43d   : > { %3015 = vmatmul.mubr.f32.gmra.mrb[52].mxu1 %v7334_v2 }
 0x43e   : > { %4719 = vmatprep.mubr.msk.f32.mxu1 %vm2625_vm5, %v7356_v18  ;;  %5245 = vmatpush1.bf16.msra.mxu1 %v5244_v4  ;;  %v4770_v4 = vld [vmem:[%s8924_s3 + $0x4b8] sm:$0xff] }
 0x43f   : > { %5247 = vmatprep.subr.bf16.mxu1 %v5246_v63  ;;  %v5256_v63 = vpack.c.bf16 %v4765_v19, %v4763_v10  ;;  %v5258_v61 = vpack.c.bf16 %v4770_v4, %v4768_v37  ;;  %v4775_v19 = vld [vmem:[%s8924_s3 + $0x4e0] sm:$0xff]  ;;  %v4777_v37 = vld [vmem:[%s8924_s3 + $0x4f0] sm:$0xff]  ;;  %v4780_v4 = vld [vmem:[%s8924_s3 + $0x508] sm:$0xff] }
 0x441   : > { %3019 = vmatmul.mubr.f32.gmra.mrb[4].mxu1 %v7358_v16 }
 0x442   : > { %4720 = vmatprep.mubr.msk.f32.mxu1 %vm2625_vm5, %v7380_v24  ;;  %5249 = vmatpush1.bf16.msra.mxu1 %v5248_v26  ;;  %v4774_v26 = vld [vmem:[%s8924_s3 + $0x4d8] sm:$0xff] }
 0x443   : > { %5251 = vmatprep.subr.bf16.mxu1 %v5250_v28  ;;  %v5260_v28 = vpack.c.bf16 %v4769_v31, %v4767_v5  ;;  %v5262_v36 = vpack.c.bf16 %v4774_v26, %v4772_v49  ;;  %v4779_v31 = vld [vmem:[%s8924_s3 + $0x500] sm:$0xff]  ;;  %v4781_v49 = vld [vmem:[%s8924_s3 + $0x510] sm:$0xff]  ;;  %v4784_v26 = vld [vmem:[%s8924_s3 + $0x528] sm:$0xff] }
 0x445   : > { %3025 = vmatmul.mubr.f32.gmra.mrb[54].mxu1 %v7382_v7 }
 0x446   : > { %4721 = vmatprep.mubr.msk.f32.mxu1 %vm2625_vm5, %v7404_v30  ;;  %5253 = vmatpush1.bf16.msra.mxu1 %v5252_v20  ;;  %v4778_v20 = vld [vmem:[%s8924_s3 + $0x4f8] sm:$0xff] }
 0x447   : > { %5255 = vmatprep.subr.bf16.mxu1 %v5254_v58  ;;  %v5264_v58 = vpack.c.bf16 %v4773_v9, %v4771_v3  ;;  %v5266_v10 = vpack.c.bf16 %v4778_v20, %v4776_v22  ;;  %v4783_v9 = vld [vmem:[%s8924_s3 + $0x520] sm:$0xff]  ;;  %v4785_v22 = vld [vmem:[%s8924_s3 + $0x530] sm:$0xff]  ;;  %v4788_v20 = vld [vmem:[%s8924_s3 + $0x548] sm:$0xff] }
 0x449   : > { %3029 = vmatmul.mubr.f32.gmra.mrb[8].mxu1 %v7406_v11 }
 0x44a   : > { %4722 = vmatprep.mubr.msk.f32.mxu1 %vm2625_vm5, %v7428_v38  ;;  %5257 = vmatpush1.bf16.msra.mxu1 %v5256_v63  ;;  %v4782_v63 = vld [vmem:[%s8924_s3 + $0x518] sm:$0xff] }
 0x44b   : > { %5259 = vmatprep.subr.bf16.mxu1 %v5258_v61  ;;  %v5268_v61 = vpack.c.bf16 %v4777_v37, %v4775_v19  ;;  %v5270_v5 = vpack.c.bf16 %v4782_v63, %v4780_v4  ;;  %v4787_v37 = vld [vmem:[%s8924_s3 + $0x540] sm:$0xff]  ;;  %v4789_v4 = vld [vmem:[%s8924_s3 + $0x550] sm:$0xff]  ;;  %v4792_v63 = vld [vmem:[%s8924_s3 + $0x568] sm:$0xff] }
 0x44d   : > { %3035 = vmatmul.mubr.f32.gmra.mrb[56].mxu1 %v7430_v21 }
 0x44e   : > { %4723 = vmatprep.mubr.msk.f32.mxu1 %vm2625_vm5, %v7452_v44  ;;  %5261 = vmatpush1.bf16.msra.mxu1 %v5260_v28  ;;  %v4786_v28 = vld [vmem:[%s8924_s3 + $0x538] sm:$0xff] }
 0x44f   : > { %5263 = vmatprep.subr.bf16.mxu1 %v5262_v36  ;;  %v5272_v36 = vpack.c.bf16 %v4781_v49, %v4779_v31  ;;  %v5274_v3 = vpack.c.bf16 %v4786_v28, %v4784_v26  ;;  %v4791_v49 = vld [vmem:[%s8924_s3 + $0x560] sm:$0xff]  ;;  %v4793_v26 = vld [vmem:[%s8924_s3 + $0x570] sm:$0xff]  ;;  %v4796_v28 = vld [vmem:[%s8924_s3 + $0x588] sm:$0xff] }
 0x451   : > { %3039 = vmatmul.mubr.f32.gmra.mrb[12].mxu1 %v7454_v27 }
 0x452   : > { %4724 = vmatprep.mubr.msk.f32.mxu1 %vm2625_vm5, %v7476_v50  ;;  %5265 = vmatpush1.bf16.msra.mxu1 %v5264_v58  ;;  %v4790_v58 = vld [vmem:[%s8924_s3 + $0x558] sm:$0xff] }
 0x453   : > { %5267 = vmatprep.subr.bf16.mxu1 %v5266_v10  ;;  %v5276_v10 = vpack.c.bf16 %v4785_v22, %v4783_v9  ;;  %v5278_v19 = vpack.c.bf16 %v4790_v58, %v4788_v20  ;;  %v5284_v9 = vpack.c.bf16 %v4793_v26, %v4791_v49  ;;  %v4795_v20 = vld [vmem:[%s8924_s3 + $0x580] sm:$0xff]  ;;  %v4797_v58 = vld [vmem:[%s8924_s3 + $0x590] sm:$0xff] }
 0x455   : > { %3045 = vmatmul.mubr.f32.gmra.mrb[58].mxu1 %v7478_v35 }
 0x456   : > { %4725 = vmatprep.mubr.msk.f32.mxu1 %vm2625_vm5, %v7500_v56  ;;  %5269 = vmatpush1.bf16.msra.mxu1 %v5268_v61  ;;  %v4794_v61 = vld [vmem:[%s8924_s3 + $0x578] sm:$0xff] }
 0x457   : > { %5271 = vmatprep.subr.bf16.mxu1 %v5270_v5  ;;  %v5280_v5 = vpack.c.bf16 %v4789_v4, %v4787_v37  ;;  %v5282_v31 = vpack.c.bf16 %v4794_v61, %v4792_v63  ;;  %v5288_v37 = vpack.c.bf16 %v4797_v58, %v4795_v20  ;;  %v4823_v63 = vld [vmem:[%s8924_s3 + $0x5a0] sm:$0xff]  ;;  %v4825_v61 = vld [vmem:[%s8924_s3 + $0x5b0] sm:$0xff] }
 0x458   : > { %v5292_v49 = vpack.c.bf16 %v4825_v61, %v4823_v63 }
 0x459   : > { %3049 = vmatmul.mubr.f32.gmra.mrb[16].mxu1 %v7502_v41 }
 0x45a   : > { %4726 = vmatprep.mubr.msk.f32.mxu1 %vm2625_vm5, %v7524_v62  ;;  %5273 = vmatpush1.bf16.msra.mxu1 %v5272_v36  ;;  %v4798_v36 = vld [vmem:[%s8924_s3 + $0x598] sm:$0xff] }
 0x45b   : > { %5275 = vmatprep.subr.bf16.mxu1 %v5274_v3  ;;  %v8970_v3 = vld [vmem:[#allocation16_spill] sm:$0xff]  ;;  %v5286_v22 = vpack.c.bf16 %v4798_v36, %v4796_v28  ;;  %v4827_v28 = vld [vmem:[%s8924_s3 + $0x5c0] sm:$0xff]  ;;  %v4829_v36 = vld [vmem:[%s8924_s3 + $0x5d0] sm:$0xff] }
 0x45c   : > { %v5296_v20 = vpack.c.bf16 %v4829_v36, %v4827_v28 }
 0x45d   : > { %3055 = vmatmul.mubr.f32.gmra.mrb[60].mxu1 %v7526_v47 }
 0x45e   : > { %4727 = vmatprep.mubr.msk.f32.mxu1 %vm2625_vm5, %v7548_v32  ;;  %5277 = vmatpush1.bf16.msra.mxu1 %v5276_v10  ;;  %v4824_v10 = vld [vmem:[%s8924_s3 + $0x5a8] sm:$0xff] }
 0x45f   : > { %5279 = vmatprep.subr.bf16.mxu1 %v5278_v19  ;;  %v4826_v19 = vld [vmem:[%s8924_s3 + $0x5b8] sm:$0xff] }
 0x460   : > { %v5290_v4 = vpack.c.bf16 %v4826_v19, %v4824_v10  ;;  %v4831_v10 = vld [vmem:[%s8924_s3 + $0x5e0] sm:$0xff]  ;;  %v4833_v19 = vld [vmem:[%s8924_s3 + $0x5f0] sm:$0xff] }
 0x461   : > { %3059 = vmatmul.mubr.f32.gmra.mrb[20].mxu1 %v7550_v53  ;;  %v5300_v63 = vpack.c.bf16 %v4833_v19, %v4831_v10 }
 0x462   : > { %4728 = vmatprep.mubr.msk.f32.mxu1 %vm2625_vm5, %v8970_v3  ;;  %5281 = vmatpush1.bf16.msra.mxu1 %v5280_v5  ;;  %v4828_v5 = vld [vmem:[%s8924_s3 + $0x5c8] sm:$0xff] }
 0x463   : > { %5283 = vmatprep.subr.bf16.mxu1 %v5282_v31  ;;  %v4830_v31 = vld [vmem:[%s8924_s3 + $0x5d8] sm:$0xff] }
 0x464   : > { %v5294_v26 = vpack.c.bf16 %v4830_v31, %v4828_v5  ;;  %v4835_v5 = vld [vmem:[%s8924_s3 + $0x600] sm:$0xff]  ;;  %v4837_v31 = vld [vmem:[%s8924_s3 + $0x610] sm:$0xff] }
 0x465   : > { %3065 = vmatmul.mubr.f32.gmra.mrb[62].mxu1 %v7574_v59  ;;  %v5304_v28 = vpack.c.bf16 %v4837_v31, %v4835_v5 }
 0x466   : > { %4729 = vmatprep.mubr.msk.f32.mxu1 %vm2625_vm5, %v7596_v17  ;;  %5285 = vmatpush1.bf16.msra.mxu1 %v5284_v9  ;;  %v4832_v9 = vld [vmem:[%s8924_s3 + $0x5e8] sm:$0xff] }
 0x467   : > { %5287 = vmatprep.subr.bf16.mxu1 %v5286_v22  ;;  %v4834_v22 = vld [vmem:[%s8924_s3 + $0x5f8] sm:$0xff] }
 0x468   : > { %v5298_v58 = vpack.c.bf16 %v4834_v22, %v4832_v9  ;;  %v4839_v9 = vld [vmem:[%s8924_s3 + $0x620] sm:$0xff]  ;;  %v4841_v22 = vld [vmem:[%s8924_s3 + $0x630] sm:$0xff] }
 0x469   : > { %3069 = vmatmul.mubr.f32.gmra.mrb[24].mxu1 %v7598_v1  ;;  %v5308_v10 = vpack.c.bf16 %v4841_v22, %v4839_v9 }
 0x46a   : > { %4730 = vmatprep.mubr.msk.f32.mxu1 %vm2625_vm5, %v7608_v13  ;;  %5289 = vmatpush1.bf16.msra.mxu1 %v5288_v37  ;;  %v4836_v37 = vld [vmem:[%s8924_s3 + $0x608] sm:$0xff] }
 0x46b   : > { %5291 = vmatprep.subr.bf16.mxu1 %v5290_v4  ;;  %v4838_v4 = vld [vmem:[%s8924_s3 + $0x618] sm:$0xff] }
 0x46c   : > { %v5302_v61 = vpack.c.bf16 %v4838_v4, %v4836_v37  ;;  %v4843_v37 = vld [vmem:[%s8924_s3 + $0x640] sm:$0xff]  ;;  %v4845_v4 = vld [vmem:[%s8924_s3 + $0x650] sm:$0xff] }
 0x46d   : > { %3075 = vmatmul.mubr.f32.gmra.mrb[64].mxu1 %v7610_v51  ;;  %v5312_v5 = vpack.c.bf16 %v4845_v4, %v4843_v37  ;;  %v4858_v37 = vld [vmem:[%s8924_s3 + $0x6b8] sm:$0xff] }
 0x46e   : > { %4731 = vmatprep.mubr.msk.f32.mxu1 %vm2625_vm5, %v7620_v34 }
 0x471   : > { %3079 = vmatmul.mubr.f32.gmra.mrb[28].mxu1 %v7622_v33 }
 0x472   : > { %4732 = vmatprep.mubr.msk.f32.mxu1 %vm2625_vm5, %v7632_v12 }
 0x475   : > { %3085 = vmatmul.mubr.f32.gmra.mrb[66].mxu1 %v7634_v40 }
 0x476   : > { %4733 = vmatprep.mubr.msk.f32.mxu1 %vm2625_vm5, %v7644_v45 }
 0x479   : > { %3089 = vmatmul.mubr.f32.gmra.mrb[68].mxu1 %v7646_v6 }
 0x47a   : > { %4734 = vmatprep.mubr.msk.f32.mxu1 %vm2625_vm5, %v7656_v48 }
 0x47d   : > { %3093 = vmatmul.mubr.f32.gmra.mrb[70].mxu1 %v7658_v29 }
 0x47e   : > { %4735 = vmatprep.mubr.msk.f32.mxu1 %vm2625_vm5, %v7668_v57 }
 0x481   : > { %3097 = vmatmul.mubr.f32.gmra.mrb[72].mxu1 %v7670_v55 }
 0x482   : > { %4736 = vmatprep.mubr.msk.f32.mxu1 %vm2625_vm5, %v7680_v42 }
 0x485   : > { %3101 = vmatmul.mubr.f32.gmra.mrb[74].mxu1 %v7682_v23 }
 0x486   : > { %4737 = vmatprep.mubr.msk.f32.mxu1 %vm2625_vm5, %v7692_v46 }
 0x489   : > { %3105 = vmatmul.mubr.f32.gmra.mrb[76].mxu1 %v7694_v43 }
 0x48a   : > { %4738 = vmatprep.mubr.msk.f32.mxu1 %vm2625_vm5, %v7701_v60 }
 0x48d   : > { %3109 = vmatmul.mubr.f32.gmra.mrb[78].mxu1 %v7703_v54 }
 0x48e   : > { %4799 = vmatprep.mubr.msk.f32.mxu1 %vm2625_vm5, %v8969_v52 }
 0x491   : > { %3255 = vmatmul.mubr.f32.vlgmr.msra.gmra.mrb[80].mxu1 %v7262_v14 }
 0x492   : > { %5293 = vmatpush1.bf16.msra.mxu1 %v5292_v49  ;;  %4800 = vmatprep.mubr.msk.f32.mxu1 %vm2625_vm5, %v7284_v39  ;;  %v4840_v49 = vld [vmem:[%s8924_s3 + $0x628] sm:$0xff] }
 0x493   : > { %5295 = vmatprep.subr.bf16.mxu1 %v5294_v26  ;;  %v4842_v26 = vld [vmem:[%s8924_s3 + $0x638] sm:$0xff] }
 0x494   : > { %v5306_v36 = vpack.c.bf16 %v4842_v26, %v4840_v49  ;;  %v4847_v49 = vld [vmem:[%s8924_s3 + $0x660] sm:$0xff]  ;;  %v4849_v26 = vld [vmem:[%s8924_s3 + $0x670] sm:$0xff] }
 0x495   : > { %3259 = vmatmul.mubr.f32.gmra.mrb[82].mxu1 %v7286_v8  ;;  %v5316_v9 = vpack.c.bf16 %v4849_v26, %v4847_v49  ;;  %v4860_v49 = vld [vmem:[%s8924_s3 + $0x6c8] sm:$0xff]  ;;  %v4862_v26 = vld [vmem:[%s8924_s3 + $0x6d8] sm:$0xff] }
 0x496   : > { %4801 = vmatprep.mubr.msk.f32.mxu1 %vm2625_vm5, %v7308_v15  ;;  %5297 = vmatpush1.bf16.msra.mxu1 %v5296_v20  ;;  %v4844_v20 = vld [vmem:[%s8924_s3 + $0x648] sm:$0xff] }
 0x497   : > { %5299 = vmatprep.subr.bf16.mxu1 %v5298_v58  ;;  %v4846_v58 = vld [vmem:[%s8924_s3 + $0x658] sm:$0xff] }
 0x498   : > { %v5310_v19 = vpack.c.bf16 %v4846_v58, %v4844_v20  ;;  %v4851_v20 = vld [vmem:[%s8924_s3 + $0x680] sm:$0xff]  ;;  %v4853_v58 = vld [vmem:[%s8924_s3 + $0x690] sm:$0xff] }
 0x499   : > { %3263 = vmatmul.mubr.f32.gmra.mrb[84].mxu1 %v7310_v25 }
 0x49a   : > { %4802 = vmatprep.mubr.msk.f32.mxu1 %vm2625_vm5, %v7332_v0  ;;  %5301 = vmatpush1.bf16.msra.mxu1 %v5300_v63  ;;  %v4848_v63 = vld [vmem:[%s8924_s3 + $0x668] sm:$0xff] }
 0x49b   : > { %5303 = vmatprep.subr.bf16.mxu1 %v5302_v61  ;;  %v4850_v61 = vld [vmem:[%s8924_s3 + $0x678] sm:$0xff] }
 0x49c   : > { %v5314_v31 = vpack.c.bf16 %v4850_v61, %v4848_v63  ;;  %v5320_v63 = vpack.c.bf16 %v4853_v58, %v4851_v20  ;;  %v4864_v58 = vld [vmem:[%s8924_s3 + $0x6e8] sm:$0xff] }
 0x49d   : > { %3267 = vmatmul.mubr.f32.gmra.mrb[86].mxu1 %v7334_v2 }
 0x49e   : > { %4803 = vmatprep.mubr.msk.f32.mxu1 %vm2625_vm5, %v7356_v18  ;;  %5305 = vmatpush1.bf16.msra.mxu1 %v5304_v28  ;;  %v4852_v28 = vld [vmem:[%s8924_s3 + $0x688] sm:$0xff] }
 0x49f   : > { %5307 = vmatprep.subr.bf16.mxu1 %v5306_v36  ;;  %v4854_v36 = vld [vmem:[%s8924_s3 + $0x698] sm:$0xff] }
 0x4a0   : > { %v5318_v22 = vpack.c.bf16 %v4854_v36, %v4852_v28  ;;  %v5326_v36 = vpack.c.bf16 %v4862_v26, %v4860_v49 }
 0x4a1   : > { %3271 = vmatmul.mubr.f32.gmra.mrb[0].mxu1 %v7358_v16 }
 0x4a2   : > { %4804 = vmatprep.mubr.msk.f32.mxu1 %vm2625_vm5, %v7380_v24  ;;  %5309 = vmatpush1.bf16.msra.mxu1 %v5308_v10 }
 0x4a3   : > { %5311 = vmatprep.subr.bf16.mxu1 %v5310_v19  ;;  %v4856_v19 = vld [vmem:[%s8924_s3 + $0x6a8] sm:$0xff] }
 0x4a4   : > { %v5322_v61 = vpack.c.bf16 %v4858_v37, %v4856_v19 }
 0x4a5   : > { %3277 = vmatmul.mubr.f32.gmra.mrb[88].mxu1 %v7382_v7 }
 0x4a6   : > { %4805 = vmatprep.mubr.msk.f32.mxu1 %vm2625_vm5, %v7404_v30  ;;  %5313 = vmatpush1.bf16.msra.mxu1 %v5312_v5  ;;  %v4855_v5 = vld [vmem:[%s8924_s3 + $0x6a0] sm:$0xff] }
 0x4a7   : > { %5315 = vmatprep.subr.bf16.mxu1 %v5314_v31  ;;  %v4857_v31 = vld [vmem:[%s8924_s3 + $0x6b0] sm:$0xff] }
 0x4a8   : > { %v2770_v10 = vpop.f32.mrb[2].mxu1  ;;  %v5324_v28 = vpack.c.bf16 %v4857_v31, %v4855_v5  ;;  %v4868_v5 = vld [vmem:[%s8924_s3 + $0x708] sm:$0xff]  ;;  %v4870_v31 = vld [vmem:[%s8924_s3 + $0x718] sm:$0xff] }
 0x4a9   : > { %v2771_v4 = vpop.f32.mrb[3].mxu1  ;;  %3281 = vmatmul.mubr.f32.gmra.mrb[4].mxu1 %v7406_v11  ;;  %v4866_v10 = vld [vmem:[%s8924_s3 + $0x6f8] sm:$0xff]  ;;  %v5334_v26 = vpack.c.bf16 %v4870_v31, %v4868_v5 }
 0x4aa   : > { %4806 = vmatprep.mubr.msk.f32.mxu1 %vm2625_vm5, %v7428_v38  ;;  %5317 = vmatpush1.bf16.msra.mxu1 %v5316_v9  ;;  %v4859_v9 = vld [vmem:[%s8924_s3 + $0x6c0] sm:$0xff]  ;;  %v5330_v4 = vpack.c.bf16 %v4866_v10, %v4864_v58 }
 0x4ab   : > { %5319 = vmatprep.subr.bf16.mxu1 %v5318_v22  ;;  %v4861_v22 = vld [vmem:[%s8924_s3 + $0x6d0] sm:$0xff] }
 0x4ac   : > { %v5328_v37 = vpack.c.bf16 %v4861_v22, %v4859_v9  ;;  %v4872_v22 = vld [vmem:[%s8924_s3 + $0x728] sm:$0xff] }
 0x4ad   : > { %3287 = vmatmul.mubr.f32.gmra.mrb[90].mxu1 %v7430_v21 }
 0x4ae   : > { %4807 = vmatprep.mubr.msk.f32.mxu1 %vm2625_vm5, %v7452_v44  ;;  %5321 = vmatpush1.bf16.msra.mxu1 %v5320_v63  ;;  %v4863_v63 = vld [vmem:[%s8924_s3 + $0x6e0] sm:$0xff] }
 0x4af   : > { %5323 = vmatprep.subr.bf16.mxu1 %v5322_v61  ;;  %v4865_v61 = vld [vmem:[%s8924_s3 + $0x6f0] sm:$0xff] }
 0x4b0   : > { %v2780_v20 = vpop.f32.mrb[6].mxu1  ;;  %v5332_v49 = vpack.c.bf16 %v4865_v61, %v4863_v63  ;;  %v4876_v63 = vld [vmem:[%s8924_s3 + $0x748] sm:$0xff]  ;;  %v4878_v61 = vld [vmem:[%s8924_s3 + $0x758] sm:$0xff] }
 0x4b1   : > { %v2781_v19 = vpop.f32.mrb[7].mxu1  ;;  %3291 = vmatmul.mubr.f32.gmra.mrb[8].mxu1 %v7454_v27  ;;  %v4874_v20 = vld [vmem:[%s8924_s3 + $0x738] sm:$0xff]  ;;  %v5342_v31 = vpack.c.bf16 %v4878_v61, %v4876_v63 }
 0x4b2   : > { %4808 = vmatprep.mubr.msk.f32.mxu1 %vm2625_vm5, %v7476_v50  ;;  %5325 = vmatpush1.bf16.msra.mxu1 %v5324_v28  ;;  %v4867_v28 = vld [vmem:[%s8924_s3 + $0x700] sm:$0xff]  ;;  %v5338_v19 = vpack.c.bf16 %v4874_v20, %v4872_v22 }
 0x4b3   : > { %5327 = vmatprep.subr.bf16.mxu1 %v5326_v36  ;;  %v4869_v36 = vld [vmem:[%s8924_s3 + $0x710] sm:$0xff] }
 0x4b4   : > { %v5336_v10 = vpack.c.bf16 %v4869_v36, %v4867_v28  ;;  %v4880_v36 = vld [vmem:[%s8924_s3 + $0x768] sm:$0xff] }
 0x4b5   : > { %3297 = vmatmul.mubr.f32.gmra.mrb[92].mxu1 %v7478_v35 }
 0x4b6   : > { %4809 = vmatprep.mubr.msk.f32.mxu1 %vm2625_vm5, %v7500_v56  ;;  %5329 = vmatpush1.bf16.msra.mxu1 %v5328_v37  ;;  %v4871_v37 = vld [vmem:[%s8924_s3 + $0x720] sm:$0xff] }
 0x4b7   : > { %5331 = vmatprep.subr.bf16.mxu1 %v5330_v4  ;;  %v4873_v4 = vld [vmem:[%s8924_s3 + $0x730] sm:$0xff] }
 0x4b8   : > { %v2790_v9 = vpop.f32.mrb[10].mxu1  ;;  %v5340_v5 = vpack.c.bf16 %v4873_v4, %v4871_v37  ;;  %v4908_v37 = vld [vmem:[%s8924_s3 + $0x788] sm:$0xff]  ;;  %v4910_v4 = vld [vmem:[%s8924_s3 + $0x798] sm:$0xff] }
 0x4b9   : > { %v2791_v58 = vpop.f32.mrb[11].mxu1  ;;  %3301 = vmatmul.mubr.f32.gmra.mrb[12].mxu1 %v7502_v41  ;;  %v4882_v9 = vld [vmem:[%s8924_s3 + $0x778] sm:$0xff]  ;;  %v5350_v61 = vpack.c.bf16 %v4910_v4, %v4908_v37  ;;  %v4907_v37 = vld [vmem:[%s8924_s3 + $0x780] sm:$0xff]  ;;  %v4909_v4 = vld [vmem:[%s8924_s3 + $0x790] sm:$0xff] }
 0x4ba   : > { %4810 = vmatprep.mubr.msk.f32.mxu1 %vm2625_vm5, %v7524_v62  ;;  %5333 = vmatpush1.bf16.msra.mxu1 %v5332_v49  ;;  %v4875_v49 = vld [vmem:[%s8924_s3 + $0x740] sm:$0xff]  ;;  %v5346_v58 = vpack.c.bf16 %v4882_v9, %v4880_v36 }
 0x4bb   : > { %5335 = vmatprep.subr.bf16.mxu1 %v5334_v26  ;;  %v4877_v26 = vld [vmem:[%s8924_s3 + $0x750] sm:$0xff] }
 0x4bc   : > { %v5344_v20 = vpack.c.bf16 %v4877_v26, %v4875_v49 }
 0x4bd   : > { %3307 = vmatmul.mubr.f32.gmra.mrb[94].mxu1 %v7526_v47 }
 0x4be   : > { %4811 = vmatprep.mubr.msk.f32.mxu1 %vm2625_vm5, %v7548_v32  ;;  %5337 = vmatpush1.bf16.msra.mxu1 %v5336_v10  ;;  %v4879_v10 = vld [vmem:[%s8924_s3 + $0x760] sm:$0xff] }
 0x4bf   : > { %5339 = vmatprep.subr.bf16.mxu1 %v5338_v19  ;;  %v4881_v19 = vld [vmem:[%s8924_s3 + $0x770] sm:$0xff] }
 0x4c0   : > { %v2800_v28 = vpop.f32.mrb[14].mxu1  ;;  %v5348_v63 = vpack.c.bf16 %v4881_v19, %v4879_v10 }
 0x4c1   : > { %v2801_v22 = vpop.f32.mrb[15].mxu1  ;;  %3311 = vmatmul.mubr.f32.gmra.mrb[16].mxu1 %v7550_v53 }
 0x4c2   : > { %4812 = vmatprep.mubr.msk.f32.mxu1 %vm2625_vm5, %v8970_v3  ;;  %5341 = vmatpush1.bf16.msra.mxu1 %v5340_v5 }
 0x4c3   : > { %5343 = vmatprep.subr.bf16.mxu1 %v5342_v31 }
 0x4c5   : > { %3317 = vmatmul.mubr.f32.gmra.mrb[96].mxu1 %v7574_v59 }
 0x4c6   : > { %4813 = vmatprep.mubr.msk.f32.mxu1 %vm2625_vm5, %v7596_v17  ;;  %5345 = vmatpush1.bf16.msra.mxu1 %v5344_v20 }
 0x4c7   : > { %5347 = vmatprep.subr.bf16.mxu1 %v5346_v58 }
 0x4c8   : > { %v2810_v5 = vpop.f32.mrb[18].mxu1 }
 0x4c9   : > { %v2811_v31 = vpop.f32.mrb[19].mxu1  ;;  %3321 = vmatmul.mubr.f32.gmra.mrb[20].mxu1 %v7598_v1  ;;  %v4914_v5 = vld [vmem:[%s8924_s3 + $0x7b8] sm:$0xff] }
 0x4ca   : > { %4814 = vmatprep.mubr.msk.f32.mxu1 %vm2625_vm5, %v7608_v13  ;;  %5349 = vmatpush1.bf16.msra.mxu1 %v5348_v63 }
 0x4cb   : > { %5351 = vmatprep.subr.bf16.mxu1 %v5350_v61  ;;  %v4912_v61 = vld [vmem:[%s8924_s3 + $0x7a8] sm:$0xff] }
 0x4cd   : > { %3327 = vmatmul.mubr.f32.gmra.mrb[98].mxu1 %v7610_v51 }
 0x4ce   : > { %4815 = vmatprep.mubr.msk.f32.mxu1 %vm2625_vm5, %v7620_v34 }
 0x4d0   : > { %v2820_v49 = vpop.f32.mrb[22].mxu1 }
 0x4d1   : > { %v2821_v26 = vpop.f32.mrb[23].mxu1  ;;  %3331 = vmatmul.mubr.f32.gmra.mrb[24].mxu1 %v7622_v33  ;;  %v5352_v49 = vpack.c.bf16 %v4909_v4, %v4907_v37  ;;  %v4915_v37 = vld [vmem:[%s8924_s3 + $0x7c0] sm:$0xff]  ;;  %v4917_v4 = vld [vmem:[%s8924_s3 + $0x7d0] sm:$0xff] }
 0x4d2   : > { %4816 = vmatprep.mubr.msk.f32.mxu1 %vm2625_vm5, %v7632_v12  ;;  %v5354_v26 = vpack.c.bf16 %v4914_v5, %v4912_v61  ;;  %v4920_v61 = vld [vmem:[%s8924_s3 + $0x7e8] sm:$0xff]  ;;  %v4922_v5 = vld [vmem:[%s8924_s3 + $0x7f8] sm:$0xff] }
 0x4d5   : > { %3337 = vmatmul.mubr.f32.gmra.mrb[100].mxu1 %v7634_v40 }
 0x4d6   : > { %4817 = vmatprep.mubr.msk.f32.mxu1 %vm2625_vm5, %v7644_v45 }
 0x4d8   : > { %v2830_v28 = vpop.f32.mrb[26].mxu1 }
 0x4d9   : > { %v2831_v36 = vpop.f32.mrb[27].mxu1  ;;  %3341 = vmatmul.mubr.f32.gmra.mrb[28].mxu1 %v7646_v6  ;;  %v4911_v28 = vld [vmem:[%s8924_s3 + $0x7a0] sm:$0xff] }
 0x4da   : > { %4818 = vmatprep.mubr.msk.f32.mxu1 %vm2625_vm5, %v7656_v48  ;;  %v4913_v36 = vld [vmem:[%s8924_s3 + $0x7b0] sm:$0xff] }
 0x4dd   : > { %3347 = vmatmul.mubr.f32.gmra.mrb[102].mxu1 %v7658_v29 }
 0x4de   : > { %4819 = vmatprep.mubr.msk.f32.mxu1 %vm2625_vm5, %v7668_v57 }
 0x4e0   : > { %v2840_v9 = vpop.f32.mrb[30].mxu1 }
 0x4e1   : > { %v2841_v22 = vpop.f32.mrb[31].mxu1  ;;  %3351 = vmatmul.mubr.f32.gmra.mrb[104].mxu1 %v7670_v55 }
 0x4e2   : > { %4820 = vmatprep.mubr.msk.f32.mxu1 %vm2625_vm5, %v7680_v42  ;;  %v4916_v22 = vld [vmem:[%s8924_s3 + $0x7c8] sm:$0xff] }
 0x4e4   : > { %v2844_v20 = vpop.f32.mrb[32].mxu1 }
 0x4e5   : > { %v2845_v58 = vpop.f32.mrb[33].mxu1  ;;  %3355 = vmatmul.mubr.f32.gmra.mrb[106].mxu1 %v7682_v23  ;;  %v4918_v20 = vld [vmem:[%s8924_s3 + $0x7d8] sm:$0xff] }
 0x4e6   : > { %4821 = vmatprep.mubr.msk.f32.mxu1 %vm2625_vm5, %v7692_v46 }
 0x4e8   : > { %v2848_v10 = vpop.f32.mrb[34].mxu1 }
 0x4e9   : > { %v2849_v19 = vpop.f32.mrb[35].mxu1  ;;  %3359 = vmatmul.mubr.f32.gmra.mrb[108].mxu1 %v7694_v43  ;;  %v5356_v10 = vpack.c.bf16 %v4913_v36, %v4911_v28  ;;  %v4919_v28 = vld [vmem:[%s8924_s3 + $0x7e0] sm:$0xff]  ;;  %v4921_v36 = vld [vmem:[%s8924_s3 + $0x7f0] sm:$0xff] }
 0x4ea   : > { %4822 = vmatprep.mubr.msk.f32.mxu1 %vm2625_vm5, %v7701_v60  ;;  %v5358_v19 = vpack.c.bf16 %v4918_v20, %v4916_v22  ;;  %v4924_v22 = vld [vmem:[%s8924_s3 + $0x808] sm:$0xff]  ;;  %v4926_v20 = vld [vmem:[%s8924_s3 + $0x818] sm:$0xff] }
 0x4ec   : > { %v2852_v63 = vpop.f32.mrb[36].mxu1 }
 0x4ed   : > { %v2853_v31 = vpop.f32.mrb[37].mxu1  ;;  %3363 = vmatmul.mubr.f32.gmra.mrb[110].mxu1 %v7703_v54 }
 0x4ee   : > { %4883 = vmatprep.mubr.msk.f32.mxu1 %vm2625_vm5, %v8969_v52 }
 0x4f0   : > { %v2856_v9 = vpop.f32.mrb[38].mxu1 }
 0x4f1   : > { %v2857_v58 = vpop.f32.mrb[39].mxu1  ;;  %3509 = vmatmul.mubr.f32.vlgmr.msra.gmra.mrb[112].mxu1 %v7262_v14 }
 0x4f2   : > { %5353 = vmatpush1.bf16.msra.mxu1 %v5352_v49  ;;  %4884 = vmatprep.mubr.msk.f32.mxu1 %vm2625_vm5, %v7284_v39  ;;  %v5360_v49 = vpack.c.bf16 %v4917_v4, %v4915_v37  ;;  %v4923_v37 = vld [vmem:[%s8924_s3 + $0x800] sm:$0xff]  ;;  %v4925_v4 = vld [vmem:[%s8924_s3 + $0x810] sm:$0xff] }
 0x4f3   : > { %5355 = vmatprep.subr.bf16.mxu1 %v5354_v26  ;;  %v5362_v26 = vpack.c.bf16 %v4922_v5, %v4920_v61  ;;  %v4928_v61 = vld [vmem:[%s8924_s3 + $0x828] sm:$0xff]  ;;  %v4930_v5 = vld [vmem:[%s8924_s3 + $0x838] sm:$0xff] }
 0x4f4   : > { %v2860_v63 = vpop.f32.mrb[40].mxu1 }
 0x4f5   : > { %v2861_v31 = vpop.f32.mrb[41].mxu1  ;;  %3513 = vmatmul.mubr.f32.gmra.mrb[114].mxu1 %v7286_v8 }
 0x4f6   : > { %4885 = vmatprep.mubr.msk.f32.mxu1 %vm2625_vm5, %v7308_v15  ;;  %5357 = vmatpush1.bf16.msra.mxu1 %v5356_v10  ;;  %v5364_v10 = vpack.c.bf16 %v4921_v36, %v4919_v28  ;;  %v4927_v28 = vld [vmem:[%s8924_s3 + $0x820] sm:$0xff]  ;;  %v4929_v36 = vld [vmem:[%s8924_s3 + $0x830] sm:$0xff] }
 0x4f7   : > { %5359 = vmatprep.subr.bf16.mxu1 %v5358_v19  ;;  %v5366_v19 = vpack.c.bf16 %v4926_v20, %v4924_v22  ;;  %v4932_v22 = vld [vmem:[%s8924_s3 + $0x848] sm:$0xff]  ;;  %v4934_v20 = vld [vmem:[%s8924_s3 + $0x858] sm:$0xff] }
 0x4f8   : > { %v2864_v9 = vpop.f32.mrb[42].mxu1 }
 0x4f9   : > { %v2865_v58 = vpop.f32.mrb[43].mxu1  ;;  %3517 = vmatmul.mubr.f32.gmra.mrb[116].mxu1 %v7310_v25 }
 0x4fa   : > { %4886 = vmatprep.mubr.msk.f32.mxu1 %vm2625_vm5, %v7332_v0  ;;  %5361 = vmatpush1.bf16.msra.mxu1 %v5360_v49  ;;  %v5368_v49 = vpack.c.bf16 %v4925_v4, %v4923_v37  ;;  %v4931_v37 = vld [vmem:[%s8924_s3 + $0x840] sm:$0xff]  ;;  %v4933_v4 = vld [vmem:[%s8924_s3 + $0x850] sm:$0xff] }
 0x4fb   : > { %5363 = vmatprep.subr.bf16.mxu1 %v5362_v26  ;;  %v5370_v26 = vpack.c.bf16 %v4930_v5, %v4928_v61  ;;  %v4936_v61 = vld [vmem:[%s8924_s3 + $0x868] sm:$0xff]  ;;  %v4938_v5 = vld [vmem:[%s8924_s3 + $0x878] sm:$0xff] }
 0x4fc   : > { %v2868_v63 = vpop.f32.mrb[44].mxu1 }
 0x4fd   : > { %v2869_v31 = vpop.f32.mrb[45].mxu1  ;;  %3521 = vmatmul.mubr.f32.gmra.mrb[118].mxu1 %v7334_v2 }
 0x4fe   : > { %4887 = vmatprep.mubr.msk.f32.mxu1 %vm2625_vm5, %v7356_v18  ;;  %5365 = vmatpush1.bf16.msra.mxu1 %v5364_v10  ;;  %v5372_v10 = vpack.c.bf16 %v4929_v36, %v4927_v28  ;;  %v4935_v28 = vld [vmem:[%s8924_s3 + $0x860] sm:$0xff]  ;;  %v4937_v36 = vld [vmem:[%s8924_s3 + $0x870] sm:$0xff] }
 0x4ff   : > { %5367 = vmatprep.subr.bf16.mxu1 %v5366_v19  ;;  %v5374_v19 = vpack.c.bf16 %v4934_v20, %v4932_v22  ;;  %v4940_v22 = vld [vmem:[%s8924_s3 + $0x888] sm:$0xff]  ;;  %v4942_v20 = vld [vmem:[%s8924_s3 + $0x898] sm:$0xff] }
 0x500   : > { %v2872_v9 = vpop.f32.mrb[46].mxu1 }
 0x501   : > { %v2873_v58 = vpop.f32.mrb[47].mxu1  ;;  %3525 = vmatmul.mubr.f32.gmra.mrb[120].mxu1 %v7358_v16 }
 0x502   : > { %4888 = vmatprep.mubr.msk.f32.mxu1 %vm2625_vm5, %v7380_v24  ;;  %5369 = vmatpush1.bf16.msra.mxu1 %v5368_v49  ;;  %v5376_v49 = vpack.c.bf16 %v4933_v4, %v4931_v37  ;;  %v4939_v37 = vld [vmem:[%s8924_s3 + $0x880] sm:$0xff]  ;;  %v4941_v4 = vld [vmem:[%s8924_s3 + $0x890] sm:$0xff] }
 0x503   : > { %5371 = vmatprep.subr.bf16.mxu1 %v5370_v26  ;;  %v5378_v26 = vpack.c.bf16 %v4938_v5, %v4936_v61  ;;  %v4946_v61 = vld [vmem:[%s8924_s3 + $0x8b8] sm:$0xff]  ;;  %v5384_v5 = vpack.c.bf16 %v4941_v4, %v4939_v37  ;;  %v4952_v37 = vld [vmem:[%s8924_s3 + $0x8e8] sm:$0xff] }
 0x504   : > { %v3002_v63 = vpop.f32.mrb[48].mxu1  ;;  %v4954_v4 = vld [vmem:[%s8924_s3 + $0x8f8] sm:$0xff] }
 0x505   : > { %v3003_v31 = vpop.f32.mrb[49].mxu1  ;;  %3529 = vmatmul.mubr.f32.gmra.mrb[122].mxu1 %v7382_v7  ;;  %v4944_v63 = vld [vmem:[%s8924_s3 + $0x8a8] sm:$0xff] }
 0x506   : > { %4889 = vmatprep.mubr.msk.f32.mxu1 %vm2625_vm5, %v7404_v30  ;;  %5373 = vmatpush1.bf16.msra.mxu1 %v5372_v10  ;;  %v5380_v10 = vpack.c.bf16 %v4937_v36, %v4935_v28  ;;  %v5386_v31 = vpack.c.bf16 %v4946_v61, %v4944_v63  ;;  %v4948_v36 = vld [vmem:[%s8924_s3 + $0x8c8] sm:$0xff]  ;;  %v5394_v61 = vpack.c.bf16 %v4954_v4, %v4952_v37 }
 0x507   : > { %5375 = vmatprep.subr.bf16.mxu1 %v5374_v19  ;;  %v5382_v19 = vpack.c.bf16 %v4942_v20, %v4940_v22 }
 0x508   : > { %v3006_v9 = vpop.f32.mrb[50].mxu1 }
 0x509   : > { %v3007_v58 = vpop.f32.mrb[51].mxu1  ;;  %3533 = vmatmul.mubr.f32.gmra.mrb[0].mxu1 %v7406_v11  ;;  %v4950_v9 = vld [vmem:[%s8924_s3 + $0x8d8] sm:$0xff] }
 0x50a   : > { %4890 = vmatprep.mubr.msk.f32.mxu1 %vm2625_vm5, %v7428_v38  ;;  %5377 = vmatpush1.bf16.msra.mxu1 %v5376_v49  ;;  %v4943_v49 = vld [vmem:[%s8924_s3 + $0x8a0] sm:$0xff]  ;;  %v5390_v58 = vpack.c.bf16 %v4950_v9, %v4948_v36 }
 0x50b   : > { %5379 = vmatprep.subr.bf16.mxu1 %v5378_v26  ;;  %v4945_v26 = vld [vmem:[%s8924_s3 + $0x8b0] sm:$0xff] }
 0x50c   : > { %v5388_v20 = vpack.c.bf16 %v4945_v26, %v4943_v49  ;;  %v4956_v26 = vld [vmem:[%s8924_s3 + $0x908] sm:$0xff] }
 0x50d   : > { %3539 = vmatmul.mubr.f32.gmra.mrb[124].mxu1 %v7430_v21 }
 0x50e   : > { %4891 = vmatprep.mubr.msk.f32.mxu1 %vm2625_vm5, %v7452_v44  ;;  %5381 = vmatpush1.bf16.msra.mxu1 %v5380_v10  ;;  %v4947_v10 = vld [vmem:[%s8924_s3 + $0x8c0] sm:$0xff] }
 0x50f   : > { %5383 = vmatprep.subr.bf16.mxu1 %v5382_v19  ;;  %v4949_v19 = vld [vmem:[%s8924_s3 + $0x8d0] sm:$0xff] }
 0x510   : > { %v3016_v28 = vpop.f32.mrb[52].mxu1  ;;  %v5392_v63 = vpack.c.bf16 %v4949_v19, %v4947_v10  ;;  %v4960_v10 = vld [vmem:[%s8924_s3 + $0x928] sm:$0xff]  ;;  %v4962_v19 = vld [vmem:[%s8924_s3 + $0x938] sm:$0xff] }
 0x511   : > { %v3017_v22 = vpop.f32.mrb[53].mxu1  ;;  %3543 = vmatmul.mubr.f32.gmra.mrb[4].mxu1 %v7454_v27  ;;  %v4958_v28 = vld [vmem:[%s8924_s3 + $0x918] sm:$0xff]  ;;  %v5402_v4 = vpack.c.bf16 %v4962_v19, %v4960_v10 }
 0x512   : > { %4892 = vmatprep.mubr.msk.f32.mxu1 %vm2625_vm5, %v7476_v50  ;;  %5385 = vmatpush1.bf16.msra.mxu1 %v5384_v5  ;;  %v4951_v5 = vld [vmem:[%s8924_s3 + $0x8e0] sm:$0xff]  ;;  %v5398_v22 = vpack.c.bf16 %v4958_v28, %v4956_v26 }
 0x513   : > { %5387 = vmatprep.subr.bf16.mxu1 %v5386_v31  ;;  %v4953_v31 = vld [vmem:[%s8924_s3 + $0x8f0] sm:$0xff] }
 0x514   : > { %v5396_v9 = vpack.c.bf16 %v4953_v31, %v4951_v5  ;;  %v4964_v31 = vld [vmem:[%s8924_s3 + $0x948] sm:$0xff] }
 0x515   : > { %3549 = vmatmul.mubr.f32.gmra.mrb[126].mxu1 %v7478_v35 }
 0x516   : > { %4893 = vmatprep.mubr.msk.f32.mxu1 %vm2625_vm5, %v7500_v56  ;;  %5389 = vmatpush1.bf16.msra.mxu1 %v5388_v20  ;;  %v4955_v20 = vld [vmem:[%s8924_s3 + $0x900] sm:$0xff] }
 0x517   : > { %5391 = vmatprep.subr.bf16.mxu1 %v5390_v58  ;;  %v4957_v58 = vld [vmem:[%s8924_s3 + $0x910] sm:$0xff] }
 0x518   : > { %v3026_v49 = vpop.f32.mrb[54].mxu1  ;;  %v5400_v37 = vpack.c.bf16 %v4957_v58, %v4955_v20 }
 0x519   : > { %v3027_v36 = vpop.f32.mrb[55].mxu1  ;;  %3553 = vmatmul.mubr.f32.gmra.mrb[8].mxu1 %v7502_v41  ;;  %v4966_v49 = vld [vmem:[%s8924_s3 + $0x958] sm:$0xff] }
 0x51a   : > { %4894 = vmatprep.mubr.msk.f32.mxu1 %vm2625_vm5, %v7524_v62  ;;  %5393 = vmatpush1.bf16.msra.mxu1 %v5392_v63  ;;  %v4959_v63 = vld [vmem:[%s8924_s3 + $0x920] sm:$0xff]  ;;  %v5406_v36 = vpack.c.bf16 %v4966_v49, %v4964_v31 }
 0x51b   : > { %5395 = vmatprep.subr.bf16.mxu1 %v5394_v61  ;;  %v4961_v61 = vld [vmem:[%s8924_s3 + $0x930] sm:$0xff] }
 0x51c   : > { %v5404_v28 = vpack.c.bf16 %v4961_v61, %v4959_v63 }
 0x51d   : > { %3559 = vmatmul.mubr.f32.gmra.mrb[128].mxu1 %v7526_v47 }
 0x51e   : > { %4895 = vmatprep.mubr.msk.f32.mxu1 %vm2625_vm5, %v7548_v32  ;;  %5397 = vmatpush1.bf16.msra.mxu1 %v5396_v9  ;;  %v4963_v9 = vld [vmem:[%s8924_s3 + $0x940] sm:$0xff] }
 0x51f   : > { %5399 = vmatprep.subr.bf16.mxu1 %v5398_v22  ;;  %v4965_v22 = vld [vmem:[%s8924_s3 + $0x950] sm:$0xff] }
 0x520   : > { %v3036_v5 = vpop.f32.mrb[56].mxu1  ;;  %v5408_v20 = vpack.c.bf16 %v4965_v22, %v4963_v9 }
 0x521   : > { %v3037_v26 = vpop.f32.mrb[57].mxu1  ;;  %3563 = vmatmul.mubr.f32.gmra.mrb[12].mxu1 %v7550_v53 }
 0x522   : > { %4896 = vmatprep.mubr.msk.f32.mxu1 %vm2625_vm5, %v8970_v3  ;;  %5401 = vmatpush1.bf16.msra.mxu1 %v5400_v37 }
 0x523   : > { %5403 = vmatprep.subr.bf16.mxu1 %v5402_v4 }
 0x525   : > { %3569 = vmatmul.mubr.f32.gmra.mrb[130].mxu1 %v7574_v59 }
 0x526   : > { %4897 = vmatprep.mubr.msk.f32.mxu1 %vm2625_vm5, %v7596_v17  ;;  %5405 = vmatpush1.bf16.msra.mxu1 %v5404_v28 }
 0x527   : > { %5407 = vmatprep.subr.bf16.mxu1 %v5406_v36 }
 0x528   : > { %v3046_v58 = vpop.f32.mrb[58].mxu1 }
 0x529   : > { %v3047_v10 = vpop.f32.mrb[59].mxu1  ;;  %3573 = vmatmul.mubr.f32.gmra.mrb[16].mxu1 %v7598_v1 }
 0x52a   : > { %4898 = vmatprep.mubr.msk.f32.mxu1 %vm2625_vm5, %v7608_v13  ;;  %5409 = vmatpush1.bf16.msra.mxu1 %v5408_v20 }
 0x52d   : > { %3579 = vmatmul.mubr.f32.gmra.mrb[132].mxu1 %v7610_v51 }
 0x52e   : > { %4899 = vmatprep.mubr.msk.f32.mxu1 %vm2625_vm5, %v7620_v34 }
 0x530   : > { %v3056_v19 = vpop.f32.mrb[60].mxu1 }
 0x531   : > { %v3057_v37 = vpop.f32.mrb[61].mxu1  ;;  %3583 = vmatmul.mubr.f32.gmra.mrb[20].mxu1 %v7622_v33 }
 0x532   : > { %4900 = vmatprep.mubr.msk.f32.mxu1 %vm2625_vm5, %v7632_v12 }
 0x535   : > { %3589 = vmatmul.mubr.f32.gmra.mrb[134].mxu1 %v7634_v40 }
 0x536   : > { %4901 = vmatprep.mubr.msk.f32.mxu1 %vm2625_vm5, %v7644_v45 }
 0x538   : > { %v3066_v4 = vpop.f32.mrb[62].mxu1 }
 0x539   : > { %v3067_v63 = vpop.f32.mrb[63].mxu1  ;;  %3593 = vmatmul.mubr.f32.gmra.mrb[24].mxu1 %v7646_v6 }
 0x53a   : > { %4902 = vmatprep.mubr.msk.f32.mxu1 %vm2625_vm5, %v7656_v48 }
 0x53d   : > { %3599 = vmatmul.mubr.f32.gmra.mrb[136].mxu1 %v7658_v29 }
 0x53e   : > { %4903 = vmatprep.mubr.msk.f32.mxu1 %vm2625_vm5, %v7668_v57 }
 0x540   : > { %v3076_v61 = vpop.f32.mrb[64].mxu1 }
 0x541   : > { %v3077_v5 = vpop.f32.mrb[65].mxu1  ;;  %3603 = vmatmul.mubr.f32.gmra.mrb[28].mxu1 %v7670_v55 }
 0x542   : > { %4904 = vmatprep.mubr.msk.f32.mxu1 %vm2625_vm5, %v7680_v42 }
 0x545   : > { %3609 = vmatmul.mubr.f32.gmra.mrb[138].mxu1 %v7682_v23 }
 0x546   : > { %4905 = vmatprep.mubr.msk.f32.mxu1 %vm2625_vm5, %v7692_v46 }
 0x548   : > { %v3086_v31 = vpop.f32.mrb[66].mxu1 }
 0x549   : > { %v3087_v49 = vpop.f32.mrb[67].mxu1  ;;  %3613 = vmatmul.mubr.f32.gmra.mrb[140].mxu1 %v7694_v43 }
 0x54a   : > { %4906 = vmatprep.mubr.msk.f32.mxu1 %vm2625_vm5, %v7701_v60 }
 0x54c   : > { %v3090_v26 = vpop.f32.mrb[68].mxu1 }
 0x54d   : > { %v3091_v28 = vpop.f32.mrb[69].mxu1  ;;  %3617 = vmatmul.mubr.f32.gmra.mrb[142].mxu1 %v7703_v54  ;;  %v4993_v26 = vld [vmem:[%s8926_s5 + $0xa0] sm:$0xff] }
 0x54e   : > { %4967 = vmatprep.mubr.msk.f32.mxu1 %vm2625_vm5, %v8969_v52  ;;  %v4994_v28 = vld [vmem:[%s8926_s5 + $0xa8] sm:$0xff] }
 0x550   : > { %v3094_v36 = vpop.f32.mrb[70].mxu1 }
 0x551   : > { %v3095_v9 = vpop.f32.mrb[71].mxu1  ;;  %3763 = vmatmul.mubr.f32.vlgmr.msra.gmra.mrb[144].mxu1 %v7262_v14  ;;  %v6022_v36 = vmov 0.0|0.0  }
 0x552   : > { %4968 = vmatprep.mubr.msk.f32.mxu1 %vm2625_vm5, %v7284_v39  ;;  %5440 = vmatprep.subr.bf16.mxu1 %v6022_v36  ;;  %v5441_v9 = vpack.c.bf16 %v4994_v28, %v4993_v26 }
 0x553   : > { %5410 = vmatprep.subr.bf16.mxu0 %v6022_v36 }
 0x554   : > { %v3098_v22 = vpop.f32.mrb[72].mxu1  ;;  %5442 = vmatpush1.bf16.msra.mxu1 %v5441_v9 }
 0x555   : > { %v3099_v20 = vpop.f32.mrb[73].mxu1  ;;  %3767 = vmatmul.mubr.f32.gmra.mrb[146].mxu1 %v7286_v8  ;;  %5443 = vmatprep.subr.bf16.mxu1 %v6022_v36 }
 0x556   : > { %4969 = vmatprep.mubr.msk.f32.mxu1 %vm2625_vm5, %v7308_v15 }
 0x558   : > { %v3102_v58 = vpop.f32.mrb[74].mxu1 }
 0x559   : > { %v3103_v10 = vpop.f32.mrb[75].mxu1  ;;  %3771 = vmatmul.mubr.f32.gmra.mrb[148].mxu1 %v7310_v25  ;;  %v4995_v58 = vld [vmem:[%s8926_s5 + $0xb0] sm:$0xff] }
 0x55a   : > { %4970 = vmatprep.mubr.msk.f32.mxu1 %vm2625_vm5, %v7332_v0  ;;  %v4996_v10 = vld [vmem:[%s8926_s5 + $0xb8] sm:$0xff] }
 0x55c   : > { %v3106_v52 = vpop.f32.mrb[76].mxu1 }
 0x55d   : > { %v3107_v19 = vpop.f32.mrb[77].mxu1  ;;  %3775 = vmatmul.mubr.f32.gmra.mrb[150].mxu1 %v7334_v2  ;;  %v4997_v52 = vld [vmem:[%s8926_s5 + $0xc0] sm:$0xff] }
 0x55e   : > { %4971 = vmatprep.mubr.msk.f32.mxu1 %vm2625_vm5, %v7356_v18  ;;  %v5444_v19 = vpack.c.bf16 %v4996_v10, %v4995_v58 }
 0x560   : > { %v3110_v14 = vpop.f32.mrb[78].mxu1  ;;  %5445 = vmatpush1.bf16.msra.mxu1 %v5444_v19 }
 0x561   : > { %v3111_v39 = vpop.f32.mrb[79].mxu1  ;;  %3779 = vmatmul.mubr.f32.gmra.mrb[152].mxu1 %v7358_v16  ;;  %v4998_v14 = vld [vmem:[%s8926_s5 + $0xc8] sm:$0xff]  ;;  %5446 = vmatprep.subr.bf16.mxu1 %v6022_v36 }
 0x562   : > { %4972 = vmatprep.mubr.msk.f32.mxu1 %vm2625_vm5, %v7380_v24  ;;  %v3972_v39 = vld [vmem:[%s8926_s5] sm:$0xff] }
 0x564   : > { %v3256_v8 = vpop.f32.mrb[80].mxu1 }
 0x565   : > { %v3257_v15 = vpop.f32.mrb[81].mxu1  ;;  %3783 = vmatmul.mubr.f32.gmra.mrb[154].mxu1 %v7382_v7  ;;  %v5447_v8 = vpack.c.bf16 %v4998_v14, %v4997_v52 }
 0x566   : > { %4973 = vmatprep.mubr.msk.f32.mxu1 %vm2625_vm5, %v7404_v30  ;;  %v4999_v15 = vld [vmem:[%s8926_s5 + $0xd0] sm:$0xff] }
 0x567   : > { %5448 = vmatpush1.bf16.msra.mxu1 %v5447_v8 }
 0x568   : > { %v3260_v25 = vpop.f32.mrb[82].mxu1  ;;  %5449 = vmatprep.subr.bf16.mxu1 %v6022_v36 }
 0x569   : > { %v3261_v0 = vpop.f32.mrb[83].mxu1  ;;  %3787 = vmatmul.mubr.f32.gmra.mrb[156].mxu1 %v7406_v11  ;;  %v3973_v25 = vld [vmem:[%s8926_s5 + $0x8] sm:$0xff] }
 0x56a   : > { %4974 = vmatprep.mubr.msk.f32.mxu1 %vm2625_vm5, %v7428_v38  ;;  %v5000_v0 = vld [vmem:[%s8926_s5 + $0xd8] sm:$0xff] }
 0x56c   : > { %v3264_v2 = vpop.f32.mrb[84].mxu1 }
 0x56d   : > { %v3265_v18 = vpop.f32.mrb[85].mxu1  ;;  %3791 = vmatmul.mubr.f32.gmra.mrb[158].mxu1 %v7430_v21  ;;  %v5411_v2 = vpack.c.bf16 %v3973_v25, %v3972_v39 }
 0x56e   : > { %4975 = vmatprep.mubr.msk.f32.mxu1 %vm2625_vm5, %v7452_v44  ;;  %v3974_v18 = vld [vmem:[%s8926_s5 + $0x10] sm:$0xff] }
 0x56f   : > { %5412 = vmatpush1.bf16.msra.mxu0 %v5411_v2 }
 0x570   : > { %v3268_v16 = vpop.f32.mrb[86].mxu1  ;;  %5413 = vmatprep.subr.bf16.mxu0 %v6022_v36 }
 0x571   : > { %v3269_v24 = vpop.f32.mrb[87].mxu1  ;;  %3795 = vmatmul.mubr.f32.gmra.mrb[0].mxu1 %v7454_v27  ;;  %v3975_v16 = vld [vmem:[%s8926_s5 + $0x18] sm:$0xff] }
 0x572   : > { %4976 = vmatprep.mubr.msk.f32.mxu1 %vm2625_vm5, %v7476_v50  ;;  %v5414_v24 = vpack.c.bf16 %v3975_v16, %v3974_v18 }
 0x574   : > { %5415 = vmatpush1.bf16.msra.mxu0 %v5414_v24  ;;  %v3980_v24 = vld [vmem:[%s8926_s5 + $0x40] sm:$0xff] }
 0x575   : > { %3801 = vmatmul.mubr.f32.gmra.mrb[160].mxu1 %v7478_v35  ;;  %5416 = vmatprep.subr.bf16.mxu0 %v6022_v36 }
 0x576   : > { %4977 = vmatprep.mubr.msk.f32.mxu1 %vm2625_vm5, %v7500_v56 }
 0x578   : > { %v3278_v7 = vpop.f32.mrb[88].mxu1 }
 0x579   : > { %v3279_v30 = vpop.f32.mrb[89].mxu1  ;;  %3805 = vmatmul.mubr.f32.gmra.mrb[4].mxu1 %v7502_v41 }
 0x57a   : > { %4978 = vmatprep.mubr.msk.f32.mxu1 %vm2625_vm5, %v7524_v62  ;;  %v5450_v30 = vpack.c.bf16 %v5000_v0, %v4999_v15 }
 0x57c   : > { %5451 = vmatpush1.bf16.msra.mxu1 %v5450_v30 }
 0x57d   : > { %3811 = vmatmul.mubr.f32.gmra.mrb[162].mxu1 %v7526_v47  ;;  %5452 = vmatprep.subr.bf16.mxu1 %v6022_v36 }
 0x57e   : > { %4979 = vmatprep.mubr.msk.f32.mxu1 %vm2625_vm5, %v7548_v32 }
 0x580   : > { %v3288_v11 = vpop.f32.mrb[90].mxu1 }
 0x581   : > { %v3289_v38 = vpop.f32.mrb[91].mxu1  ;;  %3815 = vmatmul.mubr.f32.gmra.mrb[8].mxu1 %v7550_v53  ;;  %v3976_v11 = vld [vmem:[%s8926_s5 + $0x20] sm:$0xff] }
 0x582   : > { %4980 = vmatprep.mubr.msk.f32.mxu1 %vm2625_vm5, %v8970_v3  ;;  %v3977_v38 = vld [vmem:[%s8926_s5 + $0x28] sm:$0xff] }
 0x585   : > { %3821 = vmatmul.mubr.f32.gmra.mrb[164].mxu1 %v7574_v59 }
 0x586   : > { %4981 = vmatprep.mubr.msk.f32.mxu1 %vm2625_vm5, %v7596_v17 }
 0x588   : > { %v3298_v21 = vpop.f32.mrb[92].mxu1 }
 0x589   : > { %v3299_v44 = vpop.f32.mrb[93].mxu1  ;;  %3825 = vmatmul.mubr.f32.gmra.mrb[12].mxu1 %v7598_v1 }
 0x58a   : > { %4982 = vmatprep.mubr.msk.f32.mxu1 %vm2625_vm5, %v7608_v13  ;;  %v5001_v44 = vld [vmem:[%s8926_s5 + $0xe0] sm:$0xff] }
 0x58d   : > { %3831 = vmatmul.mubr.f32.gmra.mrb[166].mxu1 %v7610_v51 }
 0x58e   : > { %4983 = vmatprep.mubr.msk.f32.mxu1 %vm2625_vm5, %v7620_v34 }
 0x590   : > { %v3308_v27 = vpop.f32.mrb[94].mxu1 }
 0x591   : > { %v3309_v50 = vpop.f32.mrb[95].mxu1  ;;  %3835 = vmatmul.mubr.f32.gmra.mrb[16].mxu1 %v7622_v33  ;;  %v5002_v27 = vld [vmem:[%s8926_s5 + $0xe8] sm:$0xff] }
 0x592   : > { %4984 = vmatprep.mubr.msk.f32.mxu1 %vm2625_vm5, %v7632_v12  ;;  %v5417_v50 = vpack.c.bf16 %v3977_v38, %v3976_v11 }
 0x594   : > { %5418 = vmatpush1.bf16.msra.mxu0 %v5417_v50 }
 0x595   : > { %3841 = vmatmul.mubr.f32.gmra.mrb[168].mxu1 %v7634_v40  ;;  %5419 = vmatprep.subr.bf16.mxu0 %v6022_v36 }
 0x596   : > { %4985 = vmatprep.mubr.msk.f32.mxu1 %vm2625_vm5, %v7644_v45 }
 0x598   : > { %v3318_v35 = vpop.f32.mrb[96].mxu1 }
 0x599   : > { %v3319_v56 = vpop.f32.mrb[97].mxu1  ;;  %3845 = vmatmul.mubr.f32.gmra.mrb[20].mxu1 %v7646_v6  ;;  %v5453_v35 = vpack.c.bf16 %v5002_v27, %v5001_v44  ;;  %v3982_v44 = vld [vmem:[%s8926_s5 + $0x50] sm:$0xff]  ;;  %v3983_v27 = vld [vmem:[%s8926_s5 + $0x58] sm:$0xff] }
 0x59a   : > { %4986 = vmatprep.mubr.msk.f32.mxu1 %vm2625_vm5, %v7656_v48  ;;  %v3978_v56 = vld [vmem:[%s8926_s5 + $0x30] sm:$0xff]  ;;  %v5426_v50 = vpack.c.bf16 %v3983_v27, %v3982_v44  ;;  %v5018_v27 = vld [vmem:[%s8926_s5 + $0x160] sm:$0xff] }
 0x59b   : > { %5454 = vmatpush1.bf16.msra.mxu1 %v5453_v35 }
 0x59c   : > { %5455 = vmatprep.subr.bf16.mxu1 %v6022_v36 }
 0x59d   : > { %3851 = vmatmul.mubr.f32.gmra.mrb[170].mxu1 %v7658_v29 }
 0x59e   : > { %4987 = vmatprep.mubr.msk.f32.mxu1 %vm2625_vm5, %v7668_v57 }
 0x5a0   : > { %v3328_v41 = vpop.f32.mrb[98].mxu1 }
 0x5a1   : > { %v3329_v62 = vpop.f32.mrb[99].mxu1  ;;  %3855 = vmatmul.mubr.f32.gmra.mrb[24].mxu1 %v7670_v55  ;;  %v3979_v41 = vld [vmem:[%s8926_s5 + $0x38] sm:$0xff] }
 0x5a2   : > { %4988 = vmatprep.mubr.msk.f32.mxu1 %vm2625_vm5, %v7680_v42  ;;  %v5003_v62 = vld [vmem:[%s8926_s5 + $0xf0] sm:$0xff] }
 0x5a5   : > { %3861 = vmatmul.mubr.f32.gmra.mrb[172].mxu1 %v7682_v23 }
 0x5a6   : > { %4989 = vmatprep.mubr.msk.f32.mxu1 %vm2625_vm5, %v7692_v46 }
 0x5a8   : > { %v3338_v47 = vpop.f32.mrb[100].mxu1 }
 0x5a9   : > { %v3339_v32 = vpop.f32.mrb[101].mxu1  ;;  %3865 = vmatmul.mubr.f32.gmra.mrb[28].mxu1 %v7694_v43  ;;  %v5004_v47 = vld [vmem:[%s8926_s5 + $0xf8] sm:$0xff] }
 0x5aa   : > { %4990 = vmatprep.mubr.msk.f32.mxu1 %vm2625_vm5, %v7701_v60  ;;  %v5420_v32 = vpack.c.bf16 %v3979_v41, %v3978_v56 }
 0x5ac   : > { %5421 = vmatpush1.bf16.msra.mxu0 %v5420_v32 }
 0x5ad   : > { %3871 = vmatmul.mubr.f32.gmra.mrb[174].mxu1 %v7703_v54  ;;  %5422 = vmatprep.subr.bf16.mxu0 %v6022_v36 }
 0x5b0   : > { %v3348_v53 = vpop.f32.mrb[102].mxu1 }
 0x5b1   : > { %v3349_v59 = vpop.f32.mrb[103].mxu1 }
 0x5b2   : > { %v5456_v59 = vpack.c.bf16 %v5004_v47, %v5003_v62  ;;  %v3984_v62 = vld [vmem:[%s8926_s5 + $0x60] sm:$0xff]  ;;  %v3985_v47 = vld [vmem:[%s8926_s5 + $0x68] sm:$0xff] }
 0x5b4   : > { %v3352_v17 = vpop.f32.mrb[104].mxu1  ;;  %5457 = vmatpush1.bf16.msra.mxu1 %v5456_v59 }
 0x5b5   : > { %v3353_v1 = vpop.f32.mrb[105].mxu1  ;;  %5458 = vmatprep.subr.bf16.mxu1 %v6022_v36 }
 0x5b6   : > { %v5005_v1 = vld [vmem:[%s8926_s5 + $0x100] sm:$0xff] }
 0x5b8   : > { %v3356_v13 = vpop.f32.mrb[106].mxu1 }
 0x5b9   : > { %v3357_v51 = vpop.f32.mrb[107].mxu1  ;;  %v5006_v13 = vld [vmem:[%s8926_s5 + $0x108] sm:$0xff] }
 0x5ba   : > { %v5459_v51 = vpack.c.bf16 %v5006_v13, %v5005_v1  ;;  %v3986_v1 = vld [vmem:[%s8926_s5 + $0x70] sm:$0xff]  ;;  %v3987_v13 = vld [vmem:[%s8926_s5 + $0x78] sm:$0xff] }
 0x5bc   : > { %v3360_v34 = vpop.f32.mrb[108].mxu1  ;;  %5460 = vmatpush1.bf16.msra.mxu1 %v5459_v51  ;;  %v5432_v51 = vpack.c.bf16 %v3987_v13, %v3986_v1 }
 0x5bd   : > { %v3361_v33 = vpop.f32.mrb[109].mxu1  ;;  %v5007_v34 = vld [vmem:[%s8926_s5 + $0x110] sm:$0xff]  ;;  %5461 = vmatprep.subr.bf16.mxu1 %v6022_v36 }
 0x5be   : > { %v5008_v33 = vld [vmem:[%s8926_s5 + $0x118] sm:$0xff] }
 0x5c0   : > { %v3364_v12 = vpop.f32.mrb[110].mxu1 }
 0x5c1   : > { %v3365_v40 = vpop.f32.mrb[111].mxu1 }
 0x5c2   : > { %v5462_v40 = vpack.c.bf16 %v5008_v33, %v5007_v34 }
 0x5c4   : > { %v3510_v45 = vpop.f32.mrb[112].mxu1  ;;  %5463 = vmatpush1.bf16.msra.mxu1 %v5462_v40  ;;  %v3989_v40 = vld [vmem:[%s8926_s5 + $0x88] sm:$0xff] }
 0x5c5   : > { %v3511_v6 = vpop.f32.mrb[113].mxu1  ;;  %5464 = vmatprep.subr.bf16.mxu1 %v6022_v36 }
 0x5c6   : > { %v5009_v6 = vld [vmem:[%s8926_s5 + $0x120] sm:$0xff] }
 0x5c8   : > { %v3514_v48 = vpop.f32.mrb[114].mxu1 }
 0x5c9   : > { %v3515_v29 = vpop.f32.mrb[115].mxu1  ;;  %v5010_v48 = vld [vmem:[%s8926_s5 + $0x128] sm:$0xff] }
 0x5cc   : > { %v3518_v57 = vpop.f32.mrb[116].mxu1 }
 0x5cd   : > { %v3519_v55 = vpop.f32.mrb[117].mxu1  ;;  %v5465_v57 = vpack.c.bf16 %v5010_v48, %v5009_v6 }
 0x5cf   : > { %5466 = vmatpush1.bf16.msra.mxu1 %v5465_v57  ;;  %v3991_v57 = vld [vmem:[%s8926_s5 + $0x98] sm:$0xff] }
 0x5d0   : > { %v3522_v42 = vpop.f32.mrb[118].mxu1  ;;  %5467 = vmatprep.subr.bf16.mxu1 %v6022_v36 }
 0x5d1   : > { %v3523_v23 = vpop.f32.mrb[119].mxu1  ;;  %v5011_v42 = vld [vmem:[%s8926_s5 + $0x130] sm:$0xff] }
 0x5d2   : > { %v5012_v23 = vld [vmem:[%s8926_s5 + $0x138] sm:$0xff] }
 0x5d4   : > { %v3526_v46 = vpop.f32.mrb[120].mxu1 }
 0x5d5   : > { %v3527_v43 = vpop.f32.mrb[121].mxu1 }
 0x5d6   : > { %v5468_v43 = vpack.c.bf16 %v5012_v23, %v5011_v42 }
 0x5d8   : > { %v3530_v60 = vpop.f32.mrb[122].mxu1  ;;  %5469 = vmatpush1.bf16.msra.mxu1 %v5468_v43 }
 0x5d9   : > { %v3531_v54 = vpop.f32.mrb[123].mxu1  ;;  %5470 = vmatprep.subr.bf16.mxu1 %v6022_v36 }
 0x5e0   : > { %v3540_v3 = vpop.f32.mrb[124].mxu1 }
 0x5e1   : > { %v3541_v37 = vpop.f32.mrb[125].mxu1 }
 0x5e8   : > { %v3550_v4 = vpop.f32.mrb[126].mxu1 }
 0x5e9   : > { %v3551_v63 = vpop.f32.mrb[127].mxu1 }
 0x5f0   : > { %v3560_v61 = vpop.f32.mrb[128].mxu1 }
 0x5f1   : > { %v3561_v5 = vpop.f32.mrb[129].mxu1 }
 0x5f8   : > { %v3570_v31 = vpop.f32.mrb[130].mxu1 }
 0x5f9   : > { %v3571_v49 = vpop.f32.mrb[131].mxu1 }
 0x600   : > { %v3580_v22 = vpop.f32.mrb[132].mxu1 }
 0x601   : > { %v3581_v20 = vpop.f32.mrb[133].mxu1 }
 0x608   : > { %v3590_v7 = vpop.f32.mrb[134].mxu1 }
 0x609   : > { %v3591_v21 = vpop.f32.mrb[135].mxu1  ;;  %v3981_v7 = vld [vmem:[%s8926_s5 + $0x48] sm:$0xff] }
 0x60a   : > { %v5423_v11 = vpack.c.bf16 %v3981_v7, %v3980_v24 }
 0x60c   : > { %5424 = vmatpush1.bf16.msra.mxu0 %v5423_v11 }
 0x60d   : > { %5425 = vmatprep.subr.bf16.mxu0 %v6022_v36 }
 0x610   : > { %v3600_v53 = vpop.f32.mrb[136].mxu1  ;;  %5427 = vmatpush1.bf16.msra.mxu0 %v5426_v50  ;;  %v5019_v50 = vld [vmem:[%s8926_s5 + $0x168] sm:$0xff] }
 0x611   : > { %v3601_v17 = vpop.f32.mrb[137].mxu1  ;;  %5428 = vmatprep.subr.bf16.mxu0 %v6022_v36  ;;  %v5429_v53 = vpack.c.bf16 %v3985_v47, %v3984_v62 }
 0x614   : > { %5430 = vmatpush1.bf16.msra.mxu0 %v5429_v53 }
 0x615   : > { %5431 = vmatprep.subr.bf16.mxu0 %v6022_v36 }
 0x618   : > { %v3610_v12 = vpop.f32.mrb[138].mxu1  ;;  %5433 = vmatpush1.bf16.msra.mxu0 %v5432_v51 }
 0x619   : > { %v3611_v45 = vpop.f32.mrb[139].mxu1  ;;  %5434 = vmatprep.subr.bf16.mxu0 %v6022_v36  ;;  %v3988_v12 = vld [vmem:[%s8926_s5 + $0x80] sm:$0xff] }
 0x61a   : > { %v5435_v45 = vpack.c.bf16 %v3989_v40, %v3988_v12 }
 0x61c   : > { %v3614_v29 = vpop.f32.mrb[140].mxu1  ;;  %5436 = vmatpush1.bf16.msra.mxu0 %v5435_v45 }
 0x61d   : > { %v3615_v55 = vpop.f32.mrb[141].mxu1  ;;  %5437 = vmatprep.subr.bf16.mxu0 %v6022_v36  ;;  %v3990_v29 = vld [vmem:[%s8926_s5 + $0x90] sm:$0xff] }
 0x61e   : > { %v5438_v55 = vpack.c.bf16 %v3991_v57, %v3990_v29 }
 0x620   : > { %v3618_v46 = vpop.f32.mrb[142].mxu1  ;;  %5439 = vmatpush1.bf16.msra.mxu0 %v5438_v55 }
 0x621   : > { %v3619_v60 = vpop.f32.mrb[143].mxu1 }
 0x624   : > { %v3764_v54 = vpop.f32.mrb[144].mxu1 }
 0x625   : > { %v3765_v3 = vpop.f32.mrb[145].mxu1 }
 0x628   : > { %v3768_v37 = vpop.f32.mrb[146].mxu1 }
 0x629   : > { %v3769_v4 = vpop.f32.mrb[147].mxu1 }
 0x62c   : > { %v3772_v63 = vpop.f32.mrb[148].mxu1 }
 0x62d   : > { %v3773_v61 = vpop.f32.mrb[149].mxu1 }
 0x630   : > { %v3776_v5 = vpop.f32.mrb[150].mxu1 }
 0x631   : > { %v3777_v31 = vpop.f32.mrb[151].mxu1 }
 0x634   : > { %v3780_v49 = vpop.f32.mrb[152].mxu1 }
 0x635   : > { %v3781_v26 = vpop.f32.mrb[153].mxu1 }
 0x638   : > { %v3784_v28 = vpop.f32.mrb[154].mxu1 }
 0x639   : > { %v3785_v9 = vpop.f32.mrb[155].mxu1 }
 0x63a   : > { %v3943_v9 = vld [vmem:[%s8925_s4] sm:$0x3] }
 0x63c   : > { %v3788_v22 = vpop.f32.mrb[156].mxu1 }
 0x63d   : > { %v3789_v20 = vpop.f32.mrb[157].mxu1 }
 0x63e   : > { %v8971_v20 = vld [vmem:[#allocation14_spill] sm:$0xff] }
 0x640   : > { %v3792_v58 = vpop.f32.mrb[158].mxu1 }
 0x641   : > { %v3793_v10 = vpop.f32.mrb[159].mxu1  ;;  %v8972_v58 = vsub.s32 1, %v8971_v20 }
 0x643   : > { %v8702_v10 = vrot.slane %v3943_v9, %v8972_v58 }
 0x644   : > { %v3796_v52 = vpop.f32.mrb[0].mxu1 }
 0x645   : > { %v3798_v19 = vpop.f32.mrb[1].mxu1 }
 0x648   : > { %v3802_v14 = vpop.f32.mrb[160].mxu1 }
 0x649   : > { %v3803_v39 = vpop.f32.mrb[161].mxu1 }
 0x64c   : > { %v3806_v8 = vpop.f32.mrb[4].mxu1 }
 0x64d   : > { %v8630_v15 = vmax.f32 %v3796_v52, %v3806_v8  ;;  %v3808_v25 = vpop.f32.mrb[5].mxu1  ;;  %v8973_v52 = vsub.s32 0, %v8971_v20 }
 0x64e   : > { %v8632_v0 = vmax.f32 %v3798_v19, %v3808_v25 }
 0x64f   : > { %v8706_v19 = vrot.slane %v3943_v9, %v8973_v52  ;;  %v5033_v9 = vld [vmem:[%s8926_s5 + $0x1d8] sm:$0xff]  ;;  %v5036_v52 = vld [vmem:[%s8926_s5 + $0x1e8] sm:$0xff] }
 0x650   : > { %v3812_v2 = vpop.f32.mrb[162].mxu1 }
 0x651   : > { %v3813_v18 = vpop.f32.mrb[163].mxu1  ;;  %v5014_v2 = vld [vmem:[%s8926_s5 + $0x140] sm:$0xff] }
 0x652   : > { %v5015_v18 = vld [vmem:[%s8926_s5 + $0x148] sm:$0xff] }
 0x654   : > { %v3816_v16 = vpop.f32.mrb[8].mxu1 }
 0x655   : > { %v3818_v30 = vpop.f32.mrb[9].mxu1 }
 0x658   : > { %v3822_v38 = vpop.f32.mrb[164].mxu1 }
 0x659   : > { %v3823_v21 = vpop.f32.mrb[165].mxu1  ;;  %v5016_v38 = vld [vmem:[%s8926_s5 + $0x150] sm:$0xff] }
 0x65a   : > { %v5017_v21 = vld [vmem:[%s8926_s5 + $0x158] sm:$0xff] }
 0x65b   : > { %v5474_v44 = vpack.c.bf16 %v5017_v21, %v5016_v38  ;;  %v5043_v38 = vld [vmem:[%s8926_s5 + $0x220] sm:$0xff]  ;;  %v5044_v21 = vld [vmem:[%s8926_s5 + $0x228] sm:$0xff] }
 0x65c   : > { %v3826_v35 = vpop.f32.mrb[12].mxu1 }
 0x65d   : > { %v8647_v56 = vmax.f32 %v3816_v16, %v3826_v35  ;;  %v3828_v41 = vpop.f32.mrb[13].mxu1  ;;  %v5477_v35 = vpack.c.bf16 %v5019_v50, %v5018_v27  ;;  %v5045_v27 = vld [vmem:[%s8926_s5 + $0x230] sm:$0xff]  ;;  %v5046_v50 = vld [vmem:[%s8926_s5 + $0x238] sm:$0xff] }
 0x65e   : > { %v3894_v32 = vmax.f32 %v3818_v30, %v3828_v41  ;;  %v5471_v30 = vpack.c.bf16 %v5015_v18, %v5014_v2  ;;  %v5021_v41 = vld [vmem:[%s8926_s5 + $0x178] sm:$0xff] }
 0x65f   : > { %3911 = vrot.lane.b32.xlu0 %v8647_v56, %s6021_s19 }
 0x660   : > { %3913 = vrot.lane.b32.xlu1 %v3894_v32, %s6021_s19  ;;  %v3832_v59 = vpop.f32.mrb[166].mxu1 }
 0x661   : > { %v3833_v17 = vpop.f32.mrb[167].mxu1  ;;  %v5022_v59 = vld [vmem:[%s8926_s5 + $0x180] sm:$0xff] }
 0x662   : > { %v5023_v17 = vld [vmem:[%s8926_s5 + $0x188] sm:$0xff] }
 0x663   : > { %v5483_v40 = vpack.c.bf16 %v5023_v17, %v5022_v59  ;;  %v5051_v17 = vld [vmem:[%s8926_s5 + $0x260] sm:$0xff] }
 0x664   : > { %v3836_v34 = vpop.f32.mrb[16].mxu1 }
 0x665   : > { %v3838_v33 = vpop.f32.mrb[17].mxu1 }
 0x668   : > { %v3842_v6 = vpop.f32.mrb[168].mxu1 }
 0x669   : > { %v3843_v48 = vpop.f32.mrb[169].mxu1  ;;  %v5024_v6 = vld [vmem:[%s8926_s5 + $0x190] sm:$0xff] }
 0x66a   : > { %v5025_v48 = vld [vmem:[%s8926_s5 + $0x198] sm:$0xff] }
 0x66b   : > { %v5486_v55 = vpack.c.bf16 %v5025_v48, %v5024_v6 }
 0x66c   : > { %v3846_v42 = vpop.f32.mrb[20].mxu1 }
 0x66d   : > { %v8680_v23 = vmax.f32 %v3836_v34, %v3846_v42  ;;  %v3848_v46 = vpop.f32.mrb[21].mxu1  ;;  %v5026_v42 = vld [vmem:[%s8926_s5 + $0x1a0] sm:$0xff] }
 0x66e   : > { %v3896_v43 = vmax.f32 %v3838_v33, %v3848_v46  ;;  %v5027_v46 = vld [vmem:[%s8926_s5 + $0x1a8] sm:$0xff] }
 0x66f   : > { %3915 = vrot.lane.b32.xlu0 %v8680_v23, %s6021_s19 }
 0x670   : > { %3917 = vrot.lane.b32.xlu1 %v3896_v43, %s6021_s19  ;;  %v3852_v60 = vpop.f32.mrb[170].mxu1 }
 0x671   : > { %v3853_v54 = vpop.f32.mrb[171].mxu1  ;;  %v5028_v60 = vld [vmem:[%s8926_s5 + $0x1b0] sm:$0xff] }
 0x672   : > { %v5029_v54 = vld [vmem:[%s8926_s5 + $0x1b8] sm:$0xff] }
 0x673   : > { %3907 = vrot.lane.b32.xlu0 %v8630_v15, %s6021_s19 }
 0x674   : > { %3909 = vrot.lane.b32.xlu1 %v8632_v0, %s6021_s19  ;;  %v3856_v3 = vpop.f32.mrb[24].mxu1 }
 0x675   : > { %v3858_v37 = vpop.f32.mrb[25].mxu1 }
 0x678   : > { %v3862_v4 = vpop.f32.mrb[172].mxu1 }
 0x679   : > { %v3863_v63 = vpop.f32.mrb[173].mxu1  ;;  %v5031_v4 = vld [vmem:[%s8926_s5 + $0x1c8] sm:$0xff] }
 0x67c   : > { %v3866_v61 = vpop.f32.mrb[28].mxu1 }
 0x67d   : > { %v8689_v5 = vmax.f32 %v3856_v3, %v3866_v61  ;;  %v3868_v31 = vpop.f32.mrb[29].mxu1  ;;  %v5492_v3 = vpack.c.bf16 %v5029_v54, %v5028_v60 }
 0x67e   : > { %v8691_v49 = vmax.f32 %v3858_v37, %v3868_v31  ;;  %v5030_v37 = vld [vmem:[%s8926_s5 + $0x1c0] sm:$0xff] }
 0x67f   : > { %3919 = vrot.lane.b32.xlu0 %v8689_v5, %s6021_s19  ;;  %v5495_v31 = vpack.c.bf16 %v5031_v4, %v5030_v37 }
 0x680   : > { %3921 = vrot.lane.b32.xlu1 %v8691_v49, %s6021_s19  ;;  %v3872_v26 = vpop.f32.mrb[174].mxu1  ;;  %s5952_s19 = sshll.u32 %s6023_s18, 4  ;;  %s5953_s19 = int_to_ptr.vmem [resolvable:$false] %s5952_s19 }
 0x681   : > { %v3873_v28 = vpop.f32.mrb[175].mxu1  ;;  %s5954_s20 = scalar_lea.vmem %s5953_s19, 256  ;;  %p5955_p4 = scmp.lt.s32.totalorder %s8879_s11, %s5953_s19 }
 0x682   : > { %v5032_v28 = vld [vmem:[%s8926_s5 + $0x1d0] sm:$0xff]  ;;  %p5956_p7 = scmp.lt.s32.totalorder %s5954_s20, %s5948_s28 }
 0x683   : > { %v5498_v20 = vpack.c.bf16 %v5033_v9, %v5032_v28 }
 0x684   : > { %p5957_p8 = por %p5956_p7, %p5955_p4 }
 0x686   : > { %p5958_p9 = pnand %p5957_p8, %p5951_p3 }
 0x6d1   : > { %v3912_v22 = vpop.permute.xlu0 %3911 }
 0x6d2   : > { %v3914_v14 = vpop.permute.xlu1 %3913 }
 0x6d3   : > { %v3924_v39 = vsel %vm2283_vm4, %v3912_v22, %v3914_v14  ;;  %v3938_v8 = vmax.f32 %v3894_v32, %v3914_v14 }
 0x6d4   : > { %v3937_v25 = vmax.f32 %v8647_v56, %v3924_v39  ;;  %v5020_v56 = vld [vmem:[%s8926_s5 + $0x170] sm:$0xff] }
 0x6d5   : > { %v3958_v16 = vadd.f32 %v8702_v10, %v3938_v8  ;;  %v5480_v53 = vpack.c.bf16 %v5021_v41, %v5020_v56  ;;  %v5047_v56 = vld [vmem:[%s8926_s5 + $0x240] sm:$0xff]  ;;  %v5048_v41 = vld [vmem:[%s8926_s5 + $0x248] sm:$0xff] }
 0x6d6   : > { %v3957_v24 = vadd.f32 %v8706_v19, %v3937_v25  ;;  %v5038_v25 = vld [vmem:[%s8926_s5 + $0x1f8] sm:$0xff] }
 0x6d7   : > { %v3966_v7 = vmax.f32 %v3958_v16, 0.0  ;;  %v5040_v16 = vld [vmem:[%s8926_s5 + $0x208] sm:$0xff] }
 0x6d8   : > { %v3965_v11 = vmax.f32 %v3957_v24, 0.0 }
 0x6d9   : > { %5013 = vmatprep.mubr.msk.f32.mxu1 %vm3992_vm6, %v3966_v7  ;;  %v5041_v7 = vld [vmem:[%s8926_s5 + $0x210] sm:$0xff] }
 0x6da   : > { %4162 = vmatmul.mubr.f32.vlgmr.msra.gmra.mrb[176].mxu1 %v3965_v11 }
 0x6db   : > { %5472 = vmatpush1.bf16.msra.mxu1 %v5471_v30  ;;  %v5042_v30 = vld [vmem:[%s8926_s5 + $0x218] sm:$0xff] }
 0x6dc   : > { %5473 = vmatprep.subr.bf16.mxu1 %v6022_v36  ;;  %v5510_v11 = vpack.c.bf16 %v5042_v30, %v5041_v7 }
 0x6df   : > { %5475 = vmatpush1.bf16.msra.mxu1 %v5474_v44  ;;  %v5513_v44 = vpack.c.bf16 %v5044_v21, %v5043_v38 }
 0x6e0   : > { %5476 = vmatprep.subr.bf16.mxu1 %v6022_v36 }
 0x6e1   : > { %v3916_v62 = vpop.permute.xlu0 %3915 }
 0x6e2   : > { %v3918_v47 = vpop.permute.xlu1 %3917 }
 0x6e3   : > { %5478 = vmatpush1.bf16.msra.mxu1 %v5477_v35  ;;  %v3940_v32 = vmax.f32 %v3896_v43, %v3918_v47  ;;  %v5489_v43 = vpack.c.bf16 %v5027_v46, %v5026_v42  ;;  %v3925_v63 = vsel %vm2283_vm4, %v3916_v62, %v3918_v47  ;;  %v5516_v35 = vpack.c.bf16 %v5046_v50, %v5045_v27  ;;  %v5049_v47 = vld [vmem:[%s8926_s5 + $0x250] sm:$0xff] }
 0x6e4   : > { %5479 = vmatprep.subr.bf16.mxu1 %v6022_v36  ;;  %v3939_v26 = vmax.f32 %v8680_v23, %v3925_v63  ;;  %v5035_v23 = vld [vmem:[%s8926_s5 + $0x1e0] sm:$0xff]  ;;  %v5519_v62 = vpack.c.bf16 %v5048_v41, %v5047_v56 }
 0x6e5   : > { %v3960_v1 = vadd.f32 %v8702_v10, %v3940_v32  ;;  %v3908_v13 = vpop.permute.xlu0 %3907  ;;  %v5501_v39 = vpack.c.bf16 %v5036_v52, %v5035_v23  ;;  %v5050_v32 = vld [vmem:[%s8926_s5 + $0x258] sm:$0xff] }
 0x6e6   : > { %v3910_v51 = vpop.permute.xlu1 %3909  ;;  %v3959_v58 = vadd.f32 %v8706_v19, %v3939_v26  ;;  %v5522_v59 = vpack.c.bf16 %v5050_v32, %v5049_v47 }
 0x6e7   : > { %v3968_v34 = vmax.f32 %v3960_v1, 0.0  ;;  %5481 = vmatpush1.bf16.msra.mxu1 %v5480_v53  ;;  %v3923_v33 = vsel %vm2283_vm4, %v3908_v13, %v3910_v51  ;;  %v3936_v12 = vmax.f32 %v8632_v0, %v3910_v51  ;;  %v5052_v1 = vld [vmem:[%s8926_s5 + $0x268] sm:$0xff] }
 0x6e8   : > { %v3935_v45 = vmax.f32 %v8630_v15, %v3923_v33  ;;  %5482 = vmatprep.subr.bf16.mxu1 %v6022_v36  ;;  %v3967_v8 = vmax.f32 %v3959_v58, 0.0  ;;  %v5525_v51 = vpack.c.bf16 %v5052_v1, %v5051_v17  ;;  %v5053_v33 = vld [vmem:[%s8926_s5 + $0x270] sm:$0xff] }
 0x6e9   : > { %v3956_v29 = vadd.f32 %v8702_v10, %v3936_v12  ;;  %5034 = vmatprep.mubr.msk.f32.mxu1 %vm3992_vm6, %v3968_v34  ;;  %v5054_v12 = vld [vmem:[%s8926_s5 + $0x278] sm:$0xff] }
 0x6ea   : > { %v3955_v57 = vadd.f32 %v8706_v19, %v3935_v45 }
 0x6eb   : > { %v3964_v0 = vmax.f32 %v3956_v29, 0.0  ;;  %5484 = vmatpush1.bf16.msra.mxu1 %v5483_v40  ;;  %v5528_v40 = vpack.c.bf16 %v5054_v12, %v5053_v33  ;;  %v4992_v29 = vld [vmem:[%s8927_s6] ss:$0 sm:$0xff] }
 0x6ec   : > { %v3963_v15 = vmax.f32 %v3955_v57, 0.0  ;;  %5485 = vmatprep.subr.bf16.mxu1 %v6022_v36 }
 0x6ed   : > { %4991 = vmatprep.mubr.msk.f32.mxu0 %vm3992_vm6, %v3964_v0 }
 0x6ee   : > { %4061 = vmatmul.mubr.f32.vlgmr.msra.gmra.mrb[120].mxu0 %v3963_v15 }
 0x6ef   : > { %5487 = vmatpush1.bf16.msra.mxu1 %v5486_v55 }
 0x6f0   : > { %5488 = vmatprep.subr.bf16.mxu1 %v6022_v36 }
 0x6f1   : > { %v3920_v53 = vpop.permute.xlu0 %3919 }
 0x6f2   : > { %v3922_v61 = vpop.permute.xlu1 %3921 }
 0x6f3   : > { %5490 = vmatpush1.bf16.msra.mxu1 %v5489_v43  ;;  %v3942_v22 = vmax.f32 %v8691_v49, %v3922_v61  ;;  %v5037_v49 = vld [vmem:[%s8926_s5 + $0x1f0] sm:$0xff]  ;;  %v3926_v13 = vsel %vm2283_vm4, %v3920_v53, %v3922_v61 }
 0x6f4   : > { %5491 = vmatprep.subr.bf16.mxu1 %v6022_v36  ;;  %v5504_v18 = vpack.c.bf16 %v5038_v25, %v5037_v49  ;;  %v3941_v34 = vmax.f32 %v8689_v5, %v3926_v13 }
 0x6f5   : > { %v3962_v14 = vadd.f32 %v8702_v10, %v3942_v22  ;;  %v5039_v10 = vld [vmem:[%s8926_s5 + $0x200] sm:$0xff] }
 0x6f6   : > { %v5507_v24 = vpack.c.bf16 %v5040_v16, %v5039_v10  ;;  %v3961_v45 = vadd.f32 %v8706_v19, %v3941_v34 }
 0x6f7   : > { %5493 = vmatpush1.bf16.msra.mxu1 %v5492_v3  ;;  %v3970_v2 = vmax.f32 %v3962_v14, 0.0 }
 0x6f8   : > { %5494 = vmatprep.subr.bf16.mxu1 %v6022_v36  ;;  %v3969_v6 = vmax.f32 %v3961_v45, 0.0 }
 0x6fb   : > { %5496 = vmatpush1.bf16.msra.mxu1 %v5495_v31 }
 0x6fc   : > { %5497 = vmatprep.subr.bf16.mxu1 %v6022_v36 }
 0x6ff   : > { %5499 = vmatpush1.bf16.msra.mxu1 %v5498_v20 }
 0x700   : > { %5500 = vmatprep.subr.bf16.mxu1 %v6022_v36 }
 0x702   : > { %4257 = vmatmul.mubr.f32.vlgmr.msra.gmra.mrb[176].mxu1 %v3967_v8 }
 0x703   : > { %5502 = vmatpush1.bf16.msra.mxu1 %v5501_v39  ;;  %5055 = vmatprep.mubr.msk.f32.mxu1 %vm3992_vm6, %v3970_v2 }
 0x704   : > { %5503 = vmatprep.subr.bf16.mxu1 %v6022_v36 }
 0x707   : > { %5505 = vmatpush1.bf16.msra.mxu1 %v5504_v18 }
 0x708   : > { %5506 = vmatprep.subr.bf16.mxu1 %v6022_v36 }
 0x70b   : > { %5508 = vmatpush1.bf16.msra.mxu1 %v5507_v24 }
 0x70c   : > { %5509 = vmatprep.subr.bf16.mxu1 %v6022_v36 }
 0x70f   : > { %5511 = vmatpush1.bf16.msra.mxu1 %v5510_v11 }
 0x710   : > { %5512 = vmatprep.subr.bf16.mxu1 %v6022_v36 }
 0x713   : > { %5514 = vmatpush1.bf16.msra.mxu1 %v5513_v44 }
 0x714   : > { %5515 = vmatprep.subr.bf16.mxu1 %v6022_v36 }
 0x717   : > { %5517 = vmatpush1.bf16.msra.mxu1 %v5516_v35 }
 0x718   : > { %5518 = vmatprep.subr.bf16.mxu1 %v6022_v36 }
 0x71b   : > { %5520 = vmatpush1.bf16.msra.mxu1 %v5519_v62 }
 0x71c   : > { %5521 = vmatprep.subr.bf16.mxu1 %v6022_v36 }
 0x71f   : > { %5523 = vmatpush1.bf16.msra.mxu1 %v5522_v59 }
 0x720   : > { %5524 = vmatprep.subr.bf16.mxu1 %v6022_v36 }
 0x723   : > { %5526 = vmatpush1.bf16.msra.mxu1 %v5525_v51 }
 0x724   : > { %5527 = vmatprep.subr.bf16.mxu1 %v6022_v36 }
 0x727   : > { %5529 = vmatpush1.bf16.msra.mxu1 %v5528_v40 }
 0x72a   : > { %4352 = vmatmul.mubr.f32.vlgmr.msra.gmra.mrb[176].mxu1 %v3969_v6 }
 0x7c1   : > { %v4062_v5 = vpop.f32.mrb[120].mxu0 }
 0x7c2   : > { %v4064_v48 = vpop.f32.mrb[121].mxu0  ;;  %v4072_v57 = vadd.f32 %v4992_v29, %v4062_v5 }
 0x7fd   : > { %v4353_v0 = vpop.f32.mrb[176].mxu1 }
 0x7fe   : > { %v5531_v19 = vadd.f32 %v4353_v0, %v4072_v57  ;;  %v4355_v36 = vpop.f32.mrb[177].mxu1 }
 0x800   : > { %4359 = vst.msk [vmem:[%s449_s17] sm:$0xff] %vm4358_vm7, %v5531_v19 }
 0x801   : > { %5961 = shalt.err (!%p5958_p9)
}
 0x802   : > { %s5962_s16 = scalar_lea.hbm %s8877_s14, 128  ;;  %s5966_s23 = scalar_lea.hbm %s8928_s7, 256 }
 0x803   : > { %p5963_p13 = scmp.ne.s32.totalorder %s8877_s14, %s5962_s16  ;;  %p5967_p6 = scmp.lt.u32.totalorder %s8877_s14, %s8928_s7 }
 0x804   : > { %p5968_p10 = scmp.lt.u32.totalorder %s5966_s23, %s5962_s16  ;;  %p5970_p0 = scmp.lt.u32.totalorder %s5962_s16, %s8877_s14 }
 0x805   : > { %p5964_p2 = pnand %p5963_p13, %p8974_p12 }
 0x806   : > { %p5969_p11 = por %p5968_p10, %p5967_p6 }
 0x807   : > { %p5965_p5 = pneg %p5964_p2 }
 0x808   : > { %p5971_p3 = por %p5970_p0, %p5969_p11 }
 0x80a   : > { %p5972_p4 = pnand %p5971_p3, %p5965_p5 }
 0x80c   : > { %5975 = shalt.err (!%p5972_p4)
}
 0x80d   : > { %5804 = dma.vmem_to_hbm [thread:$0]  (%p8974_p12), %s8879_s11, 128, %s8877_s14, %s4361_s15  }
 0x80e PF: > { %s4386_s8 = sand.u32 1, %s6002_s24   ;;  %p8975_p7 = scmp.ne.s32.totalorder %s8947_s13, 0 }
 0x80f   : > { %s4387_s9 = scalar_lea.sflag [#allocation5], %s4386_s8 }
 0x810   : > { %p5811_p8 = pnand %p4454_p1, %p8975_p7 }
 0x812   : > { %5997 = dma.done.wait (!%p5811_p8), %s4387_s9, 128  }
 0x813   : > { %5999 = vsyncadd (!%p5811_p8), %s4387_s9, 4294967168  ;;  %p18_p9 = scmp.ge.s32.totalorder %s6089_s30, 4   ;;  %s8976_s24 = smov %s6006_s25 }
 0x814   : > { %s8977_s25 = smov %s6010_s26  ;;  %s8978_s26 = smov %s6101_s10 }
 0x815   : > { %s8979_s27 = smov %s6089_s30  ;;  %20 = sbr.rel (!%p18_p9) target bundleno = 4 (0x4), region = 142 }
 0x81c   :  { %4392 = vsyncpa [#allocation4], 1 }
 0x81d   :  { %4394 = vsyncpa [#allocation4 + $0x1], 1 }
 0x81e   :  { %4395 = vsyncpa [#allocation5], 1 }
 0x81f   :  { %4397 = vsyncpa [#allocation5 + $0x1], 1 }

</bundles_post_ra>
